<compile_context>
chip_gen: v6e
topology: v6e:2x2x1
jax: 0.10.0
libtpu: 0.0.40
codegen_flags: <defaults>
</compile_context>

<pallas_src>
import math

import jax
import jax.numpy as jnp
from jax.experimental import pallas as pl
from jax.experimental.pallas import tpu as pltpu


def _round_up(x, m):
    return ((x + m - 1) // m) * m


# ----------------------------- kernel ----------------------------------------

def _make_kernel(has_emb):
    def kernel(x_ref, wlin_ref, blin_ref, wl_ref, bl_ref, wr_ref,
               idx_ref, ew_ref, *rest):
        if has_emb:
            emb_ref, out_ref, xl_scr, sum_scr, cnt_scr = rest
        else:
            emb_ref = None
            out_ref, xl_scr, sum_scr, cnt_scr = rest

        k = pl.program_id(0)
        n_pad = xl_scr.shape[0]
        te = idx_ref.shape[1]

        @pl.when(k == 0)
        def _init():
            # x_l = lin(x), computed once, kept resident in VMEM as bf16.
            xl = (jnp.dot(x_ref[...], wlin_ref[...],
                          preferred_element_type=jnp.float32)
                  + blin_ref[...])
            xl_scr[...] = xl.astype(xl_scr.dtype)
            sum_scr[...] = jnp.zeros_like(sum_scr)
            cnt_scr[...] = jnp.zeros_like(cnt_scr)

        # One-hot node-vs-edge masks, (N_pad, TE), built from lane-dense
        # (1, TE) index rows.  0/1 values are exact in bf16.
        node_ids = jax.lax.broadcasted_iota(jnp.int32, (n_pad, te), 0)
        src_oh = (node_ids == idx_ref[0:1, :]).astype(jnp.bfloat16)   # (N, TE)
        dst_oh = (node_ids == idx_ref[1:2, :]).astype(jnp.bfloat16)   # (N, TE)

        # Gather x_l[src]: src_oh^T @ x_l  -> (TE, C_in), bf16 MXU, f32 acc.
        gathered = jax.lax.dot_general(
            src_oh, xl_scr[...],
            dimension_numbers=(((0,), (0,)), ((), ())),
            preferred_element_type=jnp.float32)

        pre = gathered + emb_ref[...] if has_emb else gathered
        msg = jax.nn.gelu(pre, approximate=True).astype(jnp.bfloat16)  # (TE, C)

        # Scatter-add by dst; edge_weight folded into the one-hot columns.
        dst_oh_w = dst_oh * ew_ref[...].astype(jnp.bfloat16)           # (N, TE)
        sum_scr[...] += jnp.dot(dst_oh_w, msg,
                                preferred_element_type=jnp.float32)
        # Count uses the UNWEIGHTED one-hot (exact integers after f32 cast).
        cnt_scr[...] += jnp.sum(dst_oh.astype(jnp.float32), axis=1,
                                keepdims=True)

        @pl.when(k == pl.num_programs(0) - 1)
        def _finalize():
            # scatter_mean: sum / clamp(count, min=1); isolated nodes stay 0.
            agg = sum_scr[...] / jnp.maximum(cnt_scr[...], 1.0)
            out_ref[...] = (
                jnp.dot(agg, wl_ref[...], preferred_element_type=jnp.float32)
                + bl_ref[...]
                + jnp.dot(x_ref[...], wr_ref[...],
                          preferred_element_type=jnp.float32)
            ).astype(out_ref.dtype)

    return kernel


# ----------------------------- wrapper ----------------------------------------

def sage_conv_multi_edgeset(x, edge_index, edge_attr, edge_weight,
                            w_lin, b_lin, w_l, b_l, w_r, *, edge_tile=512):
    """Eval-mode forward of SAGEConvMultiEdgeset.

    x:           (N, C_in) float32 node features
    edge_index:  (2, E) int   [src_row, dst_row]
    edge_attr:   (E, C_in) float32 edge embeddings (bond_encoder output) or None
    edge_weight: (E, 1) or (E,) float32
    w_lin/(b_lin): (C_in, C_in)/(C_in,)    -- self.lin   (weights already (in, out))
    w_l/(b_l):     (C_in, C_out)/(C_out,)  -- self.lin_l
    w_r:           (C_in, C_out)           -- self.lin_r (no bias)
    Returns (N, C_out) float32.
    """
    n_nodes, c_in = x.shape
    c_out = w_l.shape[1]
    n_edges = edge_index.shape[1]
    has_emb = edge_attr is not None

    # Lane-dense feature dims (multiples of 128); sublane-aligned node count.
    ci = _round_up(c_in, 128)
    co = _round_up(c_out, 128)
    npad = _round_up(n_nodes, 8)

    f32 = jnp.float32
    x_p = jnp.zeros((npad, ci), f32).at[:n_nodes, :c_in].set(x.astype(f32))
    wlin_p = jnp.zeros((ci, ci), f32).at[:c_in, :c_in].set(jnp.asarray(w_lin, f32))
    blin_p = jnp.zeros((1, ci), f32).at[0, :c_in].set(jnp.asarray(b_lin, f32))
    wl_p = jnp.zeros((ci, co), f32).at[:c_in, :c_out].set(jnp.asarray(w_l, f32))
    bl_p = jnp.zeros((1, co), f32).at[0, :c_out].set(jnp.asarray(b_l, f32))
    wr_p = jnp.zeros((ci, co), f32).at[:c_in, :c_out].set(jnp.asarray(w_r, f32))

    # Pad edges to a multiple of edge_tile; padded edges point at a
    # non-existent node (npad, out of range) with weight 0 -> contribute nothing.
    e_pad = max(edge_tile, _round_up(n_edges, edge_tile))
    pad = e_pad - n_edges
    src = jnp.pad(edge_index[0].astype(jnp.int32), (0, pad), constant_values=0)
    dst = jnp.pad(edge_index[1].astype(jnp.int32), (0, pad),
                  constant_values=npad)
    idx = jnp.stack([src, dst], axis=0)                          # (2, E_pad)

    ew = jnp.asarray(edge_weight, f32).reshape(-1)
    ew = jnp.pad(ew, (0, pad))[None, :]                          # (1, E_pad)

    const2 = lambda k: (0, 0)
    args = [x_p, wlin_p, blin_p, wl_p, bl_p, wr_p, idx, ew]
    in_specs = [
        pl.BlockSpec((npad, ci), const2),                        # x
        pl.BlockSpec((ci, ci), const2),                          # w_lin
        pl.BlockSpec((1, ci), const2),                           # b_lin
        pl.BlockSpec((ci, co), const2),                          # w_l
        pl.BlockSpec((1, co), const2),                           # b_l
        pl.BlockSpec((ci, co), const2),                          # w_r
        pl.BlockSpec((2, edge_tile), lambda k: (0, k)),          # [src; dst]
        pl.BlockSpec((1, edge_tile), lambda k: (0, k)),          # edge weight
    ]
    if has_emb:
        emb_p = jnp.zeros((e_pad, ci), f32).at[:n_edges, :c_in].set(
            edge_attr.astype(f32))
        args.append(emb_p)
        in_specs.append(pl.BlockSpec((edge_tile, ci), lambda k: (k, 0)))

    n_tiles = e_pad // edge_tile

    # Rough resident-VMEM estimate (scratch + double-buffered blocks) -> limit.
    est = (
        npad * ci * 2                        # xl scratch (bf16)
        + npad * ci * 4                      # sum scratch (f32)
        + npad * 128 * 4                     # cnt scratch (lane padded)
        + 2 * 4 * (npad * ci + ci * ci + ci + 2 * ci * co + co)   # const inputs
        + 2 * 4 * npad * co                  # output block
        + 2 * (edge_tile * 2 * 4 + edge_tile * 4)                 # idx + ew tiles
        + (2 * edge_tile * ci * 4 if has_emb else 0)              # emb tiles
    )
    vmem_limit = int(min(100 * 1024 * 1024, max(2 * est, 32 * 1024 * 1024)))

    grid_spec = pltpu.PrefetchScalarGridSpec(
        num_scalar_prefetch=0,
        grid=(n_tiles,),
        in_specs=in_specs,
        out_specs=pl.BlockSpec((npad, co), const2),
        scratch_shapes=[
            pltpu.VMEM((npad, ci), jnp.bfloat16),                # x_l (resident)
            pltpu.VMEM((npad, ci), jnp.float32),                 # scatter sum
            pltpu.VMEM((npad, 1), jnp.float32),                  # scatter count
        ],
    )

    out = pl.pallas_call(
        _make_kernel(has_emb),
        out_shape=jax.ShapeDtypeStruct((npad, co), jnp.float32),
        grid_spec=grid_spec,
        compiler_params=pltpu.CompilerParams(
            dimension_semantics=("arbitrary",),   # reduction over edge tiles
            vmem_limit_bytes=vmem_limit),
    )(*args)

    return out[:n_nodes, :c_out]


# ----------------------------- reference (pure JAX) ---------------------------

def _reference(x, edge_index, edge_attr, edge_weight,
               w_lin, b_lin, w_l, b_l, w_r):
    hp = jax.lax.Precision.HIGHEST
    x = x.astype(jnp.float32)
    x_l = jnp.dot(x, w_lin, precision=hp) + b_lin
    emb = edge_attr.astype(jnp.float32) if edge_attr is not None else 0.0
    ew = jnp.asarray(edge_weight, jnp.float32)
    if ew.ndim == 1:
        ew = ew[:, None]
    msg = jax.nn.gelu(x_l[edge_index[0]] + emb, approximate=True) * ew
    n = x.shape[0]
    ssum = jnp.zeros((n, x.shape[1]), jnp.float32).at[edge_index[1]].add(msg)
    cnt = jnp.zeros((n, 1), jnp.float32).at[edge_index[1]].add(1.0)
    agg = ssum / jnp.maximum(cnt, 1.0)
    return jnp.dot(agg, w_l, precision=hp) + b_l + jnp.dot(x, w_r, precision=hp)


# ----------------------------- demo / check -----------------------------------

if __name__ == "__main__":
    N, C_IN, C_OUT, E = 64, 32, 48, 700      # 2 edge tiles at edge_tile=512

    keys = jax.random.split(jax.random.PRNGKey(0), 10)
    x = jax.random.normal(keys[0], (N, C_IN), jnp.float32)
    src_ids = jax.random.randint(keys[1], (E,), 0, N, jnp.int32)
    dst_ids = jax.random.randint(keys[2], (E,), 0, N, jnp.int32)
    edge_index = jnp.stack([src_ids, dst_ids])
    # bond_encoder = Identity in this demo -> edge embedding == edge_attr
    edge_attr = 0.1 * jax.random.normal(keys[3], (E, C_IN), jnp.float32)
    edge_weight = jax.random.uniform(keys[4], (E, 1), jnp.float32)

    w_lin = jax.random.normal(keys[5], (C_IN, C_IN), jnp.float32) / math.sqrt(C_IN)
    b_lin = 0.1 * jax.random.normal(keys[6], (C_IN,), jnp.float32)
    w_l = jax.random.normal(keys[7], (C_IN, C_OUT), jnp.float32) / math.sqrt(C_IN)
    b_l = 0.1 * jax.random.normal(keys[8], (C_OUT,), jnp.float32)
    w_r = jax.random.normal(keys[9], (C_IN, C_OUT), jnp.float32) / math.sqrt(C_IN)

    # --- variant with edge embeddings ---
    out = sage_conv_multi_edgeset(x, edge_index, edge_attr, edge_weight,
                                  w_lin, b_lin, w_l, b_l, w_r)
    out = jax.block_until_ready(out)
    ref = jax.block_until_ready(
        _reference(x, edge_index, edge_attr, edge_weight,
                   w_lin, b_lin, w_l, b_l, w_r))

    assert out.shape == (N, C_OUT)
    assert out.dtype == jnp.float32
    assert bool(jnp.all(jnp.isfinite(out)))
    assert bool(jnp.allclose(out, ref, atol=3e-2, rtol=3e-2)), (
        "max abs diff %s" % float(jnp.max(jnp.abs(out - ref))))

    # --- variant without edge embeddings (edge_attr is None) ---
    out2 = sage_conv_multi_edgeset(x, edge_index, None, edge_weight,
                                   w_lin, b_lin, w_l, b_l, w_r)
    out2 = jax.block_until_ready(out2)
    ref2 = jax.block_until_ready(
        _reference(x, edge_index, None, edge_weight,
                   w_lin, b_lin, w_l, b_l, w_r))
    assert bool(jnp.allclose(out2, ref2, atol=3e-2, rtol=3e-2)), (
        "max abs diff %s" % float(jnp.max(jnp.abs(out2 - ref2))))

    print("KERNEL_OK")
</pallas_src>

<mosaic_0001>
module attributes {stable_mosaic.version = 11 : i64} {
  func.func @kernel(%arg0: i32, %arg1: memref<64x128xf32, #tpu.memory_space<vmem>>, %arg2: memref<128x128xf32, #tpu.memory_space<vmem>>, %arg3: memref<1x128xf32, #tpu.memory_space<vmem>>, %arg4: memref<128x128xf32, #tpu.memory_space<vmem>>, %arg5: memref<1x128xf32, #tpu.memory_space<vmem>>, %arg6: memref<128x128xf32, #tpu.memory_space<vmem>>, %arg7: memref<2x512xi32, #tpu.memory_space<vmem>>, %arg8: memref<1x512xf32, #tpu.memory_space<vmem>>, %arg9: memref<512x128xf32, #tpu.memory_space<vmem>>, %arg10: memref<64x128xf32, #tpu.memory_space<vmem>>, %arg11: memref<64x128xbf16, #tpu.memory_space<vmem>>, %arg12: memref<64x128xf32, #tpu.memory_space<vmem>>, %arg13: memref<64x1xf32, #tpu.memory_space<vmem>>) attributes {dimension_semantics = [#tpu.dimension_semantics<arbitrary>], iteration_bounds = array<i64: 2>, scalar_prefetch = 0 : i64, scratch_operands = 3 : i64, tpu.core_type = #tpu.core_type<tc>, window_params = [{pipeline_mode = #tpu.pipeline_mode<synchronous>, transform_indices = @transform_0, window_bounds = array<i64: 64, 128>}, {pipeline_mode = #tpu.pipeline_mode<synchronous>, transform_indices = @transform_1, window_bounds = array<i64: 128, 128>}, {pipeline_mode = #tpu.pipeline_mode<synchronous>, transform_indices = @transform_2, window_bounds = array<i64: 1, 128>}, {pipeline_mode = #tpu.pipeline_mode<synchronous>, transform_indices = @transform_3, window_bounds = array<i64: 128, 128>}, {pipeline_mode = #tpu.pipeline_mode<synchronous>, transform_indices = @transform_4, window_bounds = array<i64: 1, 128>}, {pipeline_mode = #tpu.pipeline_mode<synchronous>, transform_indices = @transform_5, window_bounds = array<i64: 128, 128>}, {transform_indices = @transform_6, window_bounds = array<i64: 2, 512>}, {transform_indices = @transform_7, window_bounds = array<i64: 1, 512>}, {transform_indices = @transform_8, window_bounds = array<i64: 512, 128>}, {pipeline_mode = #tpu.pipeline_mode<synchronous>, transform_indices = @transform_9, window_bounds = array<i64: 64, 128>}]} {
    %c0_i32 = arith.constant 0 : i32
    %0 = arith.cmpi eq, %arg0, %c0_i32 : i32
    %1 = arith.extui %0 : i1 to i32
    %c0_i32_0 = arith.constant 0 : i32
    %2 = arith.cmpi ne, %1, %c0_i32_0 : i32
    scf.if %2 {
      %c0_24 = arith.constant 0 : index
      %c0_25 = arith.constant 0 : index
      %51 = vector.load %arg1[%c0_24, %c0_25] : memref<64x128xf32, #tpu.memory_space<vmem>>, vector<64x128xf32>
      %c0_26 = arith.constant 0 : index
      %c0_27 = arith.constant 0 : index
      %52 = vector.load %arg2[%c0_26, %c0_27] : memref<128x128xf32, #tpu.memory_space<vmem>>, vector<128x128xf32>
      %cst_28 = arith.constant dense<0.000000e+00> : vector<64x128xf32>
      %53 = tpu.matmul %51, %52, %cst_28 {dimension_numbers = #tpu.dot_dimension_numbers<[1], [0], [0], [1], [0, 0, 1, 1], [], []>} : vector<64x128xf32>, vector<128x128xf32>, vector<64x128xf32> -> vector<64x128xf32>
      %c0_29 = arith.constant 0 : index
      %c0_30 = arith.constant 0 : index
      %54 = vector.load %arg3[%c0_29, %c0_30] : memref<1x128xf32, #tpu.memory_space<vmem>>, vector<1x128xf32>
      %55 = vector.broadcast %54 : vector<1x128xf32> to vector<64x128xf32>
      %56 = arith.addf %53, %55 : vector<64x128xf32>
      %57 = arith.truncf %56 : vector<64x128xf32> to vector<64x128xbf16>
      %c0_31 = arith.constant 0 : index
      %c0_32 = arith.constant 0 : index
      %58 = vector.load %arg11[%c0_31, %c0_32] : memref<64x128xbf16, #tpu.memory_space<vmem>>, vector<64x128xbf16>
      tpu.vector_store %arg11[%c0_31, %c0_32], %57 {strides = array<i32>} : memref<64x128xbf16, #tpu.memory_space<vmem>>, vector<64x128xbf16>,
      %cst_33 = arith.constant 0.000000e+00 : f32
      %59 = vector.broadcast %cst_33 : f32 to vector<64x128xf32>
      %c0_34 = arith.constant 0 : index
      %c0_35 = arith.constant 0 : index
      %60 = vector.load %arg12[%c0_34, %c0_35] : memref<64x128xf32, #tpu.memory_space<vmem>>, vector<64x128xf32>
      tpu.vector_store %arg12[%c0_34, %c0_35], %59 {strides = array<i32>} : memref<64x128xf32, #tpu.memory_space<vmem>>, vector<64x128xf32>,
      %cst_36 = arith.constant 0.000000e+00 : f32
      %61 = vector.broadcast %cst_36 : f32 to vector<64x1xf32>
      %c0_37 = arith.constant 0 : index
      %c0_38 = arith.constant 0 : index
      %62 = vector.load %arg13[%c0_37, %c0_38] : memref<64x1xf32, #tpu.memory_space<vmem>>, vector<64x1xf32>
      tpu.vector_store %arg13[%c0_37, %c0_38], %61 {strides = array<i32>} : memref<64x1xf32, #tpu.memory_space<vmem>>, vector<64x1xf32>,
    } else {
    }
    %3 = tpu.iota {dimensions = array<i32: 0>} : vector<64x512xi32>
    %c0 = arith.constant 0 : index
    %c0_1 = arith.constant 0 : index
    %4 = vector.load %arg7[%c0, %c0_1] : memref<2x512xi32, #tpu.memory_space<vmem>>, vector<1x512xi32>
    %5 = vector.broadcast %4 : vector<1x512xi32> to vector<64x512xi32>
    %6 = arith.cmpi eq, %3, %5 : vector<64x512xi32>
    %7 = arith.extui %6 : vector<64x512xi1> to vector<64x512xi32>
    %8 = arith.sitofp %7 : vector<64x512xi32> to vector<64x512xf32>
    %9 = arith.truncf %8 : vector<64x512xf32> to vector<64x512xbf16>
    %c1 = arith.constant 1 : index
    %c0_2 = arith.constant 0 : index
    %10 = vector.load %arg7[%c1, %c0_2] : memref<2x512xi32, #tpu.memory_space<vmem>>, vector<1x512xi32>
    %11 = vector.broadcast %10 : vector<1x512xi32> to vector<64x512xi32>
    %12 = arith.cmpi eq, %3, %11 : vector<64x512xi32>
    %13 = arith.extui %12 : vector<64x512xi1> to vector<64x512xi32>
    %14 = arith.sitofp %13 : vector<64x512xi32> to vector<64x512xf32>
    %15 = arith.truncf %14 : vector<64x512xf32> to vector<64x512xbf16>
    %c0_3 = arith.constant 0 : index
    %c0_4 = arith.constant 0 : index
    %16 = vector.load %arg11[%c0_3, %c0_4] : memref<64x128xbf16, #tpu.memory_space<vmem>>, vector<64x128xbf16>
    %cst = arith.constant dense<0.000000e+00> : vector<512x128xf32>
    %17 = tpu.matmul %9, %16, %cst {dimension_numbers = #tpu.dot_dimension_numbers<[0], [0], [1], [1], [0, 1, 1, 1], [], []>} : vector<64x512xbf16>, vector<64x128xbf16>, vector<512x128xf32> -> vector<512x128xf32>
    %c0_5 = arith.constant 0 : index
    %c0_6 = arith.constant 0 : index
    %18 = vector.load %arg9[%c0_5, %c0_6] : memref<512x128xf32, #tpu.memory_space<vmem>>, vector<512x128xf32>
    %19 = arith.addf %17, %18 : vector<512x128xf32>
    %20 = arith.mulf %19, %19 : vector<512x128xf32>
    %21 = arith.mulf %19, %20 : vector<512x128xf32>
    %cst_7 = arith.constant 4.471500e-02 : f32
    %22 = vector.broadcast %cst_7 : f32 to vector<512x128xf32>
    %23 = arith.mulf %22, %21 : vector<512x128xf32>
    %24 = arith.addf %19, %23 : vector<512x128xf32>
    %cst_8 = arith.constant 0.797884583 : f32
    %25 = vector.broadcast %cst_8 : f32 to vector<512x128xf32>
    %26 = arith.mulf %25, %24 : vector<512x128xf32>
    %27 = math.tanh %26 : vector<512x128xf32>
    %cst_9 = arith.constant 1.000000e+00 : f32
    %28 = vector.broadcast %cst_9 : f32 to vector<512x128xf32>
    %29 = arith.addf %28, %27 : vector<512x128xf32>
    %cst_10 = arith.constant 5.000000e-01 : f32
    %30 = vector.broadcast %cst_10 : f32 to vector<512x128xf32>
    %31 = arith.mulf %30, %29 : vector<512x128xf32>
    %32 = arith.mulf %19, %31 : vector<512x128xf32>
    %33 = arith.truncf %32 : vector<512x128xf32> to vector<512x128xbf16>
    %c0_11 = arith.constant 0 : index
    %c0_12 = arith.constant 0 : index
    %34 = vector.load %arg8[%c0_11, %c0_12] : memref<1x512xf32, #tpu.memory_space<vmem>>, vector<1x512xf32>
    %35 = arith.truncf %34 : vector<1x512xf32> to vector<1x512xbf16>
    %36 = vector.broadcast %35 : vector<1x512xbf16> to vector<64x512xbf16>
    %37 = arith.mulf %15, %36 : vector<64x512xbf16>
    %c0_13 = arith.constant 0 : index
    %c0_14 = arith.constant 0 : index
    %38 = vector.load %arg12[%c0_13, %c0_14] : memref<64x128xf32, #tpu.memory_space<vmem>>, vector<64x128xf32>
    %cst_15 = arith.constant dense<0.000000e+00> : vector<64x128xf32>
    %39 = tpu.matmul %37, %33, %cst_15 {dimension_numbers = #tpu.dot_dimension_numbers<[1], [0], [0], [1], [0, 0, 1, 1], [], []>} : vector<64x512xbf16>, vector<512x128xbf16>, vector<64x128xf32> -> vector<64x128xf32>
    %40 = arith.addf %38, %39 : vector<64x128xf32>
    %c0_16 = arith.constant 0 : index
    %c0_17 = arith.constant 0 : index
    %41 = vector.load %arg12[%c0_16, %c0_17] : memref<64x128xf32, #tpu.memory_space<vmem>>, vector<64x128xf32>
    tpu.vector_store %arg12[%c0_16, %c0_17], %40 {strides = array<i32>} : memref<64x128xf32, #tpu.memory_space<vmem>>, vector<64x128xf32>,
    %c0_18 = arith.constant 0 : index
    %c0_19 = arith.constant 0 : index
    %42 = vector.load %arg13[%c0_18, %c0_19] : memref<64x1xf32, #tpu.memory_space<vmem>>, vector<64x1xf32>
    %43 = arith.extf %15 : vector<64x512xbf16> to vector<64x512xf32>
    %cst_20 = arith.constant dense<0.000000e+00> : vector<64xf32>
    %44 = vector.multi_reduction <add>, %43, %cst_20 [1] : vector<64x512xf32> to vector<64xf32>
    %45 = vector.shape_cast %44 : vector<64xf32> to vector<64x1xf32>
    %46 = arith.addf %42, %45 : vector<64x1xf32>
    %c0_21 = arith.constant 0 : index
    %c0_22 = arith.constant 0 : index
    %47 = vector.load %arg13[%c0_21, %c0_22] : memref<64x1xf32, #tpu.memory_space<vmem>>, vector<64x1xf32>
    tpu.vector_store %arg13[%c0_21, %c0_22], %46 {strides = array<i32>} : memref<64x1xf32, #tpu.memory_space<vmem>>, vector<64x1xf32>,
    %c1_i32 = arith.constant 1 : i32
    %48 = arith.cmpi eq, %arg0, %c1_i32 : i32
    %49 = arith.extui %48 : i1 to i32
    %c0_i32_23 = arith.constant 0 : i32
    %50 = arith.cmpi ne, %49, %c0_i32_23 : i32
    scf.if %50 {
      %c0_24 = arith.constant 0 : index
      %c0_25 = arith.constant 0 : index
      %51 = vector.load %arg12[%c0_24, %c0_25] : memref<64x128xf32, #tpu.memory_space<vmem>>, vector<64x128xf32>
      %c0_26 = arith.constant 0 : index
      %c0_27 = arith.constant 0 : index
      %52 = vector.load %arg13[%c0_26, %c0_27] : memref<64x1xf32, #tpu.memory_space<vmem>>, vector<64x1xf32>
      %cst_28 = arith.constant 1.000000e+00 : f32
      %53 = vector.broadcast %cst_28 : f32 to vector<64x1xf32>
      %54 = arith.maximumf %52, %53 : vector<64x1xf32>
      %55 = vector.broadcast %54 : vector<64x1xf32> to vector<64x128xf32>
      %56 = arith.divf %51, %55 : vector<64x128xf32>
      %c0_29 = arith.constant 0 : index
      %c0_30 = arith.constant 0 : index
      %57 = vector.load %arg4[%c0_29, %c0_30] : memref<128x128xf32, #tpu.memory_space<vmem>>, vector<128x128xf32>
      %cst_31 = arith.constant dense<0.000000e+00> : vector<64x128xf32>
      %58 = tpu.matmul %56, %57, %cst_31 {dimension_numbers = #tpu.dot_dimension_numbers<[1], [0], [0], [1], [0, 0, 1, 1], [], []>} : vector<64x128xf32>, vector<128x128xf32>, vector<64x128xf32> -> vector<64x128xf32>
      %c0_32 = arith.constant 0 : index
      %c0_33 = arith.constant 0 : index
      %59 = vector.load %arg5[%c0_32, %c0_33] : memref<1x128xf32, #tpu.memory_space<vmem>>, vector<1x128xf32>
      %60 = vector.broadcast %59 : vector<1x128xf32> to vector<64x128xf32>
      %61 = arith.addf %58, %60 : vector<64x128xf32>
      %c0_34 = arith.constant 0 : index
      %c0_35 = arith.constant 0 : index
      %62 = vector.load %arg1[%c0_34, %c0_35] : memref<64x128xf32, #tpu.memory_space<vmem>>, vector<64x128xf32>
      %c0_36 = arith.constant 0 : index
      %c0_37 = arith.constant 0 : index
      %63 = vector.load %arg6[%c0_36, %c0_37] : memref<128x128xf32, #tpu.memory_space<vmem>>, vector<128x128xf32>
      %cst_38 = arith.constant dense<0.000000e+00> : vector<64x128xf32>
      %64 = tpu.matmul %62, %63, %cst_38 {dimension_numbers = #tpu.dot_dimension_numbers<[1], [0], [0], [1], [0, 0, 1, 1], [], []>} : vector<64x128xf32>, vector<128x128xf32>, vector<64x128xf32> -> vector<64x128xf32>
      %65 = arith.addf %61, %64 : vector<64x128xf32>
      %c0_39 = arith.constant 0 : index
      %c0_40 = arith.constant 0 : index
      %66 = vector.load %arg10[%c0_39, %c0_40] : memref<64x128xf32, #tpu.memory_space<vmem>>, vector<64x128xf32>
      tpu.vector_store %arg10[%c0_39, %c0_40], %65 {strides = array<i32>} : memref<64x128xf32, #tpu.memory_space<vmem>>, vector<64x128xf32>,
    } else {
    }
    return
  }
  func.func @transform_0(%arg0: i32) -> (i32, i32) {
    %c0_i32 = arith.constant 0 : i32
    %c0_i32_0 = arith.constant 0 : i32
    %c0_i32_1 = arith.constant 0 : i32
    return %c0_i32, %c0_i32_0 : i32, i32
  }
  func.func @transform_1(%arg0: i32) -> (i32, i32) {
    %c0_i32 = arith.constant 0 : i32
    %c0_i32_0 = arith.constant 0 : i32
    %c0_i32_1 = arith.constant 0 : i32
    return %c0_i32, %c0_i32_0 : i32, i32
  }
  func.func @transform_2(%arg0: i32) -> (i32, i32) {
    %c0_i32 = arith.constant 0 : i32
    %c0_i32_0 = arith.constant 0 : i32
    %c0_i32_1 = arith.constant 0 : i32
    return %c0_i32, %c0_i32_0 : i32, i32
  }
  func.func @transform_3(%arg0: i32) -> (i32, i32) {
    %c0_i32 = arith.constant 0 : i32
    %c0_i32_0 = arith.constant 0 : i32
    %c0_i32_1 = arith.constant 0 : i32
    return %c0_i32, %c0_i32_0 : i32, i32
  }
  func.func @transform_4(%arg0: i32) -> (i32, i32) {
    %c0_i32 = arith.constant 0 : i32
    %c0_i32_0 = arith.constant 0 : i32
    %c0_i32_1 = arith.constant 0 : i32
    return %c0_i32, %c0_i32_0 : i32, i32
  }
  func.func @transform_5(%arg0: i32) -> (i32, i32) {
    %c0_i32 = arith.constant 0 : i32
    %c0_i32_0 = arith.constant 0 : i32
    %c0_i32_1 = arith.constant 0 : i32
    return %c0_i32, %c0_i32_0 : i32, i32
  }
  func.func @transform_6(%arg0: i32) -> (i32, i32) {
    %c0_i32 = arith.constant 0 : i32
    %c0_i32_0 = arith.constant 0 : i32
    return %c0_i32, %arg0 : i32, i32
  }
  func.func @transform_7(%arg0: i32) -> (i32, i32) {
    %c0_i32 = arith.constant 0 : i32
    %c0_i32_0 = arith.constant 0 : i32
    return %c0_i32, %arg0 : i32, i32
  }
  func.func @transform_8(%arg0: i32) -> (i32, i32) {
    %c0_i32 = arith.constant 0 : i32
    %c0_i32_0 = arith.constant 0 : i32
    return %arg0, %c0_i32 : i32, i32
  }
  func.func @transform_9(%arg0: i32) -> (i32, i32) {
    %c0_i32 = arith.constant 0 : i32
    %c0_i32_0 = arith.constant 0 : i32
    %c0_i32_1 = arith.constant 0 : i32
    return %c0_i32, %c0_i32_0 : i32, i32
  }
}

</mosaic_0001>

<bundles_post_ra>
// kernel: tpu_custom_call.1
= control target key start
LH: loop header
LB: loop body
LE: loop exit
PB: predicated region body
PF: predicated region fallthrough
CT: control target
= control target key end

     0   :  { %s5465_s0 = inlined_call_operand.hbm [shape: f32[64,128], index: 0, kind: input, shape index: {}]   ;;  %s5466_s1 = inlined_call_operand.hbm [shape: f32[128,128], index: 1, kind: input, shape index: {}]   ;;  %s5467_s2 = inlined_call_operand.vmem [shape: f32[1,128], index: 2, kind: input, shape index: {}]   ;;  %s5468_s3 = inlined_call_operand.hbm [shape: f32[128,128], index: 3, kind: input, shape index: {}]   ;;  %s5469_s4 = inlined_call_operand.vmem [shape: f32[1,128], index: 4, kind: input, shape index: {}]   ;;  %s5470_s5 = inlined_call_operand.hbm [shape: f32[128,128], index: 5, kind: input, shape index: {}]   ;;  %s5471_s6 = inlined_call_operand.hbm [shape: s32[2,1024], index: 6, kind: input, shape index: {}]   ;;  %s5472_s7 = inlined_call_operand.vmem [shape: f32[1,1024], index: 7, kind: input, shape index: {}]   ;;  %s5473_s8 = inlined_call_operand.hbm [shape: f32[1024,128], index: 8, kind: input, shape index: {}]   ;;  %s5474_s9 = inlined_call_operand.hbm [shape: f32[64,128], index: 9, kind: output, shape index: {}]  }
   0x1   :  { %5541 = sst [smem:[#allocation88_spill]] %s5465_s0 }
   0x2   :  { %5542 = sst [smem:[#allocation89_spill]] %s5466_s1 }
   0x3   :  { %5543 = sst [smem:[#allocation90_spill]] %s5471_s6 }
   0x4   :  { %14 = vsyncpa [#allocation6], 0 }
   0x5   :  { %15 = vsyncpa [#allocation9], 0 }
   0x6   :  { %16 = vsyncpa [#allocation12], 0 }
   0x7   :  { %17 = vsyncpa [#allocation7], 0  ;;  %s4028_s30 = smov 0   ;;  %s4030_s10 = smov 0  }
   0x8   :  { %s4032_s11 = smov 0   ;;  %s4034_s12 = smov 0  }
   0x9 LB: > { %s4047_s13 = sadd.s32 4294967295, %s3962_s12   ;;  %p169_p0 = scmp.ne.s32.totalorder %s3954_s10, %s3950_s30  ;;  %s3962_s12 = sphi %s4034_s12, %s5703_s12   ;;  %s3958_s11 = sphi %s4032_s11, %s5702_s11   ;;  %s3954_s10 = sphi %s4030_s10, %s5701_s10   ;;  %s3950_s30 = sphi %s4028_s30, %s5700_s30  }
   0xa   : > { %p5479_p1 = scmp.eq.s32.totalorder %s4047_s13, 0  ;;  %p2876_p2 = scmp.ge.s32.totalorder %s3962_s12, 1 }
   0xb   : > { %p253_p3 = scmp.lt.s32.totalorder %s3962_s12, 3  ;;  %s3964_s16 = smov [#allocation5]  }
   0xc   : > { %p4056_p5 = por %p5479_p1, %p169_p0  ;;  %s265_s17 = sshll.u32 %s3964_s16, 4  ;;  %s266_s17 = int_to_ptr.vmem [resolvable:$true] %s265_s17 }
   0xd   : > { %p4060_p6 = pnand %p2876_p2, %p253_p3  ;;  %s3965_s19 = smov [#allocation8]  }
   0xe   : > { %s5544_s14 = scalar_select %p4056_p5, 1, 0 }
   0xf   : > { %s5545_s15 = scalar_select %p4060_p6, 1, 0 }
  0x10   : > { %p3502_p7 = pneg %p4060_p6  ;;  %s278_s20 = sshll.u32 %s3965_s19, 4  ;;  %s279_s20 = int_to_ptr.vmem [resolvable:$true] %s278_s20 }
  0x11   : > { %s3739_s21 = scalar_lea.vmem %s266_s17, 1024  ;;  %p3747_p13 = scmp.lt.s32.totalorder %s266_s17, %s266_s17 }
  0x12   : > { %p4068_p8 = pnand %p3502_p7, %p5479_p1  ;;  %p3740_p10 = scmp.ne.s32.totalorder %s266_s17, %s3739_s21 }
  0x13   : > { %p3748_p0 = scmp.lt.s32.totalorder %s3739_s21, %s3739_s21 }
  0x14   : > { %s5546_s18 = scalar_select %p4068_p8, 1, 0 }
  0x15   : > { %p5480_p9 = pneg %p4068_p8  ;;  %p3749_p2 = por %p3748_p0, %p3747_p13 }
  0x17   : > { %p3742_p11 = pnand %p3740_p10, %p5480_p9 }
  0x19   : > { %p3743_p12 = pneg %p3742_p11 }
  0x1b   : > { %p3750_p3 = pnand %p3749_p2, %p3743_p12 }
  0x1d   : > { %3753 = shalt.err (!%p3750_p3)
}
  0x1e   : > { %s5475_s22 = smov 128   ;;  %s5477_s23 = smov 8  }
  0x1f   : > { %s5547_s0 = sld [smem:[#allocation88_spill]]  ;;  %s3765_s26 = scalar_lea.vmem %s279_s20, 2048 }
  0x20   : > { %p3766_p7 = scmp.ne.s32.totalorder %s279_s20, %s3765_s26  ;;  %p3773_p12 = scmp.lt.s32.totalorder %s279_s20, %s279_s20 }
  0x21   : > { %p3774_p13 = scmp.lt.s32.totalorder %s3765_s26, %s3765_s26 }
  0x22   : > { %p3768_p10 = pnand %p3766_p7, %p5480_p9 }
  0x23   : > { %p3775_p0 = por %p3774_p13, %p3773_p12 }
  0x24   : > { %p3769_p11 = pneg %p3768_p10 }
  0x25   : > { %3505 = dma.hbm_to_vmem [thread:$0]  (!%p4068_p8), %s5547_s0, 1024, %s266_s17, [#allocation6], %s5475_s22, %s5475_s22, %s5477_s23  }
  0x26   : > { %p3776_p2 = pnand %p3775_p0, %p3769_p11 }
  0x28   : > { %3779 = shalt.err (!%p3776_p2)
}
  0x29   : > { %s5548_s1 = sld [smem:[#allocation89_spill]]  ;;  %s4097_s29 = sadd.s32 1, %s3962_s12  }
  0x2a   : > { %s156_s30 = sadd.s32 1, %s3958_s11  ;;  %s153_s16 = ssub.s32 %s3962_s12, %s4097_s29 }
  0x2b   : > { %p163_p3 = scmp.ne.s32.totalorder %s3958_s11, %s3954_s10  ;;  %p154_p7 = scmp.eq.s32.totalorder %s153_s16, 0 }
  0x2c   : > { %p164_p10 = scmp.eq.s32.totalorder %s3962_s12, 0  ;;  %p3526_p11 = scmp.lt.s32.totalorder %s3962_s12, 2 }
  0x2d   : > { %s324_s17 = sand.u32 1, %s3962_s12   ;;  %s326_s21 = sand.u32 1, %s3958_s11  }
  0x2e   : > { %s4108_s19 = scalar_select %p154_p7, %s3958_s11, %s156_s30  }
  0x2f   : > { %3508 = dma.hbm_to_vmem [thread:$0]  (!%p4068_p8), %s5548_s1, 2048, %s279_s20, [#allocation9], %s5475_s22, %s5475_s22, %s5477_s23  }
  0x30   : > { %p165_p12 = por %p164_p10, %p163_p3  ;;  %s3013_s24 = sshll.u32 %s3962_s12, 7 }
  0x31   : > { %s2882_s25 = sshll.u32 %s326_s21, 3  ;;  %s5549_s6 = sld [smem:[#allocation90_spill]] }
  0x32   : > { %p4117_p13 = pnand %p3526_p11, %p165_p12  ;;  %s328_s30 = scalar_lea.vmem [#allocation13], %s2882_s25 }
  0x33   : > { %s336_s16 = sshll.u32 %s328_s30, 4  ;;  %s4121_s22 = sshll.u32 %s326_s21, 9  ;;  %s337_s16 = int_to_ptr.vmem [resolvable:$true] %s336_s16 }
  0x34   : > { %s4123_s23 = scalar_lea.sflag [#allocation6], %s324_s17  ;;  %p3782_p2 = pneg %p4117_p13 }
  0x37   : > { %s4115_s20 = scalar_lea.hbm %s5549_s6, %s3013_s24  ;;  %s3785_s27 = scalar_lea.hbm %s5549_s6, 256 }
  0x38   : > { %s3780_s0 = scalar_lea.hbm %s4115_s20, 128  ;;  %p3786_p10 = scmp.lt.s32.totalorder %s4115_s20, %s5549_s6 }
  0x39   : > { %p3781_p0 = scmp.ne.s32.totalorder %s4115_s20, %s3780_s0  ;;  %p3787_p11 = scmp.lt.s32.totalorder %s3785_s27, %s3780_s0 }
  0x3b   : > { %p3783_p3 = pnand %p3782_p2, %p3781_p0  ;;  %p3788_p12 = por %p3787_p11, %p3786_p10 }
  0x3d   : > { %p3784_p7 = pneg %p3783_p3 }
  0x3f   : > { %p3789_p4 = pnand %p3788_p12, %p3784_p7 }
  0x41   : > { %3792 = shalt.err (!%p3789_p4)
}
  0x42   : > { %s3793_s17 = scalar_lea.vmem %s337_s16, 128  ;;  %s3968_s21 = smov [#allocation13]  }
  0x43   : > { %p3794_p1 = scmp.ne.s32.totalorder %s337_s16, %s3793_s17  ;;  %s3798_s30 = sshll.u32 %s3968_s21, 4  ;;  %s3799_s30 = int_to_ptr.vmem [resolvable:$false] %s3798_s30 }
  0x44   : > { %s3800_s24 = scalar_lea.vmem %s3799_s30, 256  ;;  %p3801_p3 = scmp.lt.s32.totalorder %s337_s16, %s3799_s30 }
  0x45   : > { %p3796_p9 = pnand %p3794_p1, %p3782_p2  ;;  %p3802_p5 = scmp.lt.s32.totalorder %s3800_s24, %s3793_s17 }
  0x47   : > { %p3797_p0 = pneg %p3796_p9  ;;  %p3803_p6 = por %p3802_p5, %p3801_p3 }
  0x49   : > { %p3804_p8 = pnand %p3803_p6, %p3797_p0 }
  0x4b   : > { %3807 = shalt.err (!%p3804_p8)
}
  0x4c   : > { %3518 = dma.hbm_to_vmem [thread:$0]  (!%p4117_p13), %s4115_s20, 128, %s337_s16, %s4123_s23  }
  0x4d   : > { %s355_s0 = scalar_lea.vmem [#allocation14], %s4121_s22  ;;  %s3969_s26 = smov [#allocation10]  }
  0x4e   : > { %s362_s1 = sshll.u32 %s355_s0, 4  ;;  %s294_s27 = sshll.u32 %s3969_s26, 4  ;;  %s4147_s1 = int_to_ptr.vmem [resolvable:$true] %s362_s1  ;;  %s295_s27 = int_to_ptr.vmem [resolvable:$true] %s294_s27 }
  0x4f   : > { %s3819_s25 = scalar_lea.vmem %s295_s27, 2048  ;;  %p5551_p4 = scmp.ne.s32.totalorder %s5546_s18, 0 }
  0x50   : > { %p3820_p1 = scmp.ne.s32.totalorder %s295_s27, %s3819_s25  ;;  %p3827_p9 = scmp.lt.s32.totalorder %s295_s27, %s295_s27 }
  0x51   : > { %p5552_p5 = pneg %p5551_p4  ;;  %p3828_p7 = scmp.lt.s32.totalorder %s3819_s25, %s3819_s25 }
  0x53   : > { %p3822_p6 = pnand %p3820_p1, %p5552_p5  ;;  %p3829_p10 = por %p3828_p7, %p3827_p9 }
  0x55   : > { %p3823_p8 = pneg %p3822_p6 }
  0x57   : > { %p3830_p11 = pnand %p3829_p10, %p3823_p8 }
  0x59   : > { %3833 = shalt.err (!%p3830_p11)
}
  0x5a   : > { %s5553_s22 = smov 8   ;;  %s5554_s20 = smov 128  }
  0x5b   : > { %3511 = dma.hbm_to_vmem [thread:$0]  (!%p5551_p4), %s5468_s3, 2048, %s295_s27, [#allocation9], %s5554_s20, %s5554_s20, %s5553_s22  }
  0x5c   : > { %s3014_s21 = sshll.u32 %s3962_s12, 13  ;;  %s3970_s30 = smov [#allocation11]  }
  0x5d   : > { %s310_s24 = sshll.u32 %s3970_s30, 4  ;;  %s4164_s25 = scalar_lea.hbm %s5473_s8, %s3014_s21  ;;  %s311_s24 = int_to_ptr.vmem [resolvable:$true] %s310_s24 }
  0x5e   : > { %s3845_s6 = scalar_lea.vmem %s311_s24, 2048  ;;  %p5555_p0 = pmov %p5552_p5 }
  0x5f   : > { %p3846_p12 = scmp.ne.s32.totalorder %s311_s24, %s3845_s6  ;;  %p3853_p5 = scmp.lt.s32.totalorder %s311_s24, %s311_s24 }
  0x60   : > { %p3854_p6 = scmp.lt.s32.totalorder %s3845_s6, %s3845_s6 }
  0x61   : > { %p3848_p3 = pnand %p3846_p12, %p5555_p0 }
  0x62   : > { %p3855_p8 = por %p3854_p6, %p3853_p5 }
  0x63   : > { %p3849_p1 = pneg %p3848_p3 }
  0x65   : > { %p3856_p9 = pnand %p3855_p8, %p3849_p1 }
  0x67   : > { %3859 = shalt.err (!%p3856_p9)
}
  0x68   : > { %3514 = dma.hbm_to_vmem [thread:$0]  (!%p5551_p4), %s5470_s5, 2048, %s311_s24, [#allocation12], %s5554_s20, %s5554_s20, %s5553_s22  }
  0x69   : > { %s3860_s16 = scalar_lea.hbm %s4164_s25, 8192  ;;  %s3865_s18 = scalar_lea.hbm %s5473_s8, 16384 }
  0x6a   : > { %p3861_p7 = scmp.ne.s32.totalorder %s4164_s25, %s3860_s16  ;;  %p3866_p12 = scmp.lt.s32.totalorder %s4164_s25, %s5473_s8 }
  0x6b   : > { %p3867_p0 = scmp.lt.s32.totalorder %s3865_s18, %s3860_s16 }
  0x6c   : > { %p3863_p10 = pnand %p3861_p7, %p3782_p2 }
  0x6d   : > { %p3868_p3 = por %p3867_p0, %p3866_p12 }
  0x6e   : > { %p3864_p11 = pneg %p3863_p10 }
  0x70   : > { %p3869_p1 = pnand %p3868_p3, %p3864_p11 }
  0x72   : > { %3872 = shalt.err (!%p3869_p1)
}
  0x73   : > { %s3873_s24 = scalar_lea.vmem %s4147_s1, 8192  ;;  %s3971_s0 = smov [#allocation14]  }
  0x74   : > { %p3874_p4 = scmp.ne.s32.totalorder %s4147_s1, %s3873_s24  ;;  %s3878_s26 = sshll.u32 %s3971_s0, 4  ;;  %s3879_s26 = int_to_ptr.vmem [resolvable:$false] %s3878_s26 }
  0x75   : > { %s3880_s12 = scalar_lea.vmem %s3879_s26, 16384  ;;  %p3881_p8 = scmp.lt.s32.totalorder %s4147_s1, %s3879_s26 }
  0x76   : > { %p3876_p5 = pnand %p3874_p4, %p3782_p2  ;;  %p3882_p9 = scmp.lt.s32.totalorder %s3880_s12, %s3873_s24 }
  0x78   : > { %p3877_p6 = pneg %p3876_p5  ;;  %p3883_p7 = por %p3882_p9, %p3881_p8 }
  0x7a   : > { %p3884_p10 = pnand %p3883_p7, %p3877_p6 }
  0x7c   : > { %3887 = shalt.err (!%p3884_p10)
}
  0x7d   : > { %3521 = dma.hbm_to_vmem [thread:$0]  (!%p4117_p13), %s4164_s25, 8192, %s4147_s1, %s4123_s23, %s5554_s20, %s5554_s20, %s5553_s22  }
  0x7e   : > { %p5556_p2 = scmp.ne.s32.totalorder %s5545_s15, 0 }
  0x80   : > { %374 = sbr.rel (%p5556_p2) target bundleno = 1514 (0x5ea), region = 56 }
  0x85   : > { %p5557_p11 = scmp.eq.s32.totalorder %s4047_s13, 0 }
  0x87   : > { %3929 = dma.done.wait (%p5557_p11), [#allocation6], 1024   ;;  %p5558_p12 = pmov %p5557_p11 }
  0x88   : > { %p5559_p0 = pmov %p5557_p11 }
  0x89   : > { %3931 = vsyncadd (%p5558_p12), [#allocation6], 4294966272 }
  0x8a   : > { %3933 = dma.done.wait (%p5559_p0), [#allocation9], 4096   ;;  %p5560_p3 = pmov %p5559_p0 }
  0x8b   : > { %p5561_p1 = pmov %p5559_p0 }
  0x8c   : > { %3935 = vsyncadd (%p5560_p3), [#allocation9], 4294963200 }
  0x8d   : > { %3937 = dma.done.wait (%p5561_p1), [#allocation12], 2048   ;;  %p5562_p13 = pmov %p5559_p0 }
  0x8e   : > { %s392_s15 = sand.u32 1, %s4047_s13   ;;  %s394_s23 = sand.u32 1, %s3954_s10  }
  0x8f   : > { %3939 = vsyncadd (%p5562_p13), [#allocation12], 4294965248  ;;  %s4219_s28 = sshll.u32 %s394_s23, 3  ;;  %s393_s1 = scalar_lea.sflag [#allocation6], %s392_s15 }
  0x90   : > { %s396_s22 = scalar_lea.vmem [#allocation13], %s4219_s28  ;;  %p5563_p4 = scmp.ne.s32.totalorder %s5544_s14, 0 }
  0x92   : > { %3941 = dma.done.wait (%p5563_p4), %s393_s1, 8320  }
  0x93   : > { %3943 = vsyncadd (%p5563_p4), %s393_s1, 4294958976  ;;  %s2894_s20 = sshll.u32 %s394_s23, 9  ;;  %s2895_s25 = sshll.u32 %s4047_s13, 2 }
  0x94   : > { %p446_p5 = scmp.lt.s32.totalorder %s2895_s25, 7  ;;  %s4233_s17 = scalar_lea.vmem [#allocation14], %s2894_s20 }
  0x95   : > { %p5564_p6 = scmp.ne.s32.totalorder %s4047_s13, 0 }
  0x96   : > { %s5705_s25 = smov (!%p446_p5, %s2895_s25), 7 }
  0x97   : > { %s448_s6 = scalar_lea.vmem %s5472_s7, %s5705_s25  ;;  %455 = sbr.rel (%p5564_p6) target bundleno = 394 (0x18a), region = 84 }
  0x9c   : > { %v479_v0 = vld [vmem:[#allocation8 + $0x78] sm:$0xff]  ;;  %v478_v1 = vld [vmem:[#allocation8 + $0x70] sm:$0xff]  ;;  %v477_v2 = vld [vmem:[#allocation8 + $0x68] sm:$0xff]  ;;  %vm640_vm0 = vcmask 7168   ;;  %v3972_v24 = vmov 0.0  }
  0x9d   : > { %3234 = vmatprep.subr.mxu0 %v479_v0  ;;  %3438 = vmatprep.subr.mxu1 %v479_v0  ;;  %v476_v3 = vld [vmem:[#allocation8 + $0x60] sm:$0xff]  ;;  %v475_v4 = vld [vmem:[#allocation8 + $0x58] sm:$0xff]  ;;  %v474_v5 = vld [vmem:[#allocation8 + $0x50] sm:$0xff]  ;;  %632 = vst [vmem:[#allocation3 + $0x30] sm:$0xff] %v3972_v24 }
  0x9e   : > { %3235 = vmatpush3.msra.mxu0 %v479_v0  ;;  %3454 = vmatpush3.msra.mxu1 %v479_v0  ;;  %v473_v6 = vld [vmem:[#allocation8 + $0x48] sm:$0xff]  ;;  %v472_v7 = vld [vmem:[#allocation8 + $0x40] sm:$0xff]  ;;  %v471_v8 = vld [vmem:[#allocation8 + $0x38] sm:$0xff]  ;;  %633 = vst [vmem:[#allocation3] sm:$0xff] %v3972_v24 }
  0x9f   : > { %3236 = vmatprep.subr.mxu0 %v478_v1  ;;  %3439 = vmatprep.subr.mxu1 %v478_v1  ;;  %v470_v9 = vld [vmem:[#allocation8 + $0x30] sm:$0xff]  ;;  %v469_v10 = vld [vmem:[#allocation8 + $0x28] sm:$0xff]  ;;  %v468_v11 = vld [vmem:[#allocation8 + $0x20] sm:$0xff]  ;;  %634 = vst [vmem:[#allocation3 + $0x18] sm:$0xff] %v3972_v24 }
  0xa0   : > { %3237 = vmatpush3.msra.mxu0 %v478_v1  ;;  %3455 = vmatpush3.msra.mxu1 %v478_v1  ;;  %v467_v12 = vld [vmem:[#allocation8 + $0x18] sm:$0xff]  ;;  %v466_v13 = vld [vmem:[#allocation8 + $0x10] sm:$0xff]  ;;  %v465_v14 = vld [vmem:[#allocation8 + $0x8] sm:$0xff]  ;;  %635 = vst [vmem:[#allocation3 + $0x10] sm:$0xff] %v3972_v24 }
  0xa1   : > { %3238 = vmatprep.subr.mxu0 %v477_v2  ;;  %3440 = vmatprep.subr.mxu1 %v477_v2  ;;  %v464_v15 = vld [vmem:[#allocation8] sm:$0xff]  ;;  %v457_v18 = vld [vmem:[#allocation5 + $0x8] sm:$0xff]  ;;  %v458_v20 = vld [vmem:[#allocation5 + $0x10] sm:$0xff]  ;;  %636 = vst [vmem:[#allocation3 + $0x8] sm:$0xff] %v3972_v24 }
  0xa2   : > { %3239 = vmatpush3.msra.mxu0 %v477_v2  ;;  %3456 = vmatpush3.msra.mxu1 %v477_v2  ;;  %v456_v16 = vld [vmem:[#allocation5] sm:$0xff]  ;;  %v461_v19 = vld [vmem:[#allocation5 + $0x28] sm:$0xff]  ;;  %v462_v21 = vld [vmem:[#allocation5 + $0x30] sm:$0xff]  ;;  %637 = vst [vmem:[#allocation3 + $0x20] sm:$0xff] %v3972_v24 }
  0xa3   : > { %3240 = vmatprep.subr.mxu0 %v476_v3  ;;  %3441 = vmatprep.subr.mxu1 %v476_v3  ;;  %v460_v17 = vld [vmem:[#allocation5 + $0x20] sm:$0xff]  ;;  %v459_v22 = vld [vmem:[#allocation5 + $0x18] sm:$0xff]  ;;  %638 = vst [vmem:[#allocation3 + $0x28] sm:$0xff] %v3972_v24  ;;  %639 = vst [vmem:[#allocation3 + $0x38] sm:$0xff] %v3972_v24 }
  0xa4   : > { %3241 = vmatpush3.msra.mxu0 %v476_v3  ;;  %3457 = vmatpush3.msra.mxu1 %v476_v3  ;;  %v463_v23 = vld [vmem:[#allocation5 + $0x38] sm:$0xff]  ;;  %641 = vst.msk [vmem:[#allocation4] sm:$0xff] %vm640_vm0, %v3972_v24  ;;  %642 = vst.msk [vmem:[#allocation4 + $0x8] sm:$0xff] %vm640_vm0, %v3972_v24  ;;  %v2897_v26 = vld [vmem:[%s5467_s2] ss:$0 sm:$0xff] }
  0xa5   : > { %3242 = vmatprep.subr.mxu0 %v475_v4  ;;  %3442 = vmatprep.subr.mxu1 %v475_v4  ;;  %643 = vst.msk [vmem:[#allocation4 + $0x10] sm:$0xff] %vm640_vm0, %v3972_v24  ;;  %644 = vst.msk [vmem:[#allocation4 + $0x18] sm:$0xff] %vm640_vm0, %v3972_v24 }
  0xa6   : > { %3243 = vmatpush3.msra.mxu0 %v475_v4  ;;  %3458 = vmatpush3.msra.mxu1 %v475_v4  ;;  %645 = vst.msk [vmem:[#allocation4 + $0x20] sm:$0xff] %vm640_vm0, %v3972_v24  ;;  %646 = vst.msk [vmem:[#allocation4 + $0x28] sm:$0xff] %vm640_vm0, %v3972_v24 }
  0xa7   : > { %3244 = vmatprep.subr.mxu0 %v474_v5  ;;  %3443 = vmatprep.subr.mxu1 %v474_v5  ;;  %647 = vst.msk [vmem:[#allocation4 + $0x30] sm:$0xff] %vm640_vm0, %v3972_v24  ;;  %648 = vst.msk [vmem:[#allocation4 + $0x38] sm:$0xff] %vm640_vm0, %v3972_v24 }
  0xa8   : > { %3245 = vmatpush3.msra.mxu0 %v474_v5  ;;  %3459 = vmatpush3.msra.mxu1 %v474_v5 }
  0xa9   : > { %3246 = vmatprep.subr.mxu0 %v473_v6  ;;  %3444 = vmatprep.subr.mxu1 %v473_v6 }
  0xaa   : > { %3247 = vmatpush3.msra.mxu0 %v473_v6  ;;  %3460 = vmatpush3.msra.mxu1 %v473_v6 }
  0xab   : > { %3248 = vmatprep.subr.mxu0 %v472_v7  ;;  %3445 = vmatprep.subr.mxu1 %v472_v7 }
  0xac   : > { %3249 = vmatpush3.msra.mxu0 %v472_v7  ;;  %3461 = vmatpush3.msra.mxu1 %v472_v7 }
  0xad   : > { %3250 = vmatprep.subr.mxu0 %v471_v8  ;;  %3446 = vmatprep.subr.mxu1 %v471_v8 }
  0xae   : > { %3251 = vmatpush3.msra.mxu0 %v471_v8  ;;  %3462 = vmatpush3.msra.mxu1 %v471_v8 }
  0xaf   : > { %3252 = vmatprep.subr.mxu0 %v470_v9  ;;  %3447 = vmatprep.subr.mxu1 %v470_v9 }
  0xb0   : > { %3253 = vmatpush3.msra.mxu0 %v470_v9  ;;  %3463 = vmatpush3.msra.mxu1 %v470_v9 }
  0xb1   : > { %3254 = vmatprep.subr.mxu0 %v469_v10  ;;  %3448 = vmatprep.subr.mxu1 %v469_v10 }
  0xb2   : > { %3255 = vmatpush3.msra.mxu0 %v469_v10  ;;  %3464 = vmatpush3.msra.mxu1 %v469_v10 }
  0xb3   : > { %3256 = vmatprep.subr.mxu0 %v468_v11  ;;  %3449 = vmatprep.subr.mxu1 %v468_v11 }
  0xb4   : > { %3257 = vmatpush3.msra.mxu0 %v468_v11  ;;  %3465 = vmatpush3.msra.mxu1 %v468_v11 }
  0xb5   : > { %3258 = vmatprep.subr.mxu0 %v467_v12  ;;  %3450 = vmatprep.subr.mxu1 %v467_v12 }
  0xb6   : > { %3259 = vmatpush3.msra.mxu0 %v467_v12  ;;  %3466 = vmatpush3.msra.mxu1 %v467_v12 }
  0xb7   : > { %3260 = vmatprep.subr.mxu0 %v466_v13  ;;  %3451 = vmatprep.subr.mxu1 %v466_v13 }
  0xb8   : > { %3261 = vmatpush3.msra.mxu0 %v466_v13  ;;  %3467 = vmatpush3.msra.mxu1 %v466_v13 }
  0xb9   : > { %3262 = vmatprep.subr.mxu0 %v465_v14  ;;  %3452 = vmatprep.subr.mxu1 %v465_v14 }
  0xba   : > { %3263 = vmatpush3.msra.mxu0 %v465_v14  ;;  %3468 = vmatpush3.msra.mxu1 %v465_v14 }
  0xbb   : > { %3264 = vmatprep.subr.mxu0 %v464_v15  ;;  %3453 = vmatprep.subr.mxu1 %v464_v15 }
  0xbc   : > { %3265 = vmatpush3.msra.mxu0 %v464_v15  ;;  %3469 = vmatpush3.msra.mxu1 %v464_v15 }
  0xbd   : > { %3266 = vmatprep.mubr.f32.mxu0 %v456_v16  ;;  %3272 = vmatprep.mubr.f32.mxu1 %v460_v17 }
  0xbe   : > { %3267 = vmatmul.mubr.f32.vlgmr.msra.gmra.mxu0 %v457_v18  ;;  %3273 = vmatmul.mubr.f32.vlgmr.msra.gmra.mxu1 %v461_v19 }
  0xbf   : > { %3269 = vmatprep.mubr.f32.mxu0 %v458_v20  ;;  %3275 = vmatprep.mubr.f32.mxu1 %v462_v21 }
  0xc2   : > { %3270 = vmatmul.mubr.f32.gmra.mxu0 %v459_v22  ;;  %3276 = vmatmul.mubr.f32.gmra.mxu1 %v463_v23 }
 0x17e   : > { %v3268_v25 = vpop.f32.mrf.mxu0  ;;  %v3274_v27 = vpop.f32.mrf.mxu1 }
 0x17f   : > { %v559_v30 = vadd.f32 %v3268_v25, %v2897_v26  ;;  %v579_v31 = vadd.f32 %v3274_v27, %v2897_v26 }
 0x180   : > { %v553_v28 = vpop.f32.mrf.mxu0  ;;  %v573_v29 = vpop.f32.mrf.mxu1 }
 0x181   : > { %v554_v32 = vadd.f32 %v2897_v26, %v553_v28  ;;  %v574_v33 = vadd.f32 %v2897_v26, %v573_v29 }
 0x182   : > { %v3271_v34 = vpop.f32.mrf.mxu0  ;;  %v3277_v35 = vpop.f32.mrf.mxu1 }
 0x183   : > { %v3026_v36 = vpack.c.bf16 %v559_v30, %v554_v32  ;;  %v3036_v37 = vpack.c.bf16 %v579_v31, %v574_v33  ;;  %v569_v40 = vadd.f32 %v3271_v34, %v2897_v26  ;;  %v589_v41 = vadd.f32 %v3277_v35, %v2897_v26 }
 0x184   : > { %v563_v38 = vpop.f32.mrf.mxu0  ;;  %v583_v39 = vpop.f32.mrf.mxu1 }
 0x185   : > { %3027 = vst [vmem:[#allocation2] sm:$0xff] %v3026_v36   ;;  %3044 = vst [vmem:[#allocation2 + $0x10] sm:$0xff] %v3036_v37   ;;  %v564_v42 = vadd.f32 %v2897_v26, %v563_v38  ;;  %v584_v43 = vadd.f32 %v2897_v26, %v583_v39 }
 0x187   : > { %v3031_v44 = vpack.c.bf16 %v569_v40, %v564_v42  ;;  %v3041_v45 = vpack.c.bf16 %v589_v41, %v584_v43 }
 0x189   : > { %3043 = vst [vmem:[#allocation2 + $0x8] sm:$0xff] %v3031_v44   ;;  %3045 = vst [vmem:[#allocation2 + $0x18] sm:$0xff] %v3041_v45  }
 0x18a PF: > { %v649_v46 = vlaneseq  ;;  %v4250_v47 = vld [vmem:[%s396_s22] ss:$2 sm:$0xf]  ;;  %v5485_v62 = vmov 0.0   ;;  %p3007_p8 = scmp.ne.s32.totalorder %s4047_s13, 1 }
 0x18c   : > { %v4252_v49 = vshrl.u32 %v649_v46, 7  ;;  %v3579_v50 = vld [vmem:[#allocation2 + $0x10] sm:$0xff]   ;;  %v3581_v3 = vld [vmem:[#allocation2] sm:$0xff]  }
 0x18e   : > { %5565 = vst [vmem:[#allocation21_spill] sm:$0xff] %v4252_v49  ;;  %v4255_v51 = vadd.s32 8, %v4252_v49  ;;  %v4258_v52 = vsub.s32 0, %v4252_v49  ;;  %v4261_v53 = vadd.s32 16, %v4252_v49  ;;  %v4264_v54 = vadd.s32 24, %v4252_v49 }
 0x18f   : > { %v4269_v57 = vadd.s32 32, %v4252_v49  ;;  %v4272_v58 = vadd.s32 40, %v4252_v49  ;;  %v4275_v59 = vadd.s32 48, %v4252_v49  ;;  %v4278_v60 = vadd.s32 56, %v4252_v49 }
 0x190   : > { %v3578_v48 = vld [vmem:[#allocation2 + $0x18] sm:$0xff]   ;;  %5566 = vst [vmem:[#allocation22_spill] sm:$0xff] %v4255_v51  ;;  %5567 = vst [vmem:[#allocation23_spill] sm:$0xff] %v4258_v52  ;;  %v3580_v55 = vld [vmem:[#allocation2 + $0x8] sm:$0xff]   ;;  %v662_v56 = vrot.slane %v4250_v47, %v4258_v52  ;;  %v4281_v61 = vsub.s32 1, %v4252_v49  ;;  %v4320_v22 = vsub.s32 3, %v4252_v49 }
 0x191   : > { %3278 = vmatprep.subr.bf16.mxu0 %v3578_v48  ;;  %3470 = vmatprep.subr.bf16.mxu1 %v3578_v48  ;;  %5568 = vst [vmem:[#allocation24_spill] sm:$0xff] %v4261_v53  ;;  %5569 = vst [vmem:[#allocation25_spill] sm:$0xff] %v4264_v54  ;;  %v4327_v27 = vsub.s32 2, %v4252_v49 }
 0x192   : > { %3279 = vmatpush3.bf16.msra.mxu0 %v3578_v48  ;;  %3474 = vmatpush3.bf16.msra.mxu1 %v3578_v48  ;;  %5570 = vst [vmem:[#allocation26_spill] sm:$0xff] %v4269_v57  ;;  %5571 = vst [vmem:[#allocation27_spill] sm:$0xff] %v4272_v58  ;;  %vm675_vm1 = vcmp.eq.s32.totalorder %v4252_v49, %v662_v56  ;;  %vm679_vm2 = vcmp.eq.s32.totalorder %v4255_v51, %v662_v56 }
 0x193   : > { %3280 = vmatprep.subr.bf16.mxu0 %v3579_v50  ;;  %3471 = vmatprep.subr.bf16.mxu1 %v3579_v50  ;;  %5572 = vst [vmem:[#allocation28_spill] sm:$0xff] %v4275_v59  ;;  %5573 = vst [vmem:[#allocation29_spill] sm:$0xff] %v4278_v60  ;;  %vm683_vm3 = vcmp.eq.s32.totalorder %v4261_v53, %v662_v56  ;;  %vm687_vm4 = vcmp.eq.s32.totalorder %v4264_v54, %v662_v56  ;;  %v2906_v63 = vsel %vm675_vm1, 1.0, %v5485_v62 }
 0x194   : > { %5574 = vst [vmem:[#allocation30_spill] sm:$0xff] %v4281_v61  ;;  %v2910_v0 = vsel %vm679_vm2, 1.0, %v5485_v62  ;;  %v2914_v1 = vsel %vm683_vm3, 1.0, %v5485_v62  ;;  %v2918_v2 = vsel %vm687_vm4, 1.0, %v5485_v62  ;;  %vm691_vm5 = vcmp.eq.s32.totalorder %v4269_v57, %v662_v56  ;;  %5575 = vst [vmem:[#allocation31_spill] sm:$0xff] %v4320_v22 }
 0x195   : > { %v771_v4 = vpack.c.bf16 %v2910_v0, %v2906_v63  ;;  %vm695_vm6 = vcmp.eq.s32.totalorder %v4272_v58, %v662_v56  ;;  %v775_v5 = vpack.c.bf16 %v2918_v2, %v2914_v1  ;;  %v666_v6 = vrot.slane %v4250_v47, %v4281_v61  ;;  %5576 = vst [vmem:[#allocation32_spill] sm:$0xff] %v4327_v27 }
 0x196   : > { %3281 = vmatpush3.bf16.msra.mxu0 %v3579_v50  ;;  %3475 = vmatpush3.bf16.msra.mxu1 %v3579_v50  ;;  %v2922_v7 = vsel %vm691_vm5, 1.0, %v5485_v62  ;;  %v2926_v8 = vsel %vm695_vm6, 1.0, %v5485_v62  ;;  %vm699_vm7 = vcmp.eq.s32.totalorder %v4275_v59, %v662_v56  ;;  %vm703_vm8 = vcmp.eq.s32.totalorder %v4278_v60, %v662_v56 }
 0x197   : > { %3282 = vmatprep.subr.bf16.mxu0 %v3580_v55  ;;  %3472 = vmatprep.subr.bf16.mxu1 %v3580_v55  ;;  %vm676_vm9 = vcmp.eq.s32.totalorder %v4252_v49, %v666_v6  ;;  %vm680_vm10 = vcmp.eq.s32.totalorder %v4255_v51, %v666_v6  ;;  %vm684_vm11 = vcmp.eq.s32.totalorder %v4261_v53, %v666_v6  ;;  %v2930_v14 = vsel %vm699_vm7, 1.0, %v5485_v62 }
 0x198   : > { %989 = vxpose.xlu0.c.b16.start [1/4] (short) %v771_v4, 128  ;;  %vm688_vm12 = vcmp.eq.s32.totalorder %v4264_v54, %v666_v6  ;;  %v2907_v9 = vsel %vm676_vm9, 1.0, %v5485_v62  ;;  %v2911_v10 = vsel %vm680_vm10, 1.0, %v5485_v62  ;;  %v779_v11 = vpack.c.bf16 %v2926_v8, %v2922_v7 }
 0x199   : > { %v772_v12 = vpack.c.bf16 %v2911_v10, %v2907_v9  ;;  %v2915_v13 = vsel %vm684_vm11, 1.0, %v5485_v62  ;;  %v2934_v15 = vsel %vm703_vm8, 1.0, %v5485_v62  ;;  %v2919_v16 = vsel %vm688_vm12, 1.0, %v5485_v62 }
 0x19a   : > { %3283 = vmatpush3.bf16.msra.mxu0 %v3580_v55  ;;  %3476 = vmatpush3.bf16.msra.mxu1 %v3580_v55  ;;  %v776_v17 = vpack.c.bf16 %v2919_v16, %v2915_v13  ;;  %vm692_vm13 = vcmp.eq.s32.totalorder %v4269_v57, %v666_v6  ;;  %vm696_vm14 = vcmp.eq.s32.totalorder %v4272_v58, %v666_v6 }
 0x19b   : > { %3284 = vmatprep.subr.bf16.mxu0 %v3581_v3  ;;  %3473 = vmatprep.subr.bf16.mxu1 %v3581_v3  ;;  %v2923_v18 = vsel %vm692_vm13, 1.0, %v5485_v62  ;;  %v783_v19 = vpack.c.bf16 %v2934_v15, %v2930_v14  ;;  %v2927_v20 = vsel %vm696_vm14, 1.0, %v5485_v62  ;;  %vm700_vm15 = vcmp.eq.s32.totalorder %v4275_v59, %v666_v6 }
 0x19c   : > { %990 = vxpose.xlu0.c.b16.cont [2/4] (short) %v775_v5, 128  ;;  %1005 = vxpose.xlu1.c.b16.start [1/4] (short) %v772_v12, 128  ;;  %vm704_vm0 = vcmp.eq.s32.totalorder %v4278_v60, %v666_v6  ;;  %v780_v21 = vpack.c.bf16 %v2927_v20, %v2923_v18  ;;  %v2931_v23 = vsel %vm700_vm15, 1.0, %v5485_v62  ;;  %v674_v26 = vrot.slane %v4250_v47, %v4320_v22 }
 0x19d   : > { %v2935_v24 = vsel %vm704_vm0, 1.0, %v5485_v62  ;;  %v670_v28 = vrot.slane %v4250_v47, %v4327_v27 }
 0x19e   : > { %3285 = vmatpush3.bf16.msra.mxu0 %v3581_v3  ;;  %3477 = vmatpush3.bf16.msra.mxu1 %v3581_v3  ;;  %v784_v25 = vpack.c.bf16 %v2935_v24, %v2931_v23  ;;  %vm678_vm1 = vcmp.eq.s32.totalorder %v4252_v49, %v674_v26  ;;  %vm682_vm2 = vcmp.eq.s32.totalorder %v4255_v51, %v674_v26 }
 0x19f   : > { %v2909_v29 = vsel %vm678_vm1, 1.0, %v5485_v62  ;;  %v2913_v30 = vsel %vm682_vm2, 1.0, %v5485_v62  ;;  %vm686_vm3 = vcmp.eq.s32.totalorder %v4261_v53, %v674_v26  ;;  %vm690_vm4 = vcmp.eq.s32.totalorder %v4264_v54, %v674_v26 }
 0x1a0   : > { %991 = vxpose.xlu0.c.b16.cont [3/4] (short) %v779_v11, 128  ;;  %1006 = vxpose.xlu1.c.b16.cont [2/4] (short) %v776_v17, 128  ;;  %v774_v31 = vpack.c.bf16 %v2913_v30, %v2909_v29  ;;  %vm677_vm5 = vcmp.eq.s32.totalorder %v4252_v49, %v670_v28  ;;  %vm681_vm6 = vcmp.eq.s32.totalorder %v4255_v51, %v670_v28  ;;  %v2917_v32 = vsel %vm686_vm3, 1.0, %v5485_v62 }
 0x1a1   : > { %v2921_v33 = vsel %vm690_vm4, 1.0, %v5485_v62  ;;  %vm694_vm7 = vcmp.eq.s32.totalorder %v4269_v57, %v674_v26  ;;  %vm698_vm8 = vcmp.eq.s32.totalorder %v4272_v58, %v674_v26  ;;  %v2908_v34 = vsel %vm677_vm5, 1.0, %v5485_v62 }
 0x1a2   : > { %v2912_v35 = vsel %vm681_vm6, 1.0, %v5485_v62  ;;  %v778_v36 = vpack.c.bf16 %v2921_v33, %v2917_v32  ;;  %vm685_vm9 = vcmp.eq.s32.totalorder %v4261_v53, %v670_v28  ;;  %vm689_vm10 = vcmp.eq.s32.totalorder %v4264_v54, %v670_v28  ;;  %v946_v54 = vld [vmem:[%s4233_s17 + $0xa8] sm:$0xff] }
 0x1a3   : > { %v2925_v37 = vsel %vm694_vm7, 1.0, %v5485_v62  ;;  %v2929_v38 = vsel %vm698_vm8, 1.0, %v5485_v62  ;;  %vm702_vm11 = vcmp.eq.s32.totalorder %v4275_v59, %v674_v26  ;;  %vm706_vm12 = vcmp.eq.s32.totalorder %v4278_v60, %v674_v26 }
 0x1a4   : > { %992 = vxpose.xlu0.c.b16.end [4/4] (short) %v783_v19, 128  ;;  %1007 = vxpose.xlu1.c.b16.cont [3/4] (short) %v780_v21, 128  ;;  %v773_v39 = vpack.c.bf16 %v2912_v35, %v2908_v34  ;;  %v2916_v40 = vsel %vm685_vm9, 1.0, %v5485_v62  ;;  %v2920_v41 = vsel %vm689_vm10, 1.0, %v5485_v62  ;;  %v782_v42 = vpack.c.bf16 %v2929_v38, %v2925_v37  ;;  %v927_v34 = vld [vmem:[%s4233_s17 + $0x10] sm:$0xff] }
 0x1a5   : > { %vm693_vm13 = vcmp.eq.s32.totalorder %v4269_v57, %v670_v28  ;;  %vm697_vm14 = vcmp.eq.s32.totalorder %v4272_v58, %v670_v28  ;;  %v2933_v43 = vsel %vm702_vm11, 1.0, %v5485_v62  ;;  %v2937_v44 = vsel %vm706_vm12, 1.0, %v5485_v62 }
 0x1a6   : > { %v777_v45 = vpack.c.bf16 %v2920_v41, %v2916_v40  ;;  %v2924_v46 = vsel %vm693_vm13, 1.0, %v5485_v62  ;;  %v2928_v47 = vsel %vm697_vm14, 1.0, %v5485_v62  ;;  %v786_v48 = vpack.c.bf16 %v2937_v44, %v2933_v43  ;;  %v926_v43 = vld [vmem:[%s4233_s17 + $0x8] sm:$0xff] }
 0x1a7   : > { %vm701_vm15 = vcmp.eq.s32.totalorder %v4275_v59, %v670_v28  ;;  %vm705_vm0 = vcmp.eq.s32.totalorder %v4278_v60, %v670_v28  ;;  %v781_v50 = vpack.c.bf16 %v2928_v47, %v2924_v46  ;;  %vm1077_vm1 = vcmask 523264   ;;  %v948_v59 = vld [vmem:[%s4233_s17 + $0xb8] sm:$0xff] }
 0x1a8   : > { %1008 = vxpose.xlu1.c.b16.end [4/4] (short) %v784_v25, 128  ;;  %v2932_v55 = vsel %vm701_vm15, 1.0, %v5485_v62  ;;  %v2936_v56 = vsel %vm705_vm0, 1.0, %v5485_v62 }
 0x1a9   : > { %v785_v63 = vpack.c.bf16 %v2936_v56, %v2932_v55 }
 0x1b5   : > { %1037 = vxpose.xlu0.c.b16.start [1/4] (short) %v774_v31, 128 }
 0x1b9   : > { %1038 = vxpose.xlu0.c.b16.cont [2/4] (short) %v778_v36, 128  ;;  %1021 = vxpose.xlu1.c.b16.start [1/4] (short) %v773_v39, 128  ;;  %v925_v36 = vld [vmem:[%s4233_s17] sm:$0xff]  ;;  %v928_v39 = vld [vmem:[%s4233_s17 + $0x18] sm:$0xff] }
 0x1bd   : > { %1039 = vxpose.xlu0.c.b16.cont [3/4] (short) %v782_v42, 128  ;;  %1022 = vxpose.xlu1.c.b16.cont [2/4] (short) %v777_v45, 128 }
 0x1c1   : > { %1040 = vxpose.xlu0.c.b16.end [4/4] (short) %v786_v48, 128  ;;  %1023 = vxpose.xlu1.c.b16.cont [3/4] (short) %v781_v50, 128 }
 0x1c5   : > { %1024 = vxpose.xlu1.c.b16.end [4/4] (short) %v785_v63, 128  ;;  %v931_v63 = vld [vmem:[%s4233_s17 + $0x30] sm:$0xff] }
 0x1fa   : > { %v997_v0 = vpop.trf.xlu0 }
 0x1fb   : > { %3286 = vmatprep.mubr.msk.bf16.mxu0 %vm1077_vm1, %v997_v0 }
 0x1fe   : > { %v998_v1 = vpop.trf.xlu0  ;;  %v1013_v2 = vpop.trf.xlu1 }
 0x1ff   : > { %3287 = vmatmul.mubr.msk.bf16.vlgmr.msra.gmra.mxu0 %vm1077_vm1, %v998_v1 }
 0x202   : > { %v999_v3 = vpop.trf.xlu0  ;;  %v1014_v4 = vpop.trf.xlu1 }
 0x203   : > { %3290 = vmatprep.mubr.msk.bf16.mxu0 %vm1077_vm1, %v999_v3 }
 0x206   : > { %v1000_v5 = vpop.trf.xlu0  ;;  %v1015_v6 = vpop.trf.xlu1 }
 0x207   : > { %3291 = vmatmul.mubr.msk.bf16.gmra.mxu0 %vm1077_vm1, %v1000_v5  ;;  %v929_v5 = vld [vmem:[%s4233_s17 + $0x20] sm:$0xff] }
 0x20a   : > { %v1001_v7 = vpop.trf.xlu0  ;;  %v1016_v8 = vpop.trf.xlu1 }
 0x20b   : > { %3294 = vmatprep.mubr.msk.bf16.mxu0 %vm1077_vm1, %v1001_v7 }
 0x20e   : > { %v1002_v9 = vpop.trf.xlu0  ;;  %v1017_v10 = vpop.trf.xlu1 }
 0x20f   : > { %3295 = vmatmul.mubr.msk.bf16.gmra.mxu0 %vm1077_vm1, %v1002_v9 }
 0x212   : > { %v1003_v11 = vpop.trf.xlu0  ;;  %v1018_v13 = vpop.trf.xlu1 }
 0x213   : > { %3298 = vmatprep.mubr.msk.bf16.mxu0 %vm1077_vm1, %v1003_v11 }
 0x216   : > { %v1004_v12 = vpop.trf.xlu0  ;;  %v1019_v15 = vpop.trf.xlu1 }
 0x217   : > { %3299 = vmatmul.mubr.msk.bf16.gmra.mxu0 %vm1077_vm1, %v1004_v12  ;;  %v932_v12 = vld [vmem:[%s4233_s17 + $0x38] sm:$0xff] }
 0x218   : > { %3302 = vmatprep.mubr.msk.bf16.mxu0 %vm1077_vm1, %v1013_v2 }
 0x21a   : > { %v1045_v14 = vpop.trf.xlu0  ;;  %v1020_v18 = vpop.trf.xlu1 }
 0x21b   : > { %3334 = vmatprep.mubr.msk.bf16.mxu1 %vm1077_vm1, %v1045_v14 }
 0x21e   : > { %v1046_v16 = vpop.trf.xlu0  ;;  %v1029_v20 = vpop.trf.xlu1 }
 0x21f   : > { %3303 = vmatmul.mubr.msk.bf16.gmra.mxu0 %vm1077_vm1, %v1014_v4  ;;  %3335 = vmatmul.mubr.msk.bf16.vlgmr.msra.gmra.mxu1 %vm1077_vm1, %v1046_v16  ;;  %v930_v16 = vld [vmem:[%s4233_s17 + $0x28] sm:$0xff] }
 0x220   : > { %3306 = vmatprep.mubr.msk.bf16.mxu0 %vm1077_vm1, %v1015_v6 }
 0x222   : > { %v1047_v17 = vpop.trf.xlu0  ;;  %v1030_v24 = vpop.trf.xlu1 }
 0x223   : > { %3338 = vmatprep.mubr.msk.bf16.mxu1 %vm1077_vm1, %v1047_v17 }
 0x226   : > { %v1048_v19 = vpop.trf.xlu0  ;;  %v1031_v26 = vpop.trf.xlu1 }
 0x227   : > { %3307 = vmatmul.mubr.msk.bf16.gmra.mxu0 %vm1077_vm1, %v1016_v8  ;;  %3339 = vmatmul.mubr.msk.bf16.gmra.mxu1 %vm1077_vm1, %v1048_v19 }
 0x228   : > { %3310 = vmatprep.mubr.msk.bf16.mxu0 %vm1077_vm1, %v1017_v10 }
 0x22a   : > { %v1049_v21 = vpop.trf.xlu0  ;;  %v1032_v29 = vpop.trf.xlu1 }
 0x22b   : > { %3342 = vmatprep.mubr.msk.bf16.mxu1 %vm1077_vm1, %v1049_v21 }
 0x22e   : > { %v1050_v23 = vpop.trf.xlu0  ;;  %v1033_v30 = vpop.trf.xlu1 }
 0x22f   : > { %3311 = vmatmul.mubr.msk.bf16.gmra.mxu0 %vm1077_vm1, %v1018_v13  ;;  %3343 = vmatmul.mubr.msk.bf16.gmra.mxu1 %vm1077_vm1, %v1050_v23 }
 0x230   : > { %3314 = vmatprep.mubr.msk.bf16.mxu0 %vm1077_vm1, %v1019_v15 }
 0x232   : > { %v1051_v25 = vpop.trf.xlu0  ;;  %v1034_v31 = vpop.trf.xlu1 }
 0x233   : > { %3346 = vmatprep.mubr.msk.bf16.mxu1 %vm1077_vm1, %v1051_v25  ;;  %v935_v25 = vld [vmem:[%s4233_s17 + $0x50] sm:$0xff] }
 0x236   : > { %v1052_v28 = vpop.trf.xlu0  ;;  %v1035_v32 = vpop.trf.xlu1 }
 0x237   : > { %3315 = vmatmul.mubr.msk.bf16.gmra.mxu0 %vm1077_vm1, %v1020_v18  ;;  %3347 = vmatmul.mubr.msk.bf16.gmra.mxu1 %vm1077_vm1, %v1052_v28 }
 0x238   : > { %3318 = vmatprep.mubr.msk.bf16.mxu0 %vm1077_vm1, %v1029_v20 }
 0x23a   : > { %v1036_v33 = vpop.trf.xlu1 }
 0x23f   : > { %3319 = vmatmul.mubr.msk.bf16.gmra.mxu0 %vm1077_vm1, %v1030_v24 }
 0x240   : > { %3322 = vmatprep.mubr.msk.bf16.mxu0 %vm1077_vm1, %v1031_v26 }
 0x247   : > { %3323 = vmatmul.mubr.msk.bf16.gmra.mxu0 %vm1077_vm1, %v1032_v29 }
 0x248   : > { %3326 = vmatprep.mubr.msk.bf16.mxu0 %vm1077_vm1, %v1033_v30 }
 0x24f   : > { %3327 = vmatmul.mubr.msk.bf16.gmra.mxu0 %vm1077_vm1, %v1034_v31 }
 0x250   : > { %3330 = vmatprep.mubr.msk.bf16.mxu0 %vm1077_vm1, %v1035_v32 }
 0x257   : > { %3331 = vmatmul.mubr.msk.bf16.gmra.mxu0 %vm1077_vm1, %v1036_v33 }
 0x2bf   : > { %v3288_v35 = vpop.f32.mrf.mxu0 }
 0x2c0   : > { %v4397_v37 = vadd.f32 %v3288_v35, %v927_v34  ;;  %v933_v34 = vld [vmem:[%s4233_s17 + $0x40] sm:$0xff] }
 0x2c1   : > { %v1208_v38 = vpop.f32.mrf.mxu0 }
 0x2c2   : > { %v1465_v40 = vmul.f32 %v4397_v37, %v4397_v37  ;;  %v4402_v41 = vadd.f32 %v1208_v38, %v925_v36 }
 0x2c3   : > { %v3289_v42 = vpop.f32.mrf.mxu0 }
 0x2c4   : > { %v1529_v44 = vmul.f32 %v1465_v40, %v4397_v37  ;;  %v1463_v45 = vmul.f32 %v4402_v41, %v4402_v41  ;;  %v4408_v46 = vadd.f32 %v3289_v42, %v928_v39 }
 0x2c5   : > { %v1211_v47 = vpop.f32.mrf.mxu0 }
 0x2c6   : > { %v1593_v48 = vmul.f32 0.044715, %v1529_v44  ;;  %v1527_v50 = vmul.f32 %v1463_v45, %v4402_v41  ;;  %v1466_v55 = vmul.f32 %v4408_v46, %v4408_v46  ;;  %v4413_v56 = vadd.f32 %v1211_v47, %v926_v43  ;;  %v936_v44 = vld [vmem:[%s4233_s17 + $0x58] sm:$0xff] }
 0x2c7   : > { %v3292_v0 = vpop.f32.mrf.mxu0 }
 0x2c8   : > { %v1657_v1 = vadd.f32 %v1593_v48, %v4397_v37  ;;  %v1591_v2 = vmul.f32 0.044715, %v1527_v50  ;;  %v1530_v3 = vmul.f32 %v1466_v55, %v4408_v46  ;;  %v1464_v4 = vmul.f32 %v4413_v56, %v4413_v56 }
 0x2c9   : > { %v4421_v6 = vadd.f32 %v3292_v0, %v931_v63  ;;  %v1224_v7 = vpop.f32.mrf.mxu0 }
 0x2ca   : > { %v1721_v8 = vmul.f32 0.7978846, %v1657_v1  ;;  %v1655_v9 = vadd.f32 %v1591_v2, %v4402_v41  ;;  %v1594_v10 = vmul.f32 0.044715, %v1530_v3  ;;  %v1528_v11 = vmul.f32 %v1464_v4, %v4413_v56 }
 0x2cb   : > { %v1469_v13 = vmul.f32 %v4421_v6, %v4421_v6  ;;  %v4428_v14 = vadd.f32 %v1224_v7, %v929_v5  ;;  %v3293_v15 = vpop.f32.mrf.mxu0  ;;  %v934_v5 = vld [vmem:[%s4233_s17 + $0x48] sm:$0xff] }
 0x2cc   : > { %v1719_v17 = vmul.f32 0.7978846, %v1655_v9  ;;  %v1658_v18 = vadd.f32 %v1594_v10, %v4408_v46  ;;  %v1592_v19 = vmul.f32 0.044715, %v1528_v11  ;;  %v4435_v23 = vadd.f32 %v3293_v15, %v932_v12  ;;  %v939_v15 = vld [vmem:[%s4233_s17 + $0x70] sm:$0xff] }
 0x2cd   : > { %v1533_v20 = vmul.f32 %v1469_v13, %v4421_v6  ;;  %v1467_v21 = vmul.f32 %v4428_v14, %v4428_v14  ;;  %v1227_v24 = vpop.f32.mrf.mxu0  ;;  %3582 = vtanh.f32 %v1721_v8 }
 0x2ce   : > { %v1722_v26 = vmul.f32 0.7978846, %v1658_v18  ;;  %v1656_v28 = vadd.f32 %v1592_v19, %v4413_v56  ;;  %v4439_v29 = vadd.f32 %v1227_v24, %v930_v16  ;;  %v1470_v32 = vmul.f32 %v4435_v23, %v4435_v23 }
 0x2cf   : > { %v1597_v30 = vmul.f32 0.044715, %v1533_v20  ;;  %v1531_v31 = vmul.f32 %v1467_v21, %v4428_v14  ;;  %v3296_v33 = vpop.f32.mrf.mxu0  ;;  %3584 = vtanh.f32 %v1719_v17 }
 0x2d0   : > { %v1720_v35 = vmul.f32 0.7978846, %v1656_v28  ;;  %v1468_v36 = vmul.f32 %v4439_v29, %v4439_v29  ;;  %v4447_v38 = vadd.f32 %v3296_v33, %v935_v25  ;;  %3586 = vtanh.f32 %v1722_v26  ;;  %v937_v25 = vld [vmem:[%s4233_s17 + $0x60] sm:$0xff] }
 0x2d1   : > { %v1661_v39 = vadd.f32 %v1597_v30, %v4421_v6  ;;  %v1595_v40 = vmul.f32 0.044715, %v1531_v31  ;;  %v1534_v42 = vmul.f32 %v1470_v32, %v4435_v23  ;;  %v1240_v43 = vpop.f32.mrf.mxu0 }
 0x2d2   : > { %v1532_v45 = vmul.f32 %v1468_v36, %v4439_v29  ;;  %v1473_v47 = vmul.f32 %v4447_v38, %v4447_v38  ;;  %v4455_v48 = vadd.f32 %v1240_v43, %v933_v34  ;;  %3588 = vtanh.f32 %v1720_v35 }
 0x2d3   : > { %v1725_v50 = vmul.f32 0.7978846, %v1661_v39  ;;  %v1659_v55 = vadd.f32 %v1595_v40, %v4428_v14  ;;  %v1598_v63 = vmul.f32 0.044715, %v1534_v42  ;;  %v3297_v0 = vpop.f32.mrf.mxu0 }
 0x2d4   : > { %v1596_v1 = vmul.f32 0.044715, %v1532_v45  ;;  %v1537_v2 = vmul.f32 %v1473_v47, %v4447_v38  ;;  %v1471_v3 = vmul.f32 %v4455_v48, %v4455_v48  ;;  %v4461_v4 = vadd.f32 %v3297_v0, %v936_v44 }
 0x2d5   : > { %3590 = vtanh.f32 %v1725_v50  ;;  %v1723_v7 = vmul.f32 0.7978846, %v1659_v55  ;;  %v1662_v8 = vadd.f32 %v1598_v63, %v4435_v23  ;;  %v1243_v9 = vpop.f32.mrf.mxu0  ;;  %v940_v55 = vld [vmem:[%s4233_s17 + $0x78] sm:$0xff] }
 0x2d6   : > { %v1660_v10 = vadd.f32 %v1596_v1, %v4439_v29  ;;  %v1601_v11 = vmul.f32 0.044715, %v1537_v2  ;;  %v1535_v12 = vmul.f32 %v1471_v3, %v4455_v48  ;;  %v1474_v13 = vmul.f32 %v4461_v4, %v4461_v4 }
 0x2d7   : > { %3592 = vtanh.f32 %v1723_v7  ;;  %v1726_v16 = vmul.f32 0.7978846, %v1662_v8  ;;  %v4470_v17 = vadd.f32 %v1243_v9, %v934_v5  ;;  %v3300_v18 = vpop.f32.mrf.mxu0  ;;  %v938_v8 = vld [vmem:[%s4233_s17 + $0x68] sm:$0xff] }
 0x2d8   : > { %v1724_v19 = vmul.f32 0.7978846, %v1660_v10  ;;  %v1665_v20 = vadd.f32 %v1601_v11, %v4447_v38  ;;  %v1599_v21 = vmul.f32 0.044715, %v1535_v12  ;;  %v1538_v24 = vmul.f32 %v1474_v13, %v4461_v4 }
 0x2d9   : > { %3594 = vtanh.f32 %v1726_v16  ;;  %v1472_v26 = vmul.f32 %v4470_v17, %v4470_v17  ;;  %v4477_v28 = vadd.f32 %v3300_v18, %v939_v15  ;;  %v1256_v30 = vpop.f32.mrf.mxu0  ;;  %v943_v15 = vld [vmem:[%s4233_s17 + $0x90] sm:$0xff] }
 0x2da   : > { %3596 = vtanh.f32 %v1724_v19  ;;  %v1729_v31 = vmul.f32 0.7978846, %v1665_v20  ;;  %v1663_v32 = vadd.f32 %v1599_v21, %v4455_v48  ;;  %v3583_v33 = vpop.eup %3582  ;;  %v1602_v34 = vmul.f32 0.044715, %v1538_v24 }
 0x2db   : > { %v1536_v35 = vmul.f32 %v1472_v26, %v4470_v17  ;;  %v1477_v36 = vmul.f32 %v4477_v28, %v4477_v28  ;;  %v4483_v39 = vadd.f32 %v1256_v30, %v937_v25  ;;  %v3301_v40 = vpop.f32.mrf.mxu0  ;;  %v1849_v1 = vadd.f32 1.0, %v3583_v33 }
 0x2dc   : > { %3598 = vtanh.f32 %v1729_v31  ;;  %v1727_v42 = vmul.f32 0.7978846, %v1663_v32  ;;  %v3585_v43 = vpop.eup %3584  ;;  %v1666_v44 = vadd.f32 %v1602_v34, %v4461_v4  ;;  %v4493_v11 = vadd.f32 %v3301_v40, %v940_v55  ;;  %v975_v31 = vld [vmem:[%s4233_s17 + $0x190] sm:$0xff] }
 0x2dd   : > { %v1600_v45 = vmul.f32 0.044715, %v1536_v35  ;;  %v1541_v47 = vmul.f32 %v1477_v36, %v4477_v28  ;;  %v1475_v50 = vmul.f32 %v4483_v39, %v4483_v39  ;;  %v1259_v63 = vpop.f32.mrf.mxu0  ;;  %v3587_v0 = vpop.eup %3586  ;;  %v1847_v12 = vadd.f32 1.0, %v3585_v43 }
 0x2de   : > { %3600 = vtanh.f32 %v1727_v42  ;;  %v1730_v2 = vmul.f32 0.7978846, %v1666_v44  ;;  %v1850_v13 = vadd.f32 1.0, %v3587_v0  ;;  %v1478_v20 = vmul.f32 %v4493_v11, %v4493_v11 }
 0x2df   : > { %v1664_v3 = vadd.f32 %v1600_v45, %v4470_v17  ;;  %v1605_v5 = vmul.f32 0.044715, %v1541_v47  ;;  %v1539_v7 = vmul.f32 %v1475_v50, %v4483_v39  ;;  %v3304_v9 = vpop.f32.mrf.mxu0  ;;  %v3589_v10 = vpop.eup %3588  ;;  %v4498_v21 = vadd.f32 %v1259_v63, %v938_v8 }
 0x2e0   : > { %3602 = vtanh.f32 %v1730_v2  ;;  %v1913_v24 = vmul.f32 0.5, %v1849_v1  ;;  %v1848_v25 = vadd.f32 1.0, %v3589_v10  ;;  %v3336_v32 = vpop.f32.mrf.mxu1  ;;  %v1542_v36 = vmul.f32 %v1478_v20, %v4493_v11  ;;  %v941_v1 = vld [vmem:[%s4233_s17 + $0x80] sm:$0xff] }
 0x2e1   : > { %v1272_v16 = vpop.f32.mrf.mxu0  ;;  %v1603_v19 = vmul.f32 0.044715, %v1539_v7  ;;  %v1728_v26 = vmul.f32 0.7978846, %v1664_v3  ;;  %v1669_v30 = vadd.f32 %v1605_v5, %v4477_v28  ;;  %v1476_v40 = vmul.f32 %v4498_v21, %v4498_v21 }
 0x2e2   : > { %v3591_v18 = vpop.eup %3590  ;;  %v4505_v42 = vadd.f32 %v3304_v9, %v943_v15  ;;  %v1911_v43 = vmul.f32 0.5, %v1847_v12  ;;  %v1914_v44 = vmul.f32 0.5, %v1850_v13  ;;  %v4513_v0 = vadd.f32 %v3336_v32, %v975_v31  ;;  %v1400_v8 = vpop.f32.mrf.mxu1 }
 0x2e3   : > { %v3305_v33 = vpop.f32.mrf.mxu0  ;;  %v1853_v35 = vadd.f32 1.0, %v3591_v18  ;;  %v1667_v50 = vadd.f32 %v1603_v19, %v4483_v39  ;;  %v1540_v55 = vmul.f32 %v1476_v40, %v4498_v21  ;;  %v4517_v3 = vmul.f32 %v1913_v24, %v4397_v37 }
 0x2e4   : > { %v3593_v34 = vpop.eup %3592  ;;  %5577 = vst [vmem:[#allocation33_spill] sm:$0xff] %v4505_v42  ;;  %v1481_v63 = vmul.f32 %v4505_v42, %v4505_v42  ;;  %5578 = vst [vmem:[#allocation34_spill] sm:$0xff] %v4513_v0  ;;  %v1912_v5 = vmul.f32 0.5, %v1848_v25  ;;  %3604 = vtanh.f32 %v1728_v26  ;;  %v1606_v7 = vmul.f32 0.044715, %v1542_v36 }
 0x2e5   : > { %v4507_v45 = vpop.f32.mrf.mxu0  ;;  %5579 = vst [vmem:[#allocation35_spill] sm:$0xff] %v4517_v3  ;;  %v1917_v10 = vmul.f32 0.5, %v1853_v35  ;;  %v1851_v12 = vadd.f32 1.0, %v3593_v34  ;;  %v1733_v13 = vmul.f32 0.7978846, %v1669_v30  ;;  %v4523_v19 = vmul.f32 %v1911_v43, %v4402_v41  ;;  %v973_v43 = vld [vmem:[%s4233_s17 + $0x180] sm:$0xff] }
 0x2e6   : > { %v3595_v47 = vpop.eup %3594  ;;  %v1545_v15 = vmul.f32 %v1481_v63, %v4505_v42  ;;  %v1604_v20 = vmul.f32 0.044715, %v1540_v55  ;;  %v1513_v37 = vmul.f32 %v4513_v0, %v4513_v0  ;;  %v4527_v24 = vadd.f32 %v1272_v16, %v941_v1  ;;  %v944_v16 = vld [vmem:[%s4233_s17 + $0x98] sm:$0xff]  ;;  %v3337_v55 = vpop.f32.mrf.mxu1  ;;  %v959_v3 = vld [vmem:[%s4233_s17 + $0x110] sm:$0xff] }
 0x2e7   : > { %v3597_v2 = vpop.eup %3596  ;;  %v4519_v9 = vpop.f32.mrf.mxu0  ;;  %5580 = vst [vmem:[#allocation36_spill] sm:$0xff] %v4523_v19  ;;  %v4532_v26 = vmul.f32 %v1914_v44, %v4408_v46  ;;  %v1854_v30 = vadd.f32 1.0, %v3595_v47  ;;  %v1731_v32 = vmul.f32 0.7978846, %v1667_v50  ;;  %v1670_v35 = vadd.f32 %v1606_v7, %v4493_v11  ;;  %v985_v19 = vld [vmem:[%s4233_s17 + $0x1e0] sm:$0xff] }
 0x2e8   : > { %5581 = vst [vmem:[#allocation37_spill] sm:$0xff] %v4527_v24  ;;  %v1852_v31 = vadd.f32 1.0, %v3597_v2  ;;  %v1609_v36 = vmul.f32 0.044715, %v1545_v15  ;;  %v1577_v41 = vmul.f32 %v1513_v37, %v4513_v0  ;;  %v1479_v40 = vmul.f32 %v4527_v24, %v4527_v24 }
 0x2e9   : > { %v3599_v18 = vpop.eup %3598  ;;  %v4529_v25 = vpop.f32.mrf.mxu0  ;;  %5582 = vst [vmem:[#allocation38_spill] sm:$0xff] %v4532_v26  ;;  %v4543_v46 = vmul.f32 %v1912_v5, %v4413_v56  ;;  %v4546_v44 = vmul.f32 %v1917_v10, %v4421_v6  ;;  %v1915_v47 = vmul.f32 0.5, %v1851_v12  ;;  %3606 = vtanh.f32 %v1733_v13  ;;  %v976_v13 = vld [vmem:[%s4233_s17 + $0x198] sm:$0xff]  ;;  %v986_v26 = vld [vmem:[%s4233_s17 + $0x1e8] sm:$0xff] }
 0x2ea   : > { %v1857_v50 = vadd.f32 1.0, %v3599_v18  ;;  %v1668_v2 = vadd.f32 %v1604_v20, %v4498_v21  ;;  %v1543_v7 = vmul.f32 %v1479_v40, %v4527_v24  ;;  %3608 = vtanh.f32 %v1731_v32  ;;  %v1403_v18 = vpop.f32.mrf.mxu1 }
 0x2eb   : > { %v3601_v34 = vpop.eup %3600  ;;  %v4540_v63 = vpop.f32.mrf.mxu0  ;;  %5583 = vst [vmem:[#allocation39_spill] sm:$0xff] %v4543_v46  ;;  %v1641_v62 = vmul.f32 0.044715, %v1577_v41  ;;  %v4552_v27 = vadd.f32 %v1400_v8, %v973_v43  ;;  %v4554_v56 = vadd.f32 %v3305_v33, %v944_v16  ;;  %v1918_v6 = vmul.f32 0.5, %v1854_v30 }
 0x2ec   : > { %v1855_v1 = vadd.f32 1.0, %v3601_v34  ;;  %v1916_v5 = vmul.f32 0.5, %v1852_v31  ;;  %v1734_v10 = vmul.f32 0.7978846, %v1670_v35  ;;  %v1673_v12 = vadd.f32 %v1609_v36, %v4505_v42  ;;  %v987_v42 = vld [vmem:[%s4233_s17 + $0x1f0] sm:$0xff] }
 0x2ed   : > { %v4550_v15 = vpop.f32.mrf.mxu0  ;;  %v3603_v37 = vpop.eup %3602  ;;  %5584 = vst [vmem:[#allocation40_spill] sm:$0xff] %v4552_v27  ;;  %5585 = vst [vmem:[#allocation41_spill] sm:$0xff] %v4554_v56  ;;  %v4561_v34 = vmul.f32 %v1915_v47, %v4428_v14  ;;  %v1607_v40 = vmul.f32 0.044715, %v1543_v7  ;;  %v1511_v8 = vmul.f32 %v4552_v27, %v4552_v27  ;;  %v1482_v33 = vmul.f32 %v4554_v56, %v4554_v56  ;;  %v942_v47 = vld [vmem:[%s4233_s17 + $0x88] sm:$0xff] }
 0x2ee   : > { %v1921_v30 = vmul.f32 0.5, %v1857_v50  ;;  %v1919_v31 = vmul.f32 0.5, %v1855_v1  ;;  %v1858_v32 = vadd.f32 1.0, %v3603_v37  ;;  %v1732_v35 = vmul.f32 0.7978846, %v1668_v2  ;;  %v3340_v2 = vpop.f32.mrf.mxu1 }
 0x2ef   : > { %v4558_v20 = vpop.f32.mrf.mxu0  ;;  %5586 = vst [vmem:[#allocation42_spill] sm:$0xff] %v4561_v34  ;;  %v1705_v41 = vadd.f32 %v1641_v62, %v4513_v0  ;;  %v1575_v43 = vmul.f32 %v1511_v8, %v4552_v27  ;;  %v1546_v14 = vmul.f32 %v1482_v33, %v4554_v56  ;;  %v4572_v16 = vadd.f32 %v3337_v55, %v976_v13  ;;  %v979_v0 = vld [vmem:[%s4233_s17 + $0x1b0] sm:$0xff]  ;;  %v970_v34 = vld [vmem:[%s4233_s17 + $0x168] sm:$0xff] }
 0x2f0   : > { %v4576_v7 = vmul.f32 %v1918_v6, %v4435_v23  ;;  %v4579_v50 = vmul.f32 %v1916_v5, %v4439_v29  ;;  %3610 = vtanh.f32 %v1734_v10  ;;  %v1737_v1 = vmul.f32 0.7978846, %v1673_v12  ;;  %v974_v23 = vld [vmem:[%s4233_s17 + $0x188] sm:$0xff]  ;;  %v947_v10 = vld [vmem:[%s4233_s17 + $0xb0] sm:$0xff] }
 0x2f1   : > { %v4567_v36 = vpop.f32.mrf.mxu0  ;;  %5587 = vst [vmem:[#allocation43_spill] sm:$0xff] %v4572_v16  ;;  %v3605_v62 = vpop.eup %3604  ;;  %v1671_v8 = vadd.f32 %v1607_v40, %v4527_v24  ;;  %v1639_v33 = vmul.f32 0.044715, %v1575_v43  ;;  %v1610_v55 = vmul.f32 0.044715, %v1546_v14  ;;  %v1514_v13 = vmul.f32 %v4572_v16, %v4572_v16 }
 0x2f2   : > { %5588 = vst [vmem:[#allocation44_spill] sm:$0xff] %v4579_v50  ;;  %v4588_v6 = vmul.f32 %v1921_v30, %v4447_v38  ;;  %v1922_v29 = vmul.f32 0.5, %v1858_v32  ;;  %3612 = vtanh.f32 %v1732_v35  ;;  %v4591_v5 = vadd.f32 %v4507_v45, %v942_v47  ;;  %v1416_v35 = vpop.f32.mrf.mxu1 }
 0x2f3   : > { %v4581_v37 = vpop.f32.mrf.mxu0  ;;  %v4597_v22 = vmul.f32 %v1919_v31, %v4455_v48  ;;  %v1769_v40 = vmul.f32 0.7978846, %v1705_v41  ;;  %v1703_v43 = vadd.f32 %v1639_v33, %v4552_v27  ;;  %v1578_v14 = vmul.f32 %v1514_v13, %v4572_v16 }
 0x2f4   : > { %5589 = vst [vmem:[#allocation45_spill] sm:$0xff] %v4591_v5  ;;  %v1856_v38 = vadd.f32 1.0, %v3605_v62  ;;  %v1674_v30 = vadd.f32 %v1610_v55, %v4554_v56  ;;  %v1480_v45 = vmul.f32 %v4591_v5, %v4591_v5  ;;  %v4605_v32 = vadd.f32 %v1403_v18, %v974_v23  ;;  %v945_v23 = vld [vmem:[%s4233_s17 + $0xa0] sm:$0xff] }
 0x2f5   : > { %v4594_v12 = vpop.f32.mrf.mxu0  ;;  %5590 = vst [vmem:[#allocation46_spill] sm:$0xff] %v4597_v22  ;;  %3614 = vtanh.f32 %v1737_v1  ;;  %v1735_v48 = vmul.f32 0.7978846, %v1671_v8  ;;  %v1642_v31 = vmul.f32 0.044715, %v1578_v14  ;;  %v4610_v41 = vadd.f32 %v4519_v9, %v947_v10 }
 0x2f6   : > { %5591 = vst [vmem:[#allocation47_spill] sm:$0xff] %v4605_v32  ;;  %v3607_v33 = vpop.eup %3606  ;;  %v4613_v13 = vmul.f32 %v1922_v29, %v4461_v4  ;;  %v1544_v62 = vmul.f32 %v1480_v45, %v4591_v5  ;;  %v1512_v55 = vmul.f32 %v4605_v32, %v4605_v32  ;;  %v4618_v18 = vadd.f32 %v3340_v2, %v979_v0  ;;  %v3341_v2 = vpop.f32.mrf.mxu1 }
 0x2f7   : > { %v4607_v47 = vpop.f32.mrf.mxu0  ;;  %5592 = vst [vmem:[#allocation48_spill] sm:$0xff] %v4610_v41  ;;  %3616 = vtanh.f32 %v1769_v40  ;;  %v1767_v1 = vmul.f32 0.7978846, %v1703_v43  ;;  %v1706_v8 = vadd.f32 %v1642_v31, %v4572_v16  ;;  %v1485_v9 = vmul.f32 %v4610_v41, %v4610_v41  ;;  %v4626_v4 = vpop.eup %3608 }
 0x2f8   : > { %5593 = vst [vmem:[#allocation49_spill] sm:$0xff] %v4618_v18  ;;  %v1738_v29 = vmul.f32 0.7978846, %v1674_v30  ;;  %v1608_v10 = vmul.f32 0.044715, %v1544_v62  ;;  %v1576_v14 = vmul.f32 %v1512_v55, %v4605_v32  ;;  %v1517_v0 = vmul.f32 %v4618_v18, %v4618_v18  ;;  %v977_v55 = vld [vmem:[%s4233_s17 + $0x1a0] sm:$0xff] }
 0x2f9   : > { %v4621_v27 = vpop.f32.mrf.mxu0  ;;  %v1920_v40 = vmul.f32 0.5, %v1856_v38  ;;  %3618 = vtanh.f32 %v1735_v48  ;;  %v1549_v43 = vmul.f32 %v1485_v9, %v4610_v41  ;;  %v4635_v31 = vadd.f32 %v4529_v25, %v945_v23  ;;  %v1419_v9 = vpop.f32.mrf.mxu1 }
 0x2fa   : > { %v1770_v16 = vmul.f32 0.7978846, %v1706_v8  ;;  %v1672_v60 = vadd.f32 %v1608_v10, %v4591_v5  ;;  %v1640_v30 = vmul.f32 0.044715, %v1576_v14  ;;  %v1581_v62 = vmul.f32 %v1517_v0, %v4618_v18 }
 0x2fb   : > { %v4631_v45 = vpop.f32.mrf.mxu0  ;;  %5594 = vst [vmem:[#allocation50_spill] sm:$0xff] %v4635_v31  ;;  %v4643_v57 = vadd.f32 1.0, %v3607_v33  ;;  %3620 = vtanh.f32 %v1767_v1  ;;  %v1613_v38 = vmul.f32 0.044715, %v1549_v43  ;;  %v1483_v25 = vmul.f32 %v4635_v31, %v4635_v31  ;;  %v980_v43 = vld [vmem:[%s4233_s17 + $0x1b8] sm:$0xff] }
 0x2fc   : > { %3622 = vtanh.f32 %v1738_v29  ;;  %v1736_v48 = vmul.f32 0.7978846, %v1672_v60  ;;  %v1704_v23 = vadd.f32 %v1640_v30, %v4605_v32  ;;  %v1645_v8 = vmul.f32 0.044715, %v1581_v62 }
 0x2fd   : > { %v4641_v58 = vpop.f32.mrf.mxu0  ;;  %v4648_v10 = vpop.eup %3610  ;;  %v1677_v14 = vadd.f32 %v1613_v38, %v4610_v41  ;;  %v1547_v0 = vmul.f32 %v1483_v25, %v4635_v31  ;;  %v4652_v33 = vadd.f32 %v1416_v35, %v977_v55  ;;  %v4655_v1 = vadd.f32 %v4540_v63, %v948_v59  ;;  %v978_v25 = vld [vmem:[%s4233_s17 + $0x1a8] sm:$0xff] }
 0x2fe   : > { %v4662_v29 = vmul.f32 %v1920_v40, %v4470_v17  ;;  %3624 = vtanh.f32 %v1770_v16  ;;  %v1768_v30 = vmul.f32 0.7978846, %v1704_v23  ;;  %v1709_v62 = vadd.f32 %v1645_v8, %v4618_v18  ;;  %v951_v40 = vld [vmem:[%s4233_s17 + $0xd0] sm:$0xff]  ;;  %v3344_v23 = vpop.f32.mrf.mxu1 }
 0x2ff   : > { %5595 = vst [vmem:[#allocation51_spill] sm:$0xff] %v4652_v33  ;;  %5596 = vst [vmem:[#allocation52_spill] sm:$0xff] %v4655_v1  ;;  %v4659_v60 = vpop.f32.mrf.mxu0  ;;  %v4665_v38 = vpop.eup %3612  ;;  %v1741_v35 = vmul.f32 0.7978846, %v1677_v14  ;;  %v1611_v55 = vmul.f32 0.044715, %v1547_v0  ;;  %v1515_v59 = vmul.f32 %v4652_v33, %v4652_v33  ;;  %v1486_v63 = vmul.f32 %v4655_v1, %v4655_v1 }
 0x300   : > { %5597 = vst [vmem:[#allocation53_spill] sm:$0xff] %v4662_v29  ;;  %3626 = vtanh.f32 %v1736_v48  ;;  %v1773_v32 = vmul.f32 0.7978846, %v1709_v62  ;;  %v4672_v17 = vadd.f32 %v3341_v2, %v980_v43  ;;  %v4675_v16 = vadd.f32 %v4550_v15, %v946_v54  ;;  %v983_v18 = vld [vmem:[%s4233_s17 + $0x1d0] sm:$0xff] }
 0x301   : > { %3628 = vtanh.f32 %v1768_v30  ;;  %v1675_v8 = vadd.f32 %v1611_v55, %v4635_v31  ;;  %v1579_v14 = vmul.f32 %v1515_v59, %v4652_v33  ;;  %v1550_v0 = vmul.f32 %v1486_v63, %v4655_v1  ;;  %v4682_v53 = vpop.f32.mrf.mxu0 }
 0x302   : > { %5598 = vst [vmem:[#allocation54_spill] sm:$0xff] %v4672_v17  ;;  %5599 = vst [vmem:[#allocation55_spill] sm:$0xff] %v4675_v16  ;;  %v4684_v48 = vpop.eup %3614  ;;  %3630 = vtanh.f32 %v1741_v35  ;;  %v1518_v54 = vmul.f32 %v4672_v17, %v4672_v17  ;;  %v1484_v15 = vmul.f32 %v4675_v16, %v4675_v16  ;;  %v4690_v2 = vadd.f32 %v1419_v9, %v978_v25  ;;  %v949_v9 = vld [vmem:[%s4233_s17 + $0xc0] sm:$0xff]  ;;  %v1432_v25 = vpop.f32.mrf.mxu1 }
 0x303   : > { %5600 = vst [vmem:[#allocation56_spill] sm:$0xff] %v4684_v48  ;;  %3632 = vtanh.f32 %v1773_v32  ;;  %v1643_v43 = vmul.f32 0.044715, %v1579_v14  ;;  %v1614_v30 = vmul.f32 0.044715, %v1550_v0  ;;  %v4693_v62 = vadd.f32 %v4558_v20, %v951_v40  ;;  %v4708_v0 = vpop.f32.mrf.mxu0 }
 0x304   : > { %5601 = vst [vmem:[#allocation57_spill] sm:$0xff] %v4690_v2  ;;  %v4695_v55 = vpop.eup %3616  ;;  %v1582_v59 = vmul.f32 %v1518_v54, %v4672_v17  ;;  %v1548_v35 = vmul.f32 %v1484_v15, %v4675_v16  ;;  %v1516_v63 = vmul.f32 %v4690_v2, %v4690_v2  ;;  %v4701_v24 = vadd.f32 %v3344_v23, %v983_v18  ;;  %v981_v23 = vld [vmem:[%s4233_s17 + $0x1c0] sm:$0xff]  ;;  %v3345_v52 = vpop.f32.mrf.mxu1 }
 0x305   : > { %5602 = vst [vmem:[#allocation58_spill] sm:$0xff] %v4695_v55  ;;  %v1739_v32 = vmul.f32 0.7978846, %v1675_v8  ;;  %v1707_v14 = vadd.f32 %v1643_v43, %v4652_v33  ;;  %v1678_v20 = vadd.f32 %v1614_v30, %v4655_v1  ;;  %v1489_v40 = vmul.f32 %v4693_v62, %v4693_v62 }
 0x306   : > { %5603 = vst [vmem:[#allocation59_spill] sm:$0xff] %v4701_v24  ;;  %v4710_v54 = vpop.eup %3618  ;;  %v1646_v15 = vmul.f32 0.044715, %v1582_v59  ;;  %v1612_v55 = vmul.f32 0.044715, %v1548_v35  ;;  %v1580_v51 = vmul.f32 %v1516_v63, %v4690_v2  ;;  %v1521_v18 = vmul.f32 %v4701_v24, %v4701_v24 }
 0x307   : > { %5604 = vst [vmem:[#allocation60_spill] sm:$0xff] %v4710_v54  ;;  %v1771_v8 = vmul.f32 0.7978846, %v1707_v14  ;;  %v1742_v43 = vmul.f32 0.7978846, %v1678_v20  ;;  %v1553_v30 = vmul.f32 %v1489_v40, %v4693_v62  ;;  %v4718_v33 = vadd.f32 %v4567_v36, %v949_v9  ;;  %v952_v36 = vld [vmem:[%s4233_s17 + $0xd8] sm:$0xff] }
 0x308   : > { %v4720_v49 = vpop.eup %3620  ;;  %v1710_v59 = vadd.f32 %v1646_v15, %v4672_v17  ;;  %v1676_v35 = vadd.f32 %v1612_v55, %v4675_v16  ;;  %v1644_v63 = vmul.f32 0.044715, %v1580_v51  ;;  %v1585_v5 = vmul.f32 %v1521_v18, %v4701_v24  ;;  %v984_v9 = vld [vmem:[%s4233_s17 + $0x1d8] sm:$0xff] }
 0x309   : > { %5605 = vst [vmem:[#allocation61_spill] sm:$0xff] %v4720_v49  ;;  %v4725_v61 = vpop.eup %3622  ;;  %3634 = vtanh.f32 %v1739_v32  ;;  %v1617_v14 = vmul.f32 0.044715, %v1553_v30  ;;  %v1487_v20 = vmul.f32 %v4718_v33, %v4718_v33  ;;  %v4729_v40 = vadd.f32 %v1432_v25, %v981_v23  ;;  %v4733_v49 = vpop.f32.mrf.mxu0 }
 0x30a   : > { %5606 = vst [vmem:[#allocation62_spill] sm:$0xff] %v4725_v61  ;;  %3636 = vtanh.f32 %v1771_v8  ;;  %v1774_v55 = vmul.f32 0.7978846, %v1710_v59  ;;  %v1740_v51 = vmul.f32 0.7978846, %v1676_v35  ;;  %v1708_v15 = vadd.f32 %v1644_v63, %v4690_v2  ;;  %v950_v59 = vld [vmem:[%s4233_s17 + $0xc8] sm:$0xff]  ;;  %v1435_v35 = vpop.f32.mrf.mxu1 }
 0x30b   : > { %5607 = vst [vmem:[#allocation63_spill] sm:$0xff] %v4729_v40  ;;  %v4736_v18 = vpop.eup %3624  ;;  %v1681_v32 = vadd.f32 %v1617_v14, %v4693_v62  ;;  %v1649_v30 = vmul.f32 0.044715, %v1585_v5  ;;  %v1551_v17 = vmul.f32 %v1487_v20, %v4718_v33  ;;  %v1519_v25 = vmul.f32 %v4729_v40, %v4729_v40  ;;  %v982_v2 = vld [vmem:[%s4233_s17 + $0x1c8] sm:$0xff] }
 0x30c   : > { %5608 = vst [vmem:[#allocation64_spill] sm:$0xff] %v4736_v18  ;;  %3638 = vtanh.f32 %v1742_v43  ;;  %v1772_v23 = vmul.f32 0.7978846, %v1708_v15  ;;  %v4743_v56 = vadd.f32 %v4581_v37, %v952_v36  ;;  %v4745_v8 = vadd.f32 %v3345_v52, %v984_v9  ;;  %v4752_v18 = vpop.f32.mrf.mxu0  ;;  %v955_v9 = vld [vmem:[%s4233_s17 + $0xf0] sm:$0xff]  ;;  %v3348_v31 = vpop.f32.mrf.mxu1 }
 0x30d   : > { %v4748_v63 = vpop.eup %3626  ;;  %3640 = vtanh.f32 %v1774_v55  ;;  %v1745_v14 = vmul.f32 0.7978846, %v1681_v32  ;;  %v1713_v5 = vadd.f32 %v1649_v30, %v4701_v24  ;;  %v1615_v20 = vmul.f32 0.044715, %v1551_v17 }
 0x30e   : > { %5609 = vst [vmem:[#allocation65_spill] sm:$0xff] %v4745_v8  ;;  %5610 = vst [vmem:[#allocation66_spill] sm:$0xff] %v4748_v63  ;;  %v4754_v43 = vpop.eup %3628  ;;  %3642 = vtanh.f32 %v1740_v51  ;;  %v1583_v37 = vmul.f32 %v1519_v25, %v4729_v40  ;;  %v1490_v52 = vmul.f32 %v4743_v56, %v4743_v56  ;;  %v1522_v36 = vmul.f32 %v4745_v8, %v4745_v8 }
 0x30f   : > { %5611 = vst [vmem:[#allocation67_spill] sm:$0xff] %v4754_v43  ;;  %v4762_v55 = vpop.eup %3630  ;;  %v1925_v17 = vmul.f32 0.5, %v4643_v57  ;;  %3644 = vtanh.f32 %v1772_v23  ;;  %v1679_v15 = vadd.f32 %v1615_v20, %v4718_v33  ;;  %v4767_v32 = vadd.f32 %v4594_v12, %v950_v59  ;;  %v4781_v59 = vpop.f32.mrf.mxu0 }
 0x310   : > { %v4769_v51 = vpop.eup %3632  ;;  %v1647_v30 = vmul.f32 0.044715, %v1583_v37  ;;  %v1554_v25 = vmul.f32 %v1490_v52, %v4743_v56  ;;  %v1586_v43 = vmul.f32 %v1522_v36, %v4745_v8  ;;  %v4773_v24 = vadd.f32 %v1435_v35, %v982_v2  ;;  %v953_v35 = vld [vmem:[%s4233_s17 + $0xe0] sm:$0xff] }
 0x311   : > { %5612 = vst [vmem:[#allocation68_spill] sm:$0xff] %v4769_v51  ;;  %3646 = vtanh.f32 %v1745_v14  ;;  %v1777_v57 = vmul.f32 0.7978846, %v1713_v5  ;;  %v1488_v23 = vmul.f32 %v4767_v32, %v4767_v32  ;;  %v4779_v12 = vadd.f32 %v4607_v47, %v955_v9 }
 0x312   : > { %5613 = vst [vmem:[#allocation69_spill] sm:$0xff] %v4773_v24  ;;  %v1711_v20 = vadd.f32 %v1647_v30, %v4729_v40  ;;  %v1618_v37 = vmul.f32 0.044715, %v1554_v25  ;;  %v1650_v52 = vmul.f32 0.044715, %v1586_v43  ;;  %v1520_v2 = vmul.f32 %v4773_v24, %v4773_v24  ;;  %v1448_v25 = vpop.f32.mrf.mxu1 }
 0x313   : > { %v1743_v14 = vmul.f32 0.7978846, %v1679_v15  ;;  %v1552_v5 = vmul.f32 %v1488_v23, %v4767_v32  ;;  %v1493_v36 = vmul.f32 %v4779_v12, %v4779_v12  ;;  %v4790_v47 = vadd.f32 %v3348_v31, %v987_v42  ;;  %v956_v42 = vld [vmem:[%s4233_s17 + $0xf8] sm:$0xff]  ;;  %v4803_v31 = vpop.f32.mrf.mxu0 }
 0x314   : > { %v1775_v9 = vmul.f32 0.7978846, %v1711_v20  ;;  %v1682_v51 = vadd.f32 %v1618_v37, %v4743_v56  ;;  %v1714_v30 = vadd.f32 %v1650_v52, %v4745_v8  ;;  %v1584_v43 = vmul.f32 %v1520_v2, %v4773_v24 }
 0x315   : > { %5614 = vst [vmem:[#allocation70_spill] sm:$0xff] %v4790_v47  ;;  %v1616_v40 = vmul.f32 0.044715, %v1552_v5  ;;  %v1557_v46 = vmul.f32 %v1493_v36, %v4779_v12  ;;  %v1525_v15 = vmul.f32 %v4790_v47, %v4790_v47  ;;  %v4799_v23 = vadd.f32 %v4621_v27, %v953_v35 }
 0x316   : > { %v4805_v20 = vpop.eup %3634  ;;  %v4808_v37 = vadd.f32 1.0, %v4626_v4  ;;  %3648 = vtanh.f32 %v1777_v57  ;;  %v1746_v52 = vmul.f32 0.7978846, %v1682_v51  ;;  %v1648_v2 = vmul.f32 0.044715, %v1584_v43  ;;  %v988_v51 = vld [vmem:[%s4233_s17 + $0x1f8] sm:$0xff]  ;;  %v3349_v57 = vpop.f32.mrf.mxu1 }
 0x317   : > { %5615 = vst [vmem:[#allocation71_spill] sm:$0xff] %v4805_v20  ;;  %v4810_v5 = vpop.eup %3636  ;;  %v1680_v36 = vadd.f32 %v1616_v40, %v4767_v32  ;;  %v1621_v8 = vmul.f32 0.044715, %v1557_v46  ;;  %v1589_v27 = vmul.f32 %v1525_v15, %v4790_v47  ;;  %v1491_v35 = vmul.f32 %v4799_v23, %v4799_v23 }
 0x318   : > { %5616 = vst [vmem:[#allocation72_spill] sm:$0xff] %v4810_v5  ;;  %3650 = vtanh.f32 %v1743_v14  ;;  %v1712_v63 = vadd.f32 %v1648_v2, %v4773_v24  ;;  %v4817_v54 = vadd.f32 %v1448_v25, %v985_v19  ;;  %v4820_v4 = vadd.f32 %v4631_v45, %v956_v42  ;;  %v4828_v5 = vpop.f32.mrf.mxu0  ;;  %v1451_v16 = vpop.f32.mrf.mxu1 }
 0x319   : > { %v4823_v43 = vpop.eup %3638  ;;  %v4826_v46 = vmul.f32 %v1925_v17, %v4477_v28  ;;  %3652 = vtanh.f32 %v1775_v9  ;;  %v1778_v40 = vmul.f32 0.7978846, %v1714_v30  ;;  %v1653_v15 = vmul.f32 0.044715, %v1589_v27  ;;  %v954_v17 = vld [vmem:[%s4233_s17 + $0xe8] sm:$0xff] }
 0x31a   : > { %5617 = vst [vmem:[#allocation73_spill] sm:$0xff] %v4817_v54  ;;  %v4830_v14 = vpop.eup %3640  ;;  %v1685_v19 = vadd.f32 %v1621_v8, %v4779_v12  ;;  %v1555_v45 = vmul.f32 %v1491_v35, %v4799_v23  ;;  %v1523_v25 = vmul.f32 %v4817_v54, %v4817_v54  ;;  %v1494_v28 = vmul.f32 %v4820_v4, %v4820_v4 }
 0x31b   : > { %5618 = vst [vmem:[#allocation74_spill] sm:$0xff] %v4830_v14  ;;  %v4839_v9 = vpop.eup %3642  ;;  %3654 = vtanh.f32 %v1746_v52  ;;  %v1744_v30 = vmul.f32 0.7978846, %v1680_v36  ;;  %v1776_v42 = vmul.f32 0.7978846, %v1712_v63  ;;  %v4841_v2 = vadd.f32 %v3349_v57, %v988_v51  ;;  %v957_v36 = vld [vmem:[%s4233_s17 + $0x100] sm:$0xff]  ;;  %v4857_v51 = vpop.f32.mrf.mxu0 }
 0x31c   : > { %5619 = vst [vmem:[#allocation75_spill] sm:$0xff] %v4839_v9  ;;  %v4843_v8 = vpop.eup %3644  ;;  %v1717_v27 = vadd.f32 %v1653_v15, %v4790_v47  ;;  %v1619_v35 = vmul.f32 0.044715, %v1555_v45  ;;  %v1587_v24 = vmul.f32 %v1523_v25, %v4817_v54  ;;  %v1558_v14 = vmul.f32 %v1494_v28, %v4820_v4 }
 0x31d   : > { %5620 = vst [vmem:[#allocation76_spill] sm:$0xff] %v4841_v2  ;;  %5621 = vst [vmem:[#allocation77_spill] sm:$0xff] %v4843_v8  ;;  %v1862_v61 = vadd.f32 1.0, %v4648_v10  ;;  %3656 = vtanh.f32 %v1778_v40  ;;  %v1526_v63 = vmul.f32 %v4841_v2, %v4841_v2  ;;  %v4854_v52 = vadd.f32 %v4641_v58, %v954_v17 }
 0x31e   : > { %v4859_v57 = vpop.eup %3646  ;;  %v1749_v15 = vmul.f32 0.7978846, %v1685_v19  ;;  %v1683_v45 = vadd.f32 %v1619_v35, %v4799_v23  ;;  %v1651_v25 = vmul.f32 0.044715, %v1587_v24  ;;  %v1622_v28 = vmul.f32 0.044715, %v1558_v14 }
 0x31f   : > { %3658 = vtanh.f32 %v1744_v30  ;;  %v1492_v10 = vmul.f32 %v4854_v52, %v4854_v52  ;;  %v4864_v40 = vadd.f32 %v1451_v16, %v986_v26  ;;  %v4867_v58 = vadd.f32 %v4659_v60, %v959_v3  ;;  %v960_v26 = vld [vmem:[%s4233_s17 + $0x118] sm:$0xff]  ;;  %v958_v16 = vld [vmem:[%s4233_s17 + $0x108] sm:$0xff]  ;;  %v4879_v3 = vpop.f32.mrf.mxu0 }
 0x320   : > { %3660 = vtanh.f32 %v1776_v42  ;;  %v1781_v17 = vmul.f32 0.7978846, %v1717_v27  ;;  %v1747_v8 = vmul.f32 0.7978846, %v1683_v45  ;;  %v1590_v19 = vmul.f32 %v1526_v63, %v4841_v2 }
 0x321   : > { %v1686_v47 = vadd.f32 %v1622_v28, %v4820_v4  ;;  %v1556_v35 = vmul.f32 %v1492_v10, %v4854_v52  ;;  %v1497_v24 = vmul.f32 %v4867_v58, %v4867_v58  ;;  %v4875_v14 = vadd.f32 %v4682_v53, %v957_v36 }
 0x322   : > { %v4882_v60 = vmul.f32 0.5, %v4808_v37  ;;  %v4884_v30 = vmul.f32 0.5, %v1862_v61  ;;  %3662 = vtanh.f32 %v1749_v15  ;;  %v1715_v42 = vadd.f32 %v1651_v25, %v4817_v54  ;;  %v963_v25 = vld [vmem:[%s4233_s17 + $0x130] sm:$0xff]  ;;  %v3329_v54 = vpop.f32.mrf.mxu0 }
 0x323   : > { %5622 = vst [vmem:[#allocation78_spill] sm:$0xff] %v4875_v14  ;;  %v4887_v27 = vpop.eup %3648  ;;  %v1620_v63 = vmul.f32 0.044715, %v1556_v35  ;;  %v1524_v53 = vmul.f32 %v4864_v40, %v4864_v40  ;;  %v1561_v36 = vmul.f32 %v1497_v24, %v4867_v58  ;;  %v1495_v45 = vmul.f32 %v4875_v14, %v4875_v14 }
 0x324   : > { %5623 = vst [vmem:[#allocation79_spill] sm:$0xff] %v4887_v27  ;;  %3664 = vtanh.f32 %v1781_v17  ;;  %v1654_v37 = vmul.f32 0.044715, %v1590_v19  ;;  %v4895_v61 = vadd.f32 %v4708_v0, %v960_v26  ;;  %v4898_v15 = vadd.f32 %v4733_v49, %v958_v16  ;;  %v1371_v22 = vpop.f32.mrf.mxu0 }
 0x325   : > { %v4901_v28 = vpop.eup %3650  ;;  %3666 = vtanh.f32 %v1747_v8  ;;  %v1750_v10 = vmul.f32 0.7978846, %v1686_v47  ;;  %v1684_v35 = vadd.f32 %v1620_v63, %v4854_v52  ;;  %v1625_v24 = vmul.f32 0.044715, %v1561_v36  ;;  %v961_v8 = vld [vmem:[%s4233_s17 + $0x120] sm:$0xff] }
 0x326   : > { %5624 = vst [vmem:[#allocation80_spill] sm:$0xff] %v4895_v61  ;;  %5625 = vst [vmem:[#allocation81_spill] sm:$0xff] %v4898_v15  ;;  %v4904_v27 = vpop.eup %3652  ;;  %v4906_v17 = vmul.f32 0.7978846, %v1715_v42  ;;  %v1559_v0 = vmul.f32 %v1495_v45, %v4875_v14  ;;  %v1498_v49 = vmul.f32 %v4895_v61, %v4895_v61  ;;  %v1496_v19 = vmul.f32 %v4898_v15, %v4898_v15 }
 0x327   : > { %5626 = vst [vmem:[#allocation82_spill] sm:$0xff] %v4904_v27  ;;  %v1748_v47 = vmul.f32 0.7978846, %v1684_v35  ;;  %v4915_v26 = vmul.f32 %v1524_v53, %v4864_v40  ;;  %v1689_v16 = vadd.f32 %v1625_v24, %v4867_v58  ;;  %v4919_v63 = vadd.f32 %v4752_v18, %v963_v25  ;;  %v964_v35 = vld [vmem:[%s4233_s17 + $0x138] sm:$0xff]  ;;  %v962_v25 = vld [vmem:[%s4233_s17 + $0x128] sm:$0xff] }
 0x328   : > { %v4921_v42 = vpop.eup %3654  ;;  %v4924_v36 = vadd.f32 %v1654_v37, %v4841_v2  ;;  %v1623_v45 = vmul.f32 0.044715, %v1559_v0  ;;  %v1562_v27 = vmul.f32 %v1498_v49, %v4895_v61  ;;  %v1560_v29 = vmul.f32 %v1496_v19, %v4898_v15  ;;  %v967_v19 = vld [vmem:[%s4233_s17 + $0x150] sm:$0xff] }
 0x329   : > { %3668 = vtanh.f32 %v1750_v10  ;;  %v1753_v53 = vmul.f32 0.7978846, %v1689_v16  ;;  %v1501_v24 = vmul.f32 %v4919_v63, %v4919_v63  ;;  %v4932_v18 = vadd.f32 %v4781_v59, %v961_v8 }
 0x32a   : > { %v4935_v48 = vpop.eup %3656  ;;  %3670 = vtanh.f32 %v1748_v47  ;;  %v1687_v37 = vadd.f32 %v1623_v45, %v4875_v14  ;;  %v1626_v0 = vmul.f32 0.044715, %v1562_v27  ;;  %v1624_v49 = vmul.f32 0.044715, %v1560_v29 }
 0x32b   : > { %5627 = vst [vmem:[#allocation83_spill] sm:$0xff] %v4932_v18  ;;  %5628 = vst [vmem:[#allocation84_spill] sm:$0xff] %v4935_v48  ;;  %3672 = vtanh.f32 %v1753_v53  ;;  %v1565_v10 = vmul.f32 %v1501_v24, %v4919_v63  ;;  %v1499_v16 = vmul.f32 %v4932_v18, %v4932_v18  ;;  %v4943_v59 = vadd.f32 %v4803_v31, %v964_v35  ;;  %v965_v35 = vld [vmem:[%s4233_s17 + $0x140] sm:$0xff] }
 0x32c   : > { %v4945_v8 = vpop.eup %3658  ;;  %v1751_v48 = vmul.f32 0.7978846, %v1687_v37  ;;  %v1690_v47 = vadd.f32 %v1626_v0, %v4895_v61  ;;  %v1688_v27 = vadd.f32 %v1624_v49, %v4898_v15  ;;  %v4950_v29 = vadd.f32 %v4828_v5, %v962_v25  ;;  %v968_v37 = vld [vmem:[%s4233_s17 + $0x158] sm:$0xff]  ;;  %v3332_v0 = vpop.f32.mrf.mxu0 }
 0x32d   : > { %v4952_v45 = vpop.eup %3660  ;;  %v1629_v53 = vmul.f32 0.044715, %v1565_v10  ;;  %v1563_v24 = vmul.f32 %v1499_v16, %v4932_v18  ;;  %v1502_v14 = vmul.f32 %v4943_v59, %v4943_v59  ;;  %v4958_v31 = vadd.f32 %v4857_v51, %v967_v19 }
 0x32e   : > { %5629 = vst [vmem:[#allocation85_spill] sm:$0xff] %v4950_v29  ;;  %5630 = vst [vmem:[#allocation86_spill] sm:$0xff] %v4952_v45  ;;  %3674 = vtanh.f32 %v1751_v48  ;;  %v1754_v49 = vmul.f32 0.7978846, %v1690_v47  ;;  %v1752_v15 = vmul.f32 0.7978846, %v1688_v27  ;;  %v1500_v5 = vmul.f32 %v4950_v29, %v4950_v29  ;;  %v1384_v2 = vpop.f32.mrf.mxu0 }
 0x32f   : > { %v4964_v25 = vpop.eup %3662  ;;  %v1693_v10 = vadd.f32 %v1629_v53, %v4919_v63  ;;  %v1627_v16 = vmul.f32 0.044715, %v1563_v24  ;;  %v1566_v61 = vmul.f32 %v1502_v14, %v4943_v59  ;;  %v1505_v51 = vmul.f32 %v4958_v31, %v4958_v31  ;;  %v966_v27 = vld [vmem:[%s4233_s17 + $0x148] sm:$0xff] }
 0x330   : > { %3676 = vtanh.f32 %v1754_v49  ;;  %v1564_v19 = vmul.f32 %v1500_v5, %v4950_v29  ;;  %v4972_v48 = vadd.f32 %v4879_v3, %v965_v35  ;;  %v4974_v47 = vadd.f32 %v3329_v54, %v968_v37  ;;  %v971_v35 = vld [vmem:[%s4233_s17 + $0x170] sm:$0xff] }
 0x331   : > { %v4977_v45 = vpop.eup %3664  ;;  %3678 = vtanh.f32 %v1752_v15  ;;  %v1757_v53 = vmul.f32 0.7978846, %v1693_v10  ;;  %v1691_v24 = vadd.f32 %v1627_v16, %v4932_v18  ;;  %v1630_v14 = vmul.f32 0.044715, %v1566_v61  ;;  %v969_v18 = vld [vmem:[%s4233_s17 + $0x160] sm:$0xff] }
 0x332   : > { %5631 = vst [vmem:[#allocation87_spill] sm:$0xff] %v4977_v45  ;;  %v4980_v1 = vpop.eup %3666  ;;  %v1628_v49 = vmul.f32 0.044715, %v1564_v19  ;;  %v1569_v5 = vmul.f32 %v1505_v51, %v4958_v31  ;;  %v1503_v3 = vmul.f32 %v4972_v48, %v4972_v48  ;;  %v1506_v54 = vmul.f32 %v4974_v47, %v4974_v47 }
 0x333   : > { %v1652_v15 = vmul.f32 0.044715, %v4915_v26  ;;  %3680 = vtanh.f32 %v1757_v53  ;;  %v1694_v37 = vadd.f32 %v1630_v14, %v4943_v59  ;;  %v4990_v61 = vadd.f32 %v1371_v22, %v966_v27  ;;  %v3333_v53 = vpop.f32.mrf.mxu0 }
 0x334   : > { %v1692_v10 = vadd.f32 %v1628_v49, %v4950_v29  ;;  %v1633_v16 = vmul.f32 0.044715, %v1569_v5  ;;  %v1567_v19 = vmul.f32 %v1503_v3, %v4972_v48  ;;  %v1570_v51 = vmul.f32 %v1506_v54, %v4974_v47 }
 0x335   : > { %v1755_v45 = vmul.f32 0.7978846, %v1691_v24  ;;  %v1758_v41 = vmul.f32 0.7978846, %v1694_v37  ;;  %v1504_v50 = vmul.f32 %v4990_v61, %v4990_v61  ;;  %v4998_v26 = vadd.f32 %v3332_v0, %v971_v35  ;;  %v972_v0 = vld [vmem:[%s4233_s17 + $0x178] sm:$0xff] }
 0x336   : > { %v5000_v14 = vpop.eup %3668  ;;  %v1756_v22 = vmul.f32 0.7978846, %v1692_v10  ;;  %v1697_v27 = vadd.f32 %v1633_v16, %v4958_v31  ;;  %v1631_v49 = vmul.f32 0.044715, %v1567_v19  ;;  %v1634_v5 = vmul.f32 0.044715, %v1570_v51 }
 0x337   : > { %v5003_v3 = vpop.eup %3670  ;;  %3682 = vtanh.f32 %v1758_v41  ;;  %v1568_v24 = vmul.f32 %v1504_v50, %v4990_v61  ;;  %v1509_v54 = vmul.f32 %v4998_v26, %v4998_v26  ;;  %v5008_v37 = vadd.f32 %v1384_v2, %v969_v18  ;;  %v1387_v41 = vpop.f32.mrf.mxu0 }
 0x338   : > { %v3673_v35 = vpop.eup %3672  ;;  %3684 = vtanh.f32 %v1756_v22  ;;  %v1761_v29 = vmul.f32 0.7978846, %v1697_v27  ;;  %v1695_v10 = vadd.f32 %v1631_v49, %v4972_v48  ;;  %v1698_v16 = vadd.f32 %v1634_v5, %v4974_v47 }
 0x339   : > { %3686 = vtanh.f32 %v1755_v45  ;;  %v1632_v19 = vmul.f32 0.044715, %v1568_v24  ;;  %v1573_v51 = vmul.f32 %v1509_v54, %v4998_v26  ;;  %v1507_v50 = vmul.f32 %v5008_v37, %v5008_v37 }
 0x33a   : > { %3688 = vtanh.f32 %v1761_v29  ;;  %v1759_v2 = vmul.f32 0.7978846, %v1695_v10  ;;  %v1762_v18 = vmul.f32 0.7978846, %v1698_v16  ;;  %v5017_v9 = vadd.f32 %v3333_v53, %v972_v0 }
 0x33b   : > { %v3675_v22 = vpop.eup %3674  ;;  %v1782_v27 = vmul.f32 0.7978846, %v4924_v36  ;;  %v1696_v49 = vadd.f32 %v1632_v19, %v4990_v61  ;;  %v1637_v5 = vmul.f32 0.044715, %v1573_v51  ;;  %v1571_v45 = vmul.f32 %v1507_v50, %v5008_v37 }
 0x33c   : > { %v1860_v24 = vadd.f32 1.0, %v4665_v38  ;;  %3690 = vtanh.f32 %v1759_v2  ;;  %v1510_v54 = vmul.f32 %v5017_v9, %v5017_v9  ;;  %v5025_v20 = vadd.f32 %v1387_v41, %v970_v34 }
 0x33d   : > { %v3677_v29 = vpop.eup %3676  ;;  %v1716_v53 = vadd.f32 %v1652_v15, %v4864_v40  ;;  %3692 = vtanh.f32 %v1762_v18  ;;  %v1760_v0 = vmul.f32 0.7978846, %v1696_v49  ;;  %v1701_v36 = vadd.f32 %v1637_v5, %v4998_v26 }
 0x33e   : > { %v3679_v10 = vpop.eup %3678  ;;  %3694 = vtanh.f32 %v4906_v17  ;;  %v1881_v16 = vadd.f32 1.0, %v3673_v35  ;;  %v1635_v19 = vmul.f32 0.044715, %v1571_v45  ;;  %v1574_v38 = vmul.f32 %v1510_v54, %v5017_v9 }
 0x33f   : > { %v5033_v51 = vmul.f32 %v4882_v60, %v4483_v39  ;;  %3696 = vtanh.f32 %v1782_v27  ;;  %v1765_v34 = vmul.f32 0.7978846, %v1701_v36  ;;  %v1508_v15 = vmul.f32 %v5025_v20, %v5025_v20 }
 0x340   : > { %v3681_v50 = vpop.eup %3680  ;;  %v5039_v41 = vmul.f32 %v4884_v30, %v4493_v11  ;;  %3698 = vtanh.f32 %v1760_v0  ;;  %v1699_v17 = vadd.f32 %v1635_v19, %v5008_v37  ;;  %v1638_v35 = vmul.f32 0.044715, %v1574_v38 }
 0x341   : > { %v1924_v2 = vmul.f32 0.5, %v1860_v24  ;;  %v1780_v18 = vmul.f32 0.7978846, %v1716_v53  ;;  %3700 = vtanh.f32 %v1765_v34  ;;  %v1572_v39 = vmul.f32 %v1508_v15, %v5025_v20 }
 0x342   : > { %v1945_v60 = vmul.f32 0.5, %v1881_v16  ;;  %v1763_v27 = vmul.f32 0.7978846, %v1699_v17  ;;  %v1702_v49 = vadd.f32 %v1638_v35, %v5017_v9  ;;  %v1877_v5 = vadd.f32 1.0, %v4964_v25 }
 0x343   : > { %v1879_v45 = vadd.f32 1.0, %v3675_v22  ;;  %v1882_v54 = vadd.f32 1.0, %v3677_v29  ;;  %v1885_v36 = vadd.f32 1.0, %v3681_v50  ;;  %v1636_v11 = vmul.f32 0.044715, %v1572_v39 }
 0x344   : > { %v3683_v30 = vpop.eup %3682  ;;  %3702 = vtanh.f32 %v1763_v27  ;;  %v1766_v0 = vmul.f32 0.7978846, %v1702_v49  ;;  %v1878_v19 = vadd.f32 1.0, %v5000_v14  ;;  %v1941_v24 = vmul.f32 0.5, %v1877_v5 }
 0x345   : > { %v3685_v53 = vpop.eup %3684  ;;  %3704 = vtanh.f32 %v1780_v18  ;;  %v1880_v38 = vadd.f32 1.0, %v3679_v10  ;;  %v1886_v34 = vadd.f32 1.0, %v3683_v30  ;;  %v1700_v16 = vadd.f32 %v1636_v11, %v5025_v20 }
 0x346   : > { %v3687_v15 = vpop.eup %3686  ;;  %v1988_v17 = vmul.f32 %v1924_v2, %v4498_v21  ;;  %v5049_v25 = vmul.f32 %v1945_v60, %v4867_v58  ;;  %3706 = vtanh.f32 %v1766_v0  ;;  %v1942_v22 = vmul.f32 0.5, %v1878_v19 }
 0x347   : > { %v3689_v29 = vpop.eup %3688  ;;  %v5051_v50 = vmul.f32 0.5, %v1879_v45  ;;  %v5053_v35 = vmul.f32 0.5, %v1882_v54  ;;  %v1949_v14 = vmul.f32 0.5, %v1885_v36  ;;  %v1884_v39 = vadd.f32 1.0, %v3685_v53 }
 0x348   : > { %v1950_v18 = vmul.f32 0.5, %v1886_v34  ;;  %v2005_v10 = vmul.f32 %v1941_v24, %v4779_v12  ;;  %v2006_v27 = vmul.f32 %v1942_v22, %v4820_v4  ;;  %v1875_v49 = vadd.f32 1.0, %v4980_v1 }
 0x349   : > { %v3691_v21 = vpop.eup %3690  ;;  %v5058_v2 = vmul.f32 0.5, %v1880_v38  ;;  %v1889_v58 = vadd.f32 1.0, %v3689_v29  ;;  %v1764_v60 = vmul.f32 0.7978846, %v1700_v16  ;;  %v1876_v5 = vadd.f32 1.0, %v5003_v3 }
 0x34a   : > { %v3693_v45 = vpop.eup %3692  ;;  %v5061_v11 = vadd.f32 1.0, %v3687_v15  ;;  %v1887_v54 = vadd.f32 1.0, %v3691_v21  ;;  %v2054_v36 = vpack.c.bf16 %v2006_v27, %v2005_v10  ;;  %v2046_v30 = vpack.c.bf16 %v5039_v41, %v4826_v46 }
 0x34b   : > { %v5065_v12 = vpop.eup %3694  ;;  %v1890_v4 = vadd.f32 1.0, %v3693_v45  ;;  %v1939_v0 = vmul.f32 0.5, %v1875_v49  ;;  %v1940_v1 = vmul.f32 0.5, %v1876_v5  ;;  %v1873_v19 = vadd.f32 1.0, %v4859_v57 }
 0x34c   : > { %v5068_v24 = vpop.eup %3696  ;;  %v5071_v53 = vmul.f32 %v1949_v14, %v4919_v63  ;;  %v5074_v3 = vmul.f32 %v1950_v18, %v4943_v59  ;;  %v5076_v38 = vmul.f32 0.5, %v1884_v39  ;;  %3106 = vmatprep.subr.bf16.mxu1 %v2054_v36  ;;  %v1874_v46 = vadd.f32 1.0, %v4921_v42  ;;  %v5632_v36 = vld [vmem:[#allocation71_spill] sm:$0xff] }
 0x34d   : > { %v3699_v41 = vpop.eup %3698  ;;  %v1953_v34 = vmul.f32 0.5, %v1889_v58  ;;  %3708 = vtanh.f32 %v1764_v60  ;;  %3107 = vmatpush3.bf16.msra.mxu1 %v2046_v30  ;;  %v2003_v16 = vmul.f32 %v1939_v0, %v4799_v23  ;;  %v2004_v57 = vmul.f32 %v1940_v1, %v4854_v52  ;;  %v5633_v1 = vld [vmem:[#allocation75_spill] sm:$0xff] }
 0x34e   : > { %v3701_v15 = vpop.eup %3700  ;;  %v1951_v22 = vmul.f32 0.5, %v1887_v54  ;;  %v1937_v63 = vmul.f32 0.5, %v1873_v19  ;;  %v1938_v29 = vmul.f32 0.5, %v1874_v46  ;;  %v1871_v59 = vadd.f32 1.0, %v4901_v28  ;;  %v5635_v46 = vld [vmem:[#allocation44_spill] sm:$0xff] }
 0x34f   : > { %v1954_v14 = vmul.f32 0.5, %v1890_v4  ;;  %v1893_v39 = vadd.f32 1.0, %v3701_v15  ;;  %v2053_v18 = vpack.c.bf16 %v2004_v57, %v2003_v16  ;;  %v2045_v10 = vpack.c.bf16 %v1988_v17, %v5033_v51 }
 0x350   : > { %v2001_v42 = vmul.f32 %v1937_v63, %v4693_v62  ;;  %v2002_v27 = vmul.f32 %v1938_v29, %v4743_v56  ;;  %v1872_v49 = vadd.f32 1.0, %v4945_v8  ;;  %v1935_v23 = vmul.f32 0.5, %v1871_v59  ;;  %v5639_v59 = vld [vmem:[#allocation46_spill] sm:$0xff] }
 0x351   : > { %v3703_v21 = vpop.eup %3702  ;;  %v5087_v52 = vmul.f32 %v1953_v34, %v4958_v31  ;;  %v1888_v58 = vadd.f32 1.0, %v3699_v41  ;;  %3108 = vmatprep.subr.bf16.mxu1 %v2053_v18  ;;  %v2044_v28 = vpack.c.bf16 %v4613_v13, %v4588_v6  ;;  %v1869_v60 = vadd.f32 1.0, %v4762_v55  ;;  %v5641_v18 = vld [vmem:[#allocation62_spill] sm:$0xff] }
 0x352   : > { %v5092_v5 = vpop.eup %3704  ;;  %v5095_v62 = vmul.f32 %v1951_v22, %v4972_v48  ;;  %v1891_v56 = vadd.f32 1.0, %v3703_v21  ;;  %3109 = vmatpush3.bf16.msra.mxu1 %v2045_v10  ;;  %v2052_v8 = vpack.c.bf16 %v2002_v27, %v2001_v42  ;;  %v1936_v51 = vmul.f32 0.5, %v1872_v49  ;;  %v5638_v22 = vld [vmem:[#allocation56_spill] sm:$0xff]  ;;  %v5642_v42 = vld [vmem:[#allocation35_spill] sm:$0xff]  ;;  %v5643_v27 = vld [vmem:[#allocation38_spill] sm:$0xff] }
 0x353   : > { %v3707_v17 = vpop.eup %3706  ;;  %v5098_v31 = vmul.f32 %v1954_v14, %v4974_v47  ;;  %v1870_v45 = vadd.f32 1.0, %v4823_v43  ;;  %v1933_v54 = vmul.f32 0.5, %v1869_v60  ;;  %v2042_v6 = vpack.c.bf16 %v4576_v7, %v4546_v44  ;;  %v5634_v47 = vld [vmem:[#allocation42_spill] sm:$0xff]  ;;  %v5636_v7 = vld [vmem:[#allocation48_spill] sm:$0xff]  ;;  %v5640_v14 = vld [vmem:[#allocation53_spill] sm:$0xff] }
 0x354   : > { %v1957_v13 = vmul.f32 0.5, %v1893_v39  ;;  %3110 = vmatprep.subr.bf16.mxu1 %v2052_v8  ;;  %v1999_v55 = vmul.f32 %v1935_v23, %v4718_v33  ;;  %v2000_v48 = vmul.f32 %v1936_v51, %v4767_v32  ;;  %v1867_v30 = vadd.f32 1.0, %v5632_v36  ;;  %v5637_v33 = vld [vmem:[#allocation52_spill] sm:$0xff]  ;;  %v5136_v36 = vld [vmem:[%s448_s6] sm:$0xf] }
 0x355   : > { %v1894_v4 = vadd.f32 1.0, %v3707_v17  ;;  %v1934_v0 = vmul.f32 0.5, %v1870_v45  ;;  %v1868_v19 = vadd.f32 1.0, %v5633_v1  ;;  %v2041_v41 = vpack.c.bf16 %v5635_v46, %v5634_v47  ;;  %v5645_v51 = vld [vmem:[#allocation60_spill] sm:$0xff]  ;;  %v5646_v45 = vld [vmem:[#allocation66_spill] sm:$0xff]  ;;  %v5650_v1 = vld [vmem:[#allocation33_spill] sm:$0xff] }
 0x356   : > { %v5109_v43 = vmul.f32 0.5, %v1888_v58  ;;  %v1955_v34 = vmul.f32 0.5, %v1891_v56  ;;  %3111 = vmatpush3.bf16.msra.mxu1 %v2044_v28  ;;  %v2051_v44 = vpack.c.bf16 %v2000_v48, %v1999_v55  ;;  %v1997_v16 = vmul.f32 %v1933_v54, %v5636_v7  ;;  %v5644_v58 = vld [vmem:[#allocation55_spill] sm:$0xff] }
 0x357   : > { %v1998_v57 = vmul.f32 %v1934_v0, %v5637_v33  ;;  %v1931_v32 = vmul.f32 0.5, %v1867_v30  ;;  %v1932_v15 = vmul.f32 0.5, %v1868_v19  ;;  %v1865_v63 = vadd.f32 1.0, %v5638_v22  ;;  %v5125_v56 = vld [vmem:[%s396_s22 + $0x1] ss:$2 sm:$0xf] }
 0x358   : > { %v5115_v29 = vmul.f32 %v1957_v13, %v4998_v26  ;;  %3112 = vmatprep.subr.bf16.mxu1 %v2051_v44  ;;  %v2043_v39 = vpack.c.bf16 %v5640_v14, %v5639_v59  ;;  %v1866_v10 = vadd.f32 1.0, %v5641_v18  ;;  %v2040_v49 = vpack.c.bf16 %v5643_v27, %v5642_v42  ;;  %v5647_v13 = vld [vmem:[#allocation36_spill] sm:$0xff]  ;;  %v5648_v55 = vld [vmem:[#allocation39_spill] sm:$0xff]  ;;  %v5652_v44 = vld [vmem:[#allocation41_spill] sm:$0xff] }
 0x359   : > { %v1958_v23 = vmul.f32 0.5, %v1894_v4  ;;  %v2050_v21 = vpack.c.bf16 %v1998_v57, %v1997_v16  ;;  %v1996_v28 = vmul.f32 %v1932_v15, %v5644_v58  ;;  %v1929_v60 = vmul.f32 0.5, %v1865_v63  ;;  %v5649_v4 = vld [vmem:[#allocation50_spill] sm:$0xff]  ;;  %v5651_v47 = vld [vmem:[#allocation87_spill] sm:$0xff]  ;;  %v5656_v42 = vld [vmem:[#allocation21_spill] sm:$0xff] }
 0x35a   : > { %v3709_v26 = vpop.eup %3708  ;;  %3113 = vmatpush3.bf16.msra.mxu1 %v2043_v39  ;;  %v1930_v8 = vmul.f32 0.5, %v1866_v10  ;;  %v1863_v17 = vadd.f32 1.0, %v5645_v51  ;;  %v1864_v54 = vadd.f32 1.0, %v5646_v45  ;;  %v2039_v48 = vpack.c.bf16 %v5648_v55, %v5647_v13  ;;  %v5653_v22 = vld [vmem:[#allocation30_spill] sm:$0xff]  ;;  %v5658_v58 = vld [vmem:[#allocation37_spill] sm:$0xff] }
 0x35b   : > { %v5139_v30 = vmul.f32 %v1955_v34, %v5008_v37  ;;  %3114 = vmatprep.subr.bf16.mxu1 %v2050_v21  ;;  %v1995_v0 = vmul.f32 %v1931_v32, %v5649_v4  ;;  %v1993_v19 = vmul.f32 %v1929_v60, %v5650_v1  ;;  %v1909_v46 = vadd.f32 1.0, %v5651_v47  ;;  %v5654_v34 = vld [vmem:[#allocation23_spill] sm:$0xff]  ;;  %v5657_v27 = vld [vmem:[#allocation22_spill] sm:$0xff] }
 0x35c   : > { %v1994_v7 = vmul.f32 %v1930_v8, %v5652_v44  ;;  %v1927_v16 = vmul.f32 0.5, %v1863_v17  ;;  %v1928_v33 = vmul.f32 0.5, %v1864_v54  ;;  %v1910_v57 = vadd.f32 1.0, %v5068_v24  ;;  %v5655_v24 = vld [vmem:[#allocation45_spill] sm:$0xff] }
 0x35d   : > { %v2049_v15 = vpack.c.bf16 %v1996_v28, %v1995_v0  ;;  %v5148_v63 = vrot.slane %v5125_v56, %v5653_v22  ;;  %v2080_v37 = vrot.slane %v5136_v36, %v5653_v22  ;;  %v5154_v32 = vrot.slane %v5125_v56, %v5654_v34  ;;  %v5660_v0 = vld [vmem:[#allocation70_spill] sm:$0xff]  ;;  %v5663_v22 = vld [vmem:[#allocation84_spill] sm:$0xff] }
 0x35e   : > { %v5157_v59 = vmul.f32 %v1958_v23, %v5017_v9  ;;  %v1892_v14 = vadd.f32 1.0, %v3709_v26  ;;  %3115 = vmatpush3.bf16.msra.mxu1 %v2042_v6  ;;  %v2048_v39 = vpack.c.bf16 %v1994_v7, %v1993_v19  ;;  %v1973_v18 = vmul.f32 0.5, %v1909_v46  ;;  %v5661_v46 = vld [vmem:[#allocation76_spill] sm:$0xff] }
 0x35f   : > { %3116 = vmatprep.subr.bf16.mxu1 %v2049_v15  ;;  %v1992_v10 = vmul.f32 %v1928_v33, %v5655_v24  ;;  %vm806_vm2 = vcmp.eq.s32.totalorder %v5656_v42, %v5148_v63  ;;  %vm810_vm3 = vcmp.eq.s32.totalorder %v5657_v27, %v5148_v63  ;;  %v2094_v21 = vpack.c.bf16 %v2080_v37, %v2080_v37  ;;  %v5665_v24 = vld [vmem:[#allocation25_spill] sm:$0xff] }
 0x360   : > { %v1991_v28 = vmul.f32 %v1927_v16, %v5658_v58  ;;  %v1974_v60 = vmul.f32 0.5, %v1910_v57  ;;  %v5659_v8 = vmov 0.0   ;;  %vm805_vm4 = vcmp.eq.s32.totalorder %v5656_v42, %v5154_v32  ;;  %v5662_v16 = vld [vmem:[#allocation79_spill] sm:$0xff] }
 0x361   : > { %v5166_v9 = vsel %vm806_vm2, 1.0, %v5659_v8  ;;  %v5169_v6 = vsel %vm810_vm3, 1.0, %v5659_v8  ;;  %v2105_v26 = vpack.i.b16 %v2094_v21, %v2094_v21  ;;  %vm809_vm5 = vcmp.eq.s32.totalorder %v5657_v27, %v5154_v32 }
 0x362   : > { %v902_v23 = vpack.c.bf16 %v5169_v6, %v5166_v9  ;;  %v1956_v51 = vmul.f32 0.5, %v1892_v14  ;;  %3117 = vmatpush3.bf16.msra.mxu1 %v2041_v41  ;;  %v5178_v17 = vsel %vm805_vm4, 1.0, %v5659_v8  ;;  %v5181_v45 = vsel %vm809_vm5, 1.0, %v5659_v8  ;;  %v5664_v14 = vld [vmem:[#allocation24_spill] sm:$0xff] }
 0x363   : > { %v2076_v54 = vrot.slane %v5136_v36, %v5654_v34  ;;  %3118 = vmatprep.subr.bf16.mxu1 %v2048_v39  ;;  %v2047_v4 = vpack.c.bf16 %v1992_v10, %v1991_v28  ;;  %v2037_v1 = vmul.f32 %v1973_v18, %v5660_v0  ;;  %v5187_v19 = vrot.slane %v2105_v26, %v5654_v34 }
 0x364   : > { %v1907_v47 = vadd.f32 1.0, %v5065_v12  ;;  %v2038_v41 = vmul.f32 %v1974_v60, %v5661_v46  ;;  %v1908_v7 = vadd.f32 1.0, %v5092_v5  ;;  %v1905_v33 = vadd.f32 1.0, %v5662_v16 }
 0x365   : > { %v2093_v44 = vpack.c.bf16 %v2076_v54, %v2076_v54  ;;  %v2126_v57 = vmul.bf16 %v5187_v19, %v902_v23  ;;  %v901_v15 = vpack.c.bf16 %v5181_v45, %v5178_v17  ;;  %v1906_v37 = vadd.f32 1.0, %v5663_v22 }
 0x366   : > { %vm814_vm6 = vcmp.eq.s32.totalorder %v5664_v14, %v5148_v63  ;;  %3119 = vmatpush3.bf16.msra.mxu1 %v2040_v49  ;;  %v1971_v12 = vmul.f32 0.5, %v1907_v47  ;;  %v1972_v18 = vmul.f32 0.5, %v1908_v7  ;;  %vm818_vm7 = vcmp.eq.s32.totalorder %v5665_v24, %v5148_v63  ;;  %v5668_v47 = vld [vmem:[#allocation82_spill] sm:$0xff]  ;;  %v5671_v7 = vld [vmem:[#allocation68_spill] sm:$0xff] }
 0x367   : > { %v2098_v39 = vpack.i.b16 %v2093_v44, %v2093_v44  ;;  %v2020_v5 = vmul.f32 %v1956_v51, %v5025_v20  ;;  %3120 = vmatprep.subr.bf16.mxu1 %v2047_v4  ;;  %2181 = vmatprep.mubr.bf16.mxu1 %v2126_v57  ;;  %v1969_v10 = vmul.f32 0.5, %v1905_v33  ;;  %v5203_v21 = vsel %vm814_vm6, 1.0, %v5659_v8  ;;  %v5666_v51 = vld [vmem:[#allocation73_spill] sm:$0xff]  ;;  %v5672_v33 = vld [vmem:[#allocation74_spill] sm:$0xff] }
 0x368   : > { %v5206_v58 = vsel %vm818_vm7, 1.0, %v5659_v8  ;;  %v2036_v49 = vmul.f32 %v1972_v18, %v4864_v40  ;;  %v1970_v60 = vmul.f32 0.5, %v1906_v37  ;;  %v2070_v26 = vpack.c.bf16 %v2038_v41, %v2037_v1  ;;  %v5669_v41 = vld [vmem:[#allocation86_spill] sm:$0xff] }
 0x369   : > { %v5209_v28 = vrot.slane %v2098_v39, %v5654_v34  ;;  %v906_v23 = vpack.c.bf16 %v5206_v58, %v5203_v21  ;;  %v2062_v20 = vpack.c.bf16 %v5157_v59, %v5115_v29  ;;  %vm813_vm8 = vcmp.eq.s32.totalorder %v5664_v14, %v5154_v32  ;;  %v5667_v29 = vld [vmem:[#allocation59_spill] sm:$0xff]  ;;  %v5673_v37 = vld [vmem:[#allocation26_spill] sm:$0xff] }
 0x36a   : > { %vm817_vm9 = vcmp.eq.s32.totalorder %v5665_v24, %v5154_v32  ;;  %3121 = vmatpush3.bf16.msra.mxu1 %v2039_v48  ;;  %v2035_v54 = vmul.f32 %v1971_v12, %v5666_v51  ;;  %v5227_v0 = vsel %vm813_vm8, 1.0, %v5659_v8  ;;  %v2033_v59 = vmul.f32 %v1969_v10, %v5667_v29  ;;  %v5670_v48 = vld [vmem:[#allocation65_spill] sm:$0xff]  ;;  %v5674_v39 = vld [vmem:[#allocation27_spill] sm:$0xff] }
 0x36b   : > { %v2125_v40 = vmul.bf16 %v5209_v28, %v901_v15  ;;  %v2130_v4 = vmul.bf16 %v5187_v19, %v906_v23  ;;  %3146 = vmatprep.subr.bf16.mxu1 %v2070_v26  ;;  %v5231_v1 = vsel %vm817_vm9, 1.0, %v5659_v8  ;;  %v1903_v46 = vadd.f32 1.0, %v5668_v47 }
 0x36c   : > { %v1904_v13 = vadd.f32 1.0, %v5669_v41  ;;  %v2069_v55 = vpack.c.bf16 %v2036_v49, %v2035_v54  ;;  %v2034_v44 = vmul.f32 %v1970_v60, %v5670_v48  ;;  %v1901_v16 = vadd.f32 1.0, %v5671_v7 }
 0x36d   : > { %v1902_v57 = vadd.f32 1.0, %v5672_v33  ;;  %2182 = vmatmul.mubr.bf16.vlgmr.msra.gmra.mxu1 %v2125_v40  ;;  %v905_v15 = vpack.c.bf16 %v5231_v1, %v5227_v0  ;;  %vm822_vm10 = vcmp.eq.s32.totalorder %v5673_v37, %v5148_v63  ;;  %vm826_vm11 = vcmp.eq.s32.totalorder %v5674_v39, %v5148_v63 }
 0x36e   : > { %v1968_v22 = vmul.f32 0.5, %v1904_v13  ;;  %v2016_v12 = vmul.f32 %v5109_v43, %v4990_v61  ;;  %3147 = vmatpush3.bf16.msra.mxu1 %v2062_v20  ;;  %2189 = vmatprep.mubr.bf16.mxu1 %v2130_v4  ;;  %v1967_v18 = vmul.f32 0.5, %v1903_v46  ;;  %v1965_v10 = vmul.f32 0.5, %v1901_v16  ;;  %v5675_v43 = vld [vmem:[#allocation69_spill] sm:$0xff]  ;;  %v5676_v4 = vld [vmem:[#allocation63_spill] sm:$0xff]  ;;  %v5678_v46 = vld [vmem:[#allocation72_spill] sm:$0xff] }
 0x36f   : > { %v5247_v49 = vsel %vm822_vm10, 1.0, %v5659_v8  ;;  %3148 = vmatprep.subr.bf16.mxu1 %v2069_v55  ;;  %v2061_v60 = vpack.c.bf16 %v2020_v5, %v5139_v30  ;;  %v1966_v23 = vmul.f32 0.5, %v1902_v57  ;;  %v5251_v26 = vsel %vm826_vm11, 1.0, %v5659_v8  ;;  %v5679_v13 = vld [vmem:[#allocation54_spill] sm:$0xff]  ;;  %v5680_v55 = vld [vmem:[#allocation77_spill] sm:$0xff]  ;;  %v5682_v16 = vld [vmem:[#allocation64_spill] sm:$0xff] }
 0x370   : > { %vm821_vm12 = vcmp.eq.s32.totalorder %v5673_v37, %v5154_v32  ;;  %v2060_v61 = vpack.c.bf16 %v5098_v31, %v5087_v52  ;;  %v2032_v20 = vmul.f32 %v1968_v22, %v5675_v43  ;;  %v910_v40 = vpack.c.bf16 %v5251_v26, %v5247_v49  ;;  %v5677_v31 = vld [vmem:[#allocation49_spill] sm:$0xff]  ;;  %v5683_v22 = vld [vmem:[#allocation28_spill] sm:$0xff] }
 0x371   : > { %vm825_vm13 = vcmp.eq.s32.totalorder %v5674_v39, %v5154_v32  ;;  %v2068_v51 = vpack.c.bf16 %v2034_v44, %v2033_v59  ;;  %v2129_v30 = vmul.bf16 %v5209_v28, %v905_v15  ;;  %v5264_v5 = vsel %vm821_vm12, 1.0, %v5659_v8  ;;  %v5681_v44 = vld [vmem:[#allocation58_spill] sm:$0xff] }
 0x372   : > { %v5267_v54 = vsel %vm825_vm13, 1.0, %v5659_v8  ;;  %3149 = vmatpush3.bf16.msra.mxu1 %v2061_v60  ;;  %v2031_v52 = vmul.f32 %v1967_v18, %v5676_v4  ;;  %v2029_v29 = vmul.f32 %v1965_v10, %v5677_v31  ;;  %v2134_v47 = vmul.bf16 %v5187_v19, %v910_v40  ;;  %v5684_v18 = vld [vmem:[#allocation29_spill] sm:$0xff] }
 0x373   : > { %v1899_v41 = vadd.f32 1.0, %v5678_v46  ;;  %3150 = vmatprep.subr.bf16.mxu1 %v2068_v51  ;;  %v2030_v59 = vmul.f32 %v1966_v23, %v5679_v13  ;;  %v1900_v48 = vadd.f32 1.0, %v5680_v55  ;;  %v1897_v7 = vadd.f32 1.0, %v5681_v44  ;;  %v5688_v13 = vld [vmem:[#allocation34_spill] sm:$0xff] }
 0x374   : > { %v1898_v33 = vadd.f32 1.0, %v5682_v16  ;;  %v2067_v57 = vpack.c.bf16 %v2032_v20, %v2031_v52  ;;  %v909_v15 = vpack.c.bf16 %v5267_v54, %v5264_v5  ;;  %vm830_vm14 = vcmp.eq.s32.totalorder %v5683_v22, %v5148_v63 }
 0x375   : > { %vm834_vm15 = vcmp.eq.s32.totalorder %v5684_v18, %v5148_v63  ;;  %2190 = vmatmul.mubr.bf16.gmra.mxu1 %v2129_v30  ;;  %v1963_v10 = vmul.f32 0.5, %v1899_v41  ;;  %v1964_v60 = vmul.f32 0.5, %v1900_v48  ;;  %v1961_v23 = vmul.f32 0.5, %v1897_v7  ;;  %v5685_v63 = vld [vmem:[#allocation85_spill] sm:$0xff]  ;;  %v5687_v41 = vld [vmem:[#allocation51_spill] sm:$0xff] }
 0x376   : > { %v5284_v43 = vsel %vm830_vm14, 1.0, %v5659_v8  ;;  %v1947_v40 = vmul.f32 0.5, %v5061_v11  ;;  %3151 = vmatpush3.bf16.msra.mxu1 %v2060_v61  ;;  %2197 = vmatprep.mubr.bf16.mxu1 %v2134_v47  ;;  %v5288_v20 = vsel %vm834_vm15, 1.0, %v5659_v8  ;;  %vm829_vm0 = vcmp.eq.s32.totalorder %v5683_v22, %v5154_v32  ;;  %v5686_v47 = vld [vmem:[#allocation57_spill] sm:$0xff]  ;;  %v5690_v48 = vld [vmem:[#allocation67_spill] sm:$0xff] }
 0x377   : > { %vm833_vm1 = vcmp.eq.s32.totalorder %v5684_v18, %v5154_v32  ;;  %v2012_v51 = vmul.f32 %v5076_v38, %v5685_v63  ;;  %3152 = vmatprep.subr.bf16.mxu1 %v2067_v57  ;;  %v2059_v30 = vpack.c.bf16 %v2016_v12, %v5095_v62  ;;  %v1962_v4 = vmul.f32 0.5, %v1898_v33  ;;  %v5692_v7 = vld [vmem:[#allocation43_spill] sm:$0xff]  ;;  %v5693_v57 = vld [vmem:[#allocation32_spill] sm:$0xff] }
 0x378   : > { %v914_v11 = vpack.c.bf16 %v5288_v20, %v5284_v43  ;;  %v2066_v61 = vpack.c.bf16 %v2030_v59, %v2029_v29  ;;  %v2133_v52 = vmul.bf16 %v5209_v28, %v909_v15  ;;  %v2058_v31 = vpack.c.bf16 %v5074_v3, %v5071_v53  ;;  %v5689_v29 = vld [vmem:[#allocation61_spill] sm:$0xff]  ;;  %v5691_v53 = vld [vmem:[#allocation31_spill] sm:$0xff] }
 0x379   : > { %v2028_v46 = vmul.f32 %v1964_v60, %v5686_v47  ;;  %v2027_v32 = vmul.f32 %v1963_v10, %v5687_v41  ;;  %v2025_v55 = vmul.f32 %v1961_v23, %v5688_v13  ;;  %v5306_v38 = vsel %vm829_vm0, 1.0, %v5659_v8 }
 0x37a   : > { %v5309_v62 = vsel %vm833_vm1, 1.0, %v5659_v8  ;;  %3153 = vmatpush3.bf16.msra.mxu1 %v2059_v30  ;;  %v2138_v12 = vmul.bf16 %v5187_v19, %v914_v11  ;;  %v1895_v59 = vadd.f32 1.0, %v5689_v29  ;;  %v1896_v44 = vadd.f32 1.0, %v5690_v48 }
 0x37b   : > { %v5316_v3 = vrot.slane %v5125_v56, %v5691_v53  ;;  %3154 = vmatprep.subr.bf16.mxu1 %v2066_v61  ;;  %v2026_v16 = vmul.f32 %v1962_v4, %v5692_v7  ;;  %v2088_v33 = vrot.slane %v5136_v36, %v5691_v53  ;;  %v5323_v15 = vrot.slane %v5125_v56, %v5693_v57  ;;  %v5694_v4 = vld [vmem:[#allocation83_spill] sm:$0xff] }
 0x37c   : > { %v2084_v19 = vrot.slane %v5136_v36, %v5693_v57  ;;  %v2065_v10 = vpack.c.bf16 %v2028_v46, %v2027_v32  ;;  %v913_v60 = vpack.c.bf16 %v5309_v62, %v5306_v38  ;;  %v1960_v23 = vmul.f32 0.5, %v1896_v44  ;;  %v5695_v46 = vld [vmem:[#allocation80_spill] sm:$0xff]  ;;  %v5698_v44 = vld [vmem:[#allocation81_spill] sm:$0xff] }
 0x37d   : > { %vm808_vm2 = vcmp.eq.s32.totalorder %v5656_v42, %v5316_v3  ;;  %vm812_vm3 = vcmp.eq.s32.totalorder %v5657_v27, %v5316_v3  ;;  %2198 = vmatmul.mubr.bf16.gmra.mxu1 %v2133_v52  ;;  %v2096_v30 = vpack.c.bf16 %v2088_v33, %v2088_v33  ;;  %v2011_v36 = vmul.f32 %v1947_v40, %v5694_v4 }
 0x37e   : > { %v5334_v63 = vsel %vm808_vm2, 1.0, %v5659_v8  ;;  %v2946_v56 = vsel %vm812_vm3, 1.0, %v5659_v8  ;;  %3155 = vmatpush3.bf16.msra.mxu1 %v2058_v31  ;;  %2205 = vmatprep.mubr.bf16.mxu1 %v2138_v12  ;;  %v1959_v11 = vmul.f32 0.5, %v1895_v59  ;;  %vm807_vm4 = vcmp.eq.s32.totalorder %v5656_v42, %v5323_v15  ;;  %v5696_v42 = vld [vmem:[#allocation47_spill] sm:$0xff] }
 0x37f   : > { %v904_v61 = vpack.c.bf16 %v2946_v56, %v5334_v63  ;;  %3156 = vmatprep.subr.bf16.mxu1 %v2065_v10  ;;  %v2119_v47 = vpack.i.b16 %v2096_v30, %v2096_v30  ;;  %vm811_vm5 = vcmp.eq.s32.totalorder %v5657_v27, %v5323_v15  ;;  %v2095_v52 = vpack.c.bf16 %v2084_v19, %v2084_v19  ;;  %v5699_v10 = vld [vmem:[#allocation78_spill] sm:$0xff] }
 0x380   : > { %vm816_vm6 = vcmp.eq.s32.totalorder %v5664_v14, %v5316_v3  ;;  %v2010_v40 = vmul.f32 %v5053_v35, %v5695_v46  ;;  %v2057_v31 = vpack.c.bf16 %v2012_v51, %v2011_v36  ;;  %v2064_v41 = vpack.c.bf16 %v2026_v16, %v2025_v55  ;;  %v5697_v55 = vld [vmem:[#allocation40_spill] sm:$0xff] }
 0x381   : > { %vm820_vm7 = vcmp.eq.s32.totalorder %v5665_v24, %v5316_v3  ;;  %v2137_v32 = vmul.bf16 %v5209_v28, %v913_v60  ;;  %v2024_v13 = vmul.f32 %v1960_v23, %v5696_v42  ;;  %v5352_v12 = vrot.slane %v2119_v47, %v5654_v34 }
 0x382   : > { %v2112_v27 = vpack.i.b16 %v2095_v52, %v2095_v52  ;;  %3157 = vmatpush3.bf16.msra.mxu1 %v2057_v31  ;;  %v2941_v29 = vsel %vm807_vm4, 1.0, %v5659_v8  ;;  %v2945_v59 = vsel %vm811_vm5, 1.0, %v5659_v8  ;;  %v2950_v35 = vsel %vm816_vm6, 1.0, %v5659_v8 }
 0x383   : > { %v2954_v51 = vsel %vm820_vm7, 1.0, %v5659_v8  ;;  %3158 = vmatprep.subr.bf16.mxu1 %v2064_v41  ;;  %v2023_v48 = vmul.f32 %v1959_v11, %v5697_v55  ;;  %v2128_v28 = vmul.bf16 %v5352_v12, %v904_v61  ;;  %vm815_vm8 = vcmp.eq.s32.totalorder %v5664_v14, %v5323_v15 }
 0x384   : > { %vm819_vm9 = vcmp.eq.s32.totalorder %v5665_v24, %v5323_v15  ;;  %v2008_v53 = vmul.f32 %v5058_v2, %v5698_v44  ;;  %v2056_v7 = vpack.c.bf16 %v2010_v40, %v5049_v25  ;;  %v903_v33 = vpack.c.bf16 %v2945_v59, %v2941_v29 }
 0x385   : > { %2206 = vmatmul.mubr.bf16.gmra.mxu1 %v2137_v32  ;;  %v2063_v16 = vpack.c.bf16 %v2024_v13, %v2023_v48  ;;  %v5368_v57 = vrot.slane %v2112_v27, %v5654_v34  ;;  %v908_v19 = vpack.c.bf16 %v2954_v51, %v2950_v35  ;;  %v2007_v60 = vmul.f32 %v5051_v50, %v5699_v10  ;;  %v2298_v48 = vld [vmem:[#allocation4 + $0x18] sm:$0xff] }
 0x386   : > { %3159 = vmatpush3.bf16.msra.mxu1 %v2056_v7  ;;  %2246 = vmatprep.mubr.bf16.mxu1 %v2128_v28  ;;  %v2949_v14 = vsel %vm815_vm8, 1.0, %v5659_v8  ;;  %v2953_v24 = vsel %vm819_vm9, 1.0, %v5659_v8  ;;  %vm824_vm10 = vcmp.eq.s32.totalorder %v5673_v37, %v5316_v3  ;;  %vm828_vm11 = vcmp.eq.s32.totalorder %v5674_v39, %v5316_v3 }
 0x387   : > { %3160 = vmatprep.subr.bf16.mxu1 %v2063_v16  ;;  %v2055_v25 = vpack.c.bf16 %v2008_v53, %v2007_v60  ;;  %vm827_vm12 = vcmp.eq.s32.totalorder %v5674_v39, %v5323_v15  ;;  %v2340_v50 = vadd.f32 %v5169_v6, %v5181_v45  ;;  %v2127_v2 = vmul.bf16 %v5368_v57, %v903_v33  ;;  %v2300_v16 = vld [vmem:[#allocation4 + $0x28] sm:$0xff] }
 0x388   : > { %v2132_v34 = vmul.bf16 %v5352_v12, %v908_v19  ;;  %v907_v23 = vpack.c.bf16 %v2953_v24, %v2949_v14  ;;  %v2958_v30 = vsel %vm824_vm10, 1.0, %v5659_v8  ;;  %v2962_v4 = vsel %vm828_vm11, 1.0, %v5659_v8  ;;  %v2299_v19 = vld [vmem:[#allocation4 + $0x20] sm:$0xff] }
 0x389   : > { %v2341_v36 = vadd.f32 %v2945_v59, %v2340_v50  ;;  %v2335_v11 = vadd.f32 %v5166_v9, %v5178_v17  ;;  %v2350_v39 = vadd.f32 %v5206_v58, %v5231_v1  ;;  %vm823_vm13 = vcmp.eq.s32.totalorder %v5673_v37, %v5323_v15  ;;  %v2301_v50 = vld [vmem:[#allocation4 + $0x30] sm:$0xff] }
 0x38a   : > { %3161 = vmatpush3.bf16.msra.mxu1 %v2055_v25  ;;  %v2961_v6 = vsel %vm827_vm12, 1.0, %v5659_v8  ;;  %v2345_v45 = vadd.f32 %v5203_v21, %v5227_v0  ;;  %v2360_v61 = vadd.f32 %v5251_v26, %v5267_v54  ;;  %v2355_v9 = vadd.f32 %v5247_v49, %v5264_v5 }
 0x38b   : > { %v2342_v47 = vadd.f32 %v2946_v56, %v2341_v36  ;;  %v2336_v52 = vadd.f32 %v2941_v29, %v2335_v11  ;;  %v2351_v46 = vadd.f32 %v2953_v24, %v2350_v39  ;;  %v912_v17 = vpack.c.bf16 %v2962_v4, %v2958_v30  ;;  %v2296_v29 = vld [vmem:[#allocation4 + $0x8] sm:$0xff] }
 0x38c   : > { %vm835_vm14 = vcmp.eq.s32.totalorder %v5684_v18, %v5323_v15  ;;  %v2346_v58 = vadd.f32 %v2949_v14, %v2345_v45  ;;  %v2361_v1 = vadd.f32 %v2961_v6, %v2360_v61  ;;  %v2370_v26 = vadd.f32 %v5288_v20, %v5309_v62  ;;  %v2302_v14 = vld [vmem:[#allocation4 + $0x38] sm:$0xff] }
 0x38d   : > { %2247 = vmatmul.mubr.bf16.vlgmr.msra.gmra.mxu1 %v2127_v2  ;;  %2343 = vadd.xlane.f32.xlu1 %v2342_v47  ;;  %v2337_v21 = vadd.f32 %v5334_v63, %v2336_v52  ;;  %v2352_v0 = vadd.f32 %v2954_v51, %v2351_v46  ;;  %v2957_v49 = vsel %vm823_vm13, 1.0, %v5659_v8  ;;  %vm832_vm15 = vcmp.eq.s32.totalorder %v5683_v22, %v5316_v3 }
 0x38e   : > { %2254 = vmatprep.mubr.bf16.mxu1 %v2132_v34  ;;  %vm836_vm0 = vcmp.eq.s32.totalorder %v5684_v18, %v5316_v3  ;;  %vm831_vm1 = vcmp.eq.s32.totalorder %v5683_v22, %v5323_v15  ;;  %v2347_v5 = vadd.f32 %v2950_v35, %v2346_v58  ;;  %v2356_v54 = vadd.f32 %v2957_v49, %v2355_v9  ;;  %v2295_v35 = vld [vmem:[#allocation4] sm:$0xff] }
 0x38f   : > { %2338 = vadd.xlane.f32.xlu0 %v2337_v21  ;;  %v2365_v20 = vadd.f32 %v5284_v43, %v5306_v38  ;;  %v2131_v62 = vmul.bf16 %v5368_v57, %v907_v23  ;;  %v2969_v37 = vsel %vm835_vm14, 1.0, %v5659_v8  ;;  %v2136_v63 = vmul.bf16 %v5352_v12, %v912_v17 }
 0x390   : > { %v2362_v3 = vadd.f32 %v2962_v4, %v2361_v1  ;;  %v2371_v56 = vadd.f32 %v2969_v37, %v2370_v26  ;;  %v2966_v22 = vsel %vm832_vm15, 1.0, %v5659_v8  ;;  %v2970_v40 = vsel %vm836_vm0, 1.0, %v5659_v8 }
 0x391   : > { %2353 = vadd.xlane.f32.xlu1 %v2352_v0  ;;  %v2965_v31 = vsel %vm831_vm1, 1.0, %v5659_v8  ;;  %v2357_v43 = vadd.f32 %v2958_v30, %v2356_v54  ;;  %v911_v41 = vpack.c.bf16 %v2961_v6, %v2957_v49  ;;  %v916_v32 = vpack.c.bf16 %v2970_v40, %v2966_v22  ;;  %v2141_v54 = vld [vmem:[#allocation3 + $0x30] sm:$0xff] }
 0x392   : > { %v2366_v38 = vadd.f32 %v2965_v31, %v2365_v20  ;;  %v2372_v18 = vadd.f32 %v2970_v40, %v2371_v56  ;;  %v915_v27 = vpack.c.bf16 %v2969_v37, %v2965_v31  ;;  %vm2383_vm2 = vcmask 7168  }
 0x393   : > { %2348 = vadd.xlane.f32.xlu0 %v2347_v5  ;;  %v2135_v42 = vmul.bf16 %v5368_v57, %v911_v41  ;;  %v2140_v13 = vmul.bf16 %v5352_v12, %v916_v32  ;;  %v2297_v12 = vld [vmem:[#allocation4 + $0x10] sm:$0xff] }
 0x394   : > { %v2367_v15 = vadd.f32 %v2966_v22, %v2366_v38  ;;  %v2139_v8 = vmul.bf16 %v5368_v57, %v915_v27  ;;  %v2142_v22 = vld [vmem:[#allocation3] sm:$0xff] }
 0x395   : > { %2255 = vmatmul.mubr.bf16.gmra.mxu1 %v2131_v62  ;;  %2363 = vadd.xlane.f32.xlu1 %v2362_v3 }
 0x396   : > { %2262 = vmatprep.mubr.bf16.mxu1 %v2136_v63 }
 0x397   : > { %2358 = vadd.xlane.f32.xlu0 %v2357_v43 }
 0x399   : > { %2373 = vadd.xlane.f32.xlu1 %v2372_v18  ;;  %v2143_v18 = vld [vmem:[#allocation3 + $0x18] sm:$0xff] }
 0x39b   : > { %2368 = vadd.xlane.f32.xlu0 %v2367_v15 }
 0x39d   : > { %2263 = vmatmul.mubr.bf16.gmra.mxu1 %v2135_v42 }
 0x39e   : > { %2270 = vmatprep.mubr.bf16.mxu1 %v2140_v13 }
 0x3a5   : > { %2271 = vmatmul.mubr.bf16.gmra.mxu1 %v2139_v8 }
 0x416   : > { %v2344_v59 = vpop.xlane.xlu1 %2343 }
 0x417   : > { %v2376_v51 = vadd.f32 %v2344_v59, %v2296_v29  ;;  %v2144_v59 = vld [vmem:[#allocation3 + $0x10] sm:$0xff] }
 0x418   : > { %v2339_v55 = vpop.xlane.xlu0 %2338 }
 0x419   : > { %2385 = vst.msk [vmem:[#allocation4 + $0x8] sm:$0xff] %vm2383_vm2, %v2376_v51  ;;  %v2375_v28 = vadd.f32 %v2339_v55, %v2295_v35 }
 0x41a   : > { %v2354_v44 = vpop.xlane.xlu1 %2353 }
 0x41b   : > { %2384 = vst.msk [vmem:[#allocation4] sm:$0xff] %vm2383_vm2, %v2375_v28  ;;  %v2378_v53 = vadd.f32 %v2354_v44, %v2298_v48 }
 0x41c   : > { %v2349_v7 = vpop.xlane.xlu0 %2348 }
 0x41d   : > { %2387 = vst.msk [vmem:[#allocation4 + $0x18] sm:$0xff] %vm2383_vm2, %v2378_v53  ;;  %v2377_v33 = vadd.f32 %v2349_v7, %v2297_v12  ;;  %v2145_v12 = vld [vmem:[#allocation3 + $0x8] sm:$0xff] }
 0x41e   : > { %v2364_v57 = vpop.xlane.xlu1 %2363 }
 0x41f   : > { %2386 = vst.msk [vmem:[#allocation4 + $0x10] sm:$0xff] %vm2383_vm2, %v2377_v33  ;;  %v2380_v10 = vadd.f32 %v2364_v57, %v2300_v16 }
 0x420   : > { %v2359_v60 = vpop.xlane.xlu0 %2358 }
 0x421   : > { %2389 = vst.msk [vmem:[#allocation4 + $0x28] sm:$0xff] %vm2383_vm2, %v2380_v10  ;;  %v2379_v24 = vadd.f32 %v2359_v60, %v2299_v19  ;;  %v2146_v10 = vld [vmem:[#allocation3 + $0x20] sm:$0xff] }
 0x422   : > { %v2374_v25 = vpop.xlane.xlu1 %2373 }
 0x423   : > { %2388 = vst.msk [vmem:[#allocation4 + $0x20] sm:$0xff] %vm2383_vm2, %v2379_v24  ;;  %v2382_v2 = vadd.f32 %v2374_v25, %v2302_v14 }
 0x424   : > { %v2369_v34 = vpop.xlane.xlu0 %2368 }
 0x425   : > { %2391 = vst.msk [vmem:[#allocation4 + $0x38] sm:$0xff] %vm2383_vm2, %v2382_v2  ;;  %v2381_v23 = vadd.f32 %v2369_v34, %v2301_v50  ;;  %v2147_v34 = vld [vmem:[#allocation3 + $0x28] sm:$0xff] }
 0x427   : > { %2390 = vst.msk [vmem:[#allocation4 + $0x30] sm:$0xff] %vm2383_vm2, %v2381_v23 }
 0x42d   : > { %v3122_v30 = vpop.f32.mrf.mxu1 }
 0x42f   : > { %v3123_v4 = vpop.f32.mrf.mxu1 }
 0x430   : > { %v3124_v49 = vadd.f32 %v3123_v4, %v3122_v30 }
 0x431   : > { %v3125_v36 = vpop.f32.mrf.mxu1 }
 0x433   : > { %v3126_v11 = vpop.f32.mrf.mxu1 }
 0x434   : > { %v3127_v63 = vadd.f32 %v3126_v11, %v3125_v36 }
 0x435   : > { %v3128_v39 = vpop.f32.mrf.mxu1 }
 0x437   : > { %v3129_v6 = vpop.f32.mrf.mxu1 }
 0x438   : > { %v3130_v38 = vadd.f32 %v3129_v6, %v3128_v39  ;;  %v2148_v6 = vld [vmem:[#allocation3 + $0x38] sm:$0xff] }
 0x439   : > { %v3131_v45 = vpop.f32.mrf.mxu1 }
 0x43b   : > { %v3132_v61 = vpop.f32.mrf.mxu1 }
 0x43c   : > { %v3133_v27 = vadd.f32 %v3132_v61, %v3131_v45 }
 0x43d   : > { %v3134_v47 = vpop.f32.mrf.mxu1 }
 0x43f   : > { %v3135_v52 = vpop.f32.mrf.mxu1 }
 0x440   : > { %v3136_v48 = vadd.f32 %v3135_v52, %v3134_v47 }
 0x441   : > { %v3137_v46 = vpop.f32.mrf.mxu1 }
 0x443   : > { %v3138_v9 = vpop.f32.mrf.mxu1 }
 0x444   : > { %v3139_v33 = vadd.f32 %v3138_v9, %v3137_v46 }
 0x445   : > { %v3140_v17 = vpop.f32.mrf.mxu1 }
 0x447   : > { %v3141_v58 = vpop.f32.mrf.mxu1 }
 0x448   : > { %v3142_v25 = vadd.f32 %v3141_v58, %v3140_v17 }
 0x449   : > { %v3143_v1 = vpop.f32.mrf.mxu1 }
 0x44b   : > { %v3144_v21 = vpop.f32.mrf.mxu1 }
 0x44c   : > { %v3145_v36 = vadd.f32 %v3144_v21, %v3143_v1 }
 0x44d   : > { %v3162_v0 = vpop.f32.mrf.mxu1 }
 0x44f   : > { %v3163_v26 = vpop.f32.mrf.mxu1 }
 0x450   : > { %v3164_v5 = vadd.f32 %v3163_v26, %v3162_v0 }
 0x451   : > { %v3165_v20 = vpop.f32.mrf.mxu1 }
 0x452   : > { %v2249_v62 = vadd.f32 %v3164_v5, %v3124_v49 }
 0x453   : > { %v3166_v37 = vpop.f32.mrf.mxu1 }
 0x454   : > { %v2279_v3 = vadd.f32 %v2249_v62, %v2141_v54  ;;  %v3167_v56 = vadd.f32 %v3166_v37, %v3165_v20 }
 0x455   : > { %v3168_v40 = vpop.f32.mrf.mxu1 }
 0x456   : > { %2287 = vst [vmem:[#allocation3 + $0x30] sm:$0xff] %v2279_v3  ;;  %v2252_v31 = vadd.f32 %v3167_v56, %v3127_v63 }
 0x457   : > { %v3169_v43 = vpop.f32.mrf.mxu1 }
 0x458   : > { %v2280_v41 = vadd.f32 %v2252_v31, %v2142_v22  ;;  %v3170_v32 = vadd.f32 %v3169_v43, %v3168_v40 }
 0x459   : > { %v3171_v15 = vpop.f32.mrf.mxu1 }
 0x45a   : > { %2288 = vst [vmem:[#allocation3] sm:$0xff] %v2280_v41  ;;  %v2257_v42 = vadd.f32 %v3170_v32, %v3130_v38 }
 0x45b   : > { %v3172_v13 = vpop.f32.mrf.mxu1 }
 0x45c   : > { %v2281_v8 = vadd.f32 %v2257_v42, %v2143_v18  ;;  %v3173_v29 = vadd.f32 %v3172_v13, %v3171_v15 }
 0x45d   : > { %v3174_v35 = vpop.f32.mrf.mxu1 }
 0x45e   : > { %2289 = vst [vmem:[#allocation3 + $0x18] sm:$0xff] %v2281_v8  ;;  %v2260_v51 = vadd.f32 %v3173_v29, %v3133_v27 }
 0x45f   : > { %v3175_v55 = vpop.f32.mrf.mxu1 }
 0x460   : > { %v2282_v28 = vadd.f32 %v2260_v51, %v2144_v59  ;;  %v3176_v44 = vadd.f32 %v3175_v55, %v3174_v35 }
 0x461   : > { %v3177_v53 = vpop.f32.mrf.mxu1 }
 0x462   : > { %2290 = vst [vmem:[#allocation3 + $0x10] sm:$0xff] %v2282_v28  ;;  %v2265_v7 = vadd.f32 %v3176_v44, %v3136_v48 }
 0x463   : > { %v3178_v16 = vpop.f32.mrf.mxu1 }
 0x464   : > { %v2283_v57 = vadd.f32 %v2265_v7, %v2145_v12  ;;  %v3179_v19 = vadd.f32 %v3178_v16, %v3177_v53 }
 0x465   : > { %v3180_v60 = vpop.f32.mrf.mxu1 }
 0x466   : > { %2291 = vst [vmem:[#allocation3 + $0x8] sm:$0xff] %v2283_v57  ;;  %v2268_v14 = vadd.f32 %v3179_v19, %v3139_v33 }
 0x467   : > { %v3181_v24 = vpop.f32.mrf.mxu1 }
 0x468   : > { %v2284_v50 = vadd.f32 %v2268_v14, %v2146_v10  ;;  %v3182_v2 = vadd.f32 %v3181_v24, %v3180_v60 }
 0x469   : > { %v3183_v23 = vpop.f32.mrf.mxu1 }
 0x46a   : > { %2292 = vst [vmem:[#allocation3 + $0x20] sm:$0xff] %v2284_v50  ;;  %v2273_v30 = vadd.f32 %v3182_v2, %v3142_v25 }
 0x46b   : > { %v3184_v4 = vpop.f32.mrf.mxu1 }
 0x46c   : > { %v2285_v11 = vadd.f32 %v2273_v30, %v2147_v34  ;;  %v3185_v39 = vadd.f32 %v3184_v4, %v3183_v23 }
 0x46e   : > { %2293 = vst [vmem:[#allocation3 + $0x28] sm:$0xff] %v2285_v11  ;;  %v2276_v45 = vadd.f32 %v3185_v39, %v3145_v36  ;;  %2395 = sbr.rel (%p3007_p8) target bundleno = 1498 (0x5da), region = 88 }
 0x470   : > { %v2286_v61 = vadd.f32 %v2276_v45, %v2148_v6 }
 0x472   : > { %2294 = vst [vmem:[#allocation3 + $0x38] sm:$0xff] %v2286_v61 }
 0x473   : > { %v2406_v47 = vld [vmem:[#allocation4 + $0x10] sm:$0xff]  ;;  %v2404_v52 = vld [vmem:[#allocation4] sm:$0xff]  ;;  %v2407_v46 = vld [vmem:[#allocation4 + $0x18] sm:$0xff]  ;;  %v3974_v9 = vmov 0  }
 0x474   : > { %3711 = vset.pattern.permute.xlu1 %v3974_v9  ;;  %3710 = vset.pattern.permute.xlu0 %v3974_v9  ;;  %v2414_v17 = vmax.f32 %v2406_v47, 1.0  ;;  %v2412_v58 = vmax.f32 %v2404_v52, 1.0  ;;  %v2405_v0 = vld [vmem:[#allocation4 + $0x8] sm:$0xff]  ;;  %v2491_v1 = vld [vmem:[#allocation10 + $0x78] sm:$0xff]  ;;  %v2415_v21 = vmax.f32 %v2407_v46, 1.0  ;;  %v2490_v5 = vld [vmem:[#allocation10 + $0x70] sm:$0xff] }
 0x475   : > { %v2413_v26 = vmax.f32 %v2405_v0, 1.0  ;;  %v2627_v49 = vld [vmem:[#allocation11 + $0x78] sm:$0xff]  ;;  %v2626_v54 = vld [vmem:[#allocation11 + $0x70] sm:$0xff]  ;;  %v2409_v20 = vld [vmem:[#allocation4 + $0x28] sm:$0xff]  ;;  %3350 = vmatprep.subr.mxu0 %v2491_v1 }
 0x476   : > { %2432 = vperm.xlu1 %3711, %v2414_v17   ;;  %2422 = vperm.xlu0 %3710, %v2412_v58   ;;  %v2408_v62 = vld [vmem:[#allocation4 + $0x20] sm:$0xff]  ;;  %v2489_v37 = vld [vmem:[#allocation10 + $0x68] sm:$0xff]  ;;  %v2417_v3 = vmax.f32 %v2409_v20, 1.0  ;;  %v2411_v22 = vld [vmem:[#allocation4 + $0x38] sm:$0xff] }
 0x477   : > { %3394 = vmatprep.subr.mxu1 %v2627_v49  ;;  %3351 = vmatpush3.msra.mxu0 %v2491_v1  ;;  %v2625_v63 = vld [vmem:[#allocation11 + $0x68] sm:$0xff]  ;;  %v2416_v56 = vmax.f32 %v2408_v62, 1.0  ;;  %v2410_v40 = vld [vmem:[#allocation4 + $0x30] sm:$0xff]  ;;  %v2488_v31 = vld [vmem:[#allocation10 + $0x60] sm:$0xff]  ;;  %v2419_v38 = vmax.f32 %v2411_v22, 1.0 }
 0x478   : > { %3395 = vmatpush3.msra.mxu1 %v2627_v49  ;;  %3352 = vmatprep.subr.mxu0 %v2490_v5  ;;  %v2624_v43 = vld [vmem:[#allocation11 + $0x60] sm:$0xff]  ;;  %v2418_v41 = vmax.f32 %v2410_v40, 1.0  ;;  %v2487_v32 = vld [vmem:[#allocation10 + $0x58] sm:$0xff]  ;;  %v2486_v15 = vld [vmem:[#allocation10 + $0x50] sm:$0xff] }
 0x479   : > { %3396 = vmatprep.subr.mxu1 %v2626_v54  ;;  %3353 = vmatpush3.msra.mxu0 %v2490_v5  ;;  %v2623_v18 = vld [vmem:[#allocation11 + $0x58] sm:$0xff]  ;;  %v2622_v42 = vld [vmem:[#allocation11 + $0x50] sm:$0xff]  ;;  %v2485_v13 = vld [vmem:[#allocation10 + $0x48] sm:$0xff] }
 0x47a   : > { %2437 = vperm.xlu1 %3711, %v2415_v21   ;;  %2427 = vperm.xlu0 %3710, %v2413_v26   ;;  %v2621_v27 = vld [vmem:[#allocation11 + $0x48] sm:$0xff]  ;;  %v2484_v8 = vld [vmem:[#allocation10 + $0x40] sm:$0xff]  ;;  %v2483_v59 = vld [vmem:[#allocation10 + $0x38] sm:$0xff] }
 0x47b   : > { %3397 = vmatpush3.msra.mxu1 %v2626_v54  ;;  %3354 = vmatprep.subr.mxu0 %v2489_v37  ;;  %v2620_v29 = vld [vmem:[#allocation11 + $0x40] sm:$0xff]  ;;  %v2619_v35 = vld [vmem:[#allocation11 + $0x38] sm:$0xff]  ;;  %v2482_v51 = vld [vmem:[#allocation10 + $0x30] sm:$0xff] }
 0x47c   : > { %3398 = vmatprep.subr.mxu1 %v2625_v63  ;;  %3355 = vmatpush3.msra.mxu0 %v2489_v37  ;;  %v2618_v55 = vld [vmem:[#allocation11 + $0x30] sm:$0xff]  ;;  %v2481_v48 = vld [vmem:[#allocation10 + $0x28] sm:$0xff]  ;;  %v2480_v44 = vld [vmem:[#allocation10 + $0x20] sm:$0xff] }
 0x47d   : > { %3399 = vmatpush3.msra.mxu1 %v2625_v63  ;;  %3356 = vmatprep.subr.mxu0 %v2488_v31  ;;  %v2617_v28 = vld [vmem:[#allocation11 + $0x28] sm:$0xff]  ;;  %v2616_v12 = vld [vmem:[#allocation11 + $0x20] sm:$0xff]  ;;  %v2479_v53 = vld [vmem:[#allocation10 + $0x18] sm:$0xff] }
 0x47e   : > { %2447 = vperm.xlu1 %3711, %v2417_v3   ;;  %2442 = vperm.xlu0 %3710, %v2416_v56   ;;  %v2615_v7 = vld [vmem:[#allocation11 + $0x18] sm:$0xff]  ;;  %v2478_v16 = vld [vmem:[#allocation10 + $0x10] sm:$0xff]  ;;  %v2477_v57 = vld [vmem:[#allocation10 + $0x8] sm:$0xff] }
 0x47f   : > { %3400 = vmatprep.subr.mxu1 %v2624_v43  ;;  %3357 = vmatpush3.msra.mxu0 %v2488_v31  ;;  %v2614_v33 = vld [vmem:[#allocation11 + $0x10] sm:$0xff]  ;;  %v2613_v19 = vld [vmem:[#allocation11 + $0x8] sm:$0xff]  ;;  %v2476_v10 = vld [vmem:[#allocation10] sm:$0xff] }
 0x480   : > { %3401 = vmatpush3.msra.mxu1 %v2624_v43  ;;  %3358 = vmatprep.subr.mxu0 %v2487_v32  ;;  %v2612_v60 = vld [vmem:[#allocation11] sm:$0xff]  ;;  %v2605_v24 = vld [vmem:[#allocation5 + $0x8] sm:$0xff]  ;;  %v2606_v25 = vld [vmem:[#allocation5 + $0x10] sm:$0xff] }
 0x481   : > { %3402 = vmatprep.subr.mxu1 %v2623_v18  ;;  %3359 = vmatpush3.msra.mxu0 %v2487_v32  ;;  %v2604_v14 = vld [vmem:[#allocation5] sm:$0xff]  ;;  %v2607_v50 = vld [vmem:[#allocation5 + $0x18] sm:$0xff]  ;;  %v2609_v34 = vld [vmem:[#allocation5 + $0x28] sm:$0xff] }
 0x482   : > { %2457 = vperm.xlu1 %3711, %v2419_v38   ;;  %2452 = vperm.xlu0 %3710, %v2418_v41   ;;  %v2608_v2 = vld [vmem:[#allocation5 + $0x20] sm:$0xff]  ;;  %v2610_v23 = vld [vmem:[#allocation5 + $0x30] sm:$0xff]  ;;  %v2611_v30 = vld [vmem:[#allocation5 + $0x38] sm:$0xff] }
 0x483   : > { %3403 = vmatpush3.msra.mxu1 %v2623_v18  ;;  %3360 = vmatprep.subr.mxu0 %v2486_v15  ;;  %v2396_v52 = vld [vmem:[#allocation3 + $0x30] sm:$0xff]  ;;  %v2398_v58 = vld [vmem:[#allocation3 + $0x18] sm:$0xff]  ;;  %v2397_v0 = vld [vmem:[#allocation3] sm:$0xff] }
 0x484   : > { %3404 = vmatprep.subr.mxu1 %v2622_v42  ;;  %3361 = vmatpush3.msra.mxu0 %v2486_v15  ;;  %v2399_v5 = vld [vmem:[#allocation3 + $0x10] sm:$0xff]  ;;  %v2400_v54 = vld [vmem:[#allocation3 + $0x8] sm:$0xff]  ;;  %v2401_v3 = vld [vmem:[#allocation3 + $0x20] sm:$0xff] }
 0x485   : > { %3405 = vmatpush3.msra.mxu1 %v2622_v42  ;;  %3362 = vmatprep.subr.mxu0 %v2485_v13  ;;  %v2402_v56 = vld [vmem:[#allocation3 + $0x28] sm:$0xff]  ;;  %v2403_v38 = vld [vmem:[#allocation3 + $0x38] sm:$0xff]  ;;  %v3008_v42 = vld [vmem:[%s5469_s4] ss:$0 sm:$0xff] }
 0x486   : > { %3406 = vmatprep.subr.mxu1 %v2621_v27  ;;  %3363 = vmatpush3.msra.mxu0 %v2485_v13 }
 0x487   : > { %3407 = vmatpush3.msra.mxu1 %v2621_v27  ;;  %3364 = vmatprep.subr.mxu0 %v2484_v8 }
 0x488   : > { %3408 = vmatprep.subr.mxu1 %v2620_v29  ;;  %3365 = vmatpush3.msra.mxu0 %v2484_v8 }
 0x489   : > { %3409 = vmatpush3.msra.mxu1 %v2620_v29  ;;  %3366 = vmatprep.subr.mxu0 %v2483_v59 }
 0x48a   : > { %3410 = vmatprep.subr.mxu1 %v2619_v35  ;;  %3367 = vmatpush3.msra.mxu0 %v2483_v59 }
 0x48b   : > { %3411 = vmatpush3.msra.mxu1 %v2619_v35  ;;  %3368 = vmatprep.subr.mxu0 %v2482_v51 }
 0x48c   : > { %3412 = vmatprep.subr.mxu1 %v2618_v55  ;;  %3369 = vmatpush3.msra.mxu0 %v2482_v51 }
 0x48d   : > { %3413 = vmatpush3.msra.mxu1 %v2618_v55  ;;  %3370 = vmatprep.subr.mxu0 %v2481_v48 }
 0x48e   : > { %3414 = vmatprep.subr.mxu1 %v2617_v28  ;;  %3371 = vmatpush3.msra.mxu0 %v2481_v48 }
 0x48f   : > { %3415 = vmatpush3.msra.mxu1 %v2617_v28  ;;  %3372 = vmatprep.subr.mxu0 %v2480_v44 }
 0x490   : > { %3416 = vmatprep.subr.mxu1 %v2616_v12  ;;  %3373 = vmatpush3.msra.mxu0 %v2480_v44 }
 0x491   : > { %3417 = vmatpush3.msra.mxu1 %v2616_v12  ;;  %3374 = vmatprep.subr.mxu0 %v2479_v53 }
 0x492   : > { %3418 = vmatprep.subr.mxu1 %v2615_v7  ;;  %3375 = vmatpush3.msra.mxu0 %v2479_v53 }
 0x493   : > { %3419 = vmatpush3.msra.mxu1 %v2615_v7  ;;  %3376 = vmatprep.subr.mxu0 %v2478_v16 }
 0x494   : > { %3420 = vmatprep.subr.mxu1 %v2614_v33  ;;  %3377 = vmatpush3.msra.mxu0 %v2478_v16 }
 0x495   : > { %3421 = vmatpush3.msra.mxu1 %v2614_v33  ;;  %3378 = vmatprep.subr.mxu0 %v2477_v57 }
 0x496   : > { %3422 = vmatprep.subr.mxu1 %v2613_v19  ;;  %3379 = vmatpush3.msra.mxu0 %v2477_v57 }
 0x497   : > { %3423 = vmatpush3.msra.mxu1 %v2613_v19  ;;  %3380 = vmatprep.subr.mxu0 %v2476_v10 }
 0x498   : > { %3424 = vmatprep.subr.mxu1 %v2612_v60  ;;  %3381 = vmatpush3.msra.mxu0 %v2476_v10 }
 0x499   : > { %3425 = vmatpush3.msra.mxu1 %v2612_v60  ;;  %3426 = vmatprep.mubr.f32.mxu1 %v2604_v14 }
 0x49a   : > { %3427 = vmatmul.mubr.f32.vlgmr.msra.gmra.mxu1 %v2605_v24 }
 0x49b   : > { %3429 = vmatprep.mubr.f32.mxu1 %v2606_v25 }
 0x49e   : > { %3430 = vmatmul.mubr.f32.gmra.mxu1 %v2607_v50 }
 0x49f   : > { %3432 = vmatprep.mubr.f32.mxu1 %v2608_v2 }
 0x4a2   : > { %3433 = vmatmul.mubr.f32.gmra.mxu1 %v2609_v34 }
 0x4a3   : > { %3435 = vmatprep.mubr.f32.mxu1 %v2610_v23 }
 0x4a6   : > { %3436 = vmatmul.mubr.f32.gmra.mxu1 %v2611_v30 }
 0x4f1   : > { %v2433_v4 = vpop.permute.xlu1 %2432  ;;  %v2423_v36 = vpop.permute.xlu0 %2422 }
 0x4f2   : > { %3712 = vrcp.f32 %v2423_v36 }
 0x4f3   : > { %3714 = vrcp.f32 %v2433_v4 }
 0x4f5   : > { %v2438_v11 = vpop.permute.xlu1 %2437  ;;  %v2428_v39 = vpop.permute.xlu0 %2427 }
 0x4f6   : > { %3716 = vrcp.f32 %v2428_v39 }
 0x4f7   : > { %3718 = vrcp.f32 %v2438_v11 }
 0x4f9   : > { %v2448_v6 = vpop.permute.xlu1 %2447  ;;  %v2443_v45 = vpop.permute.xlu0 %2442 }
 0x4fa   : > { %3720 = vrcp.f32 %v2443_v45 }
 0x4fb   : > { %3722 = vrcp.f32 %v2448_v6 }
 0x4fd   : > { %v2453_v61 = vpop.permute.xlu0 %2452  ;;  %v2458_v47 = vpop.permute.xlu1 %2457 }
 0x4fe   : > { %3724 = vrcp.f32 %v2453_v61 }
 0x4ff   : > { %v3713_v46 = vpop.eup %3712  ;;  %3726 = vrcp.f32 %v2458_v47 }
 0x500   : > { %v3715_v9 = vpop.eup %3714  ;;  %v2461_v17 = vmul.f32 %v3713_v46, %v2396_v52 }
 0x501   : > { %v2465_v21 = vmul.f32 %v3715_v9, %v2398_v58 }
 0x502   : > { %3382 = vmatprep.mubr.f32.mxu0 %v2461_v17 }
 0x503   : > { %v3717_v1 = vpop.eup %3716 }
 0x504   : > { %v2463_v26 = vmul.f32 %v3717_v1, %v2397_v0  ;;  %v3719_v49 = vpop.eup %3718 }
 0x505   : > { %v2467_v62 = vmul.f32 %v3719_v49, %v2399_v5 }
 0x506   : > { %3383 = vmatmul.mubr.f32.vlgmr.msra.gmra.mxu0 %v2463_v26 }
 0x507   : > { %v3721_v20 = vpop.eup %3720  ;;  %3385 = vmatprep.mubr.f32.mxu0 %v2465_v21 }
 0x508   : > { %v2469_v37 = vmul.f32 %v3721_v20, %v2400_v54  ;;  %v3723_v63 = vpop.eup %3722 }
 0x509   : > { %v2471_v40 = vmul.f32 %v3723_v63, %v2401_v3 }
 0x50a   : > { %3386 = vmatmul.mubr.f32.gmra.mxu0 %v2467_v62 }
 0x50b   : > { %v3725_v22 = vpop.eup %3724  ;;  %3388 = vmatprep.mubr.f32.mxu0 %v2469_v37 }
 0x50c   : > { %v2473_v31 = vmul.f32 %v3725_v22, %v2402_v56  ;;  %v3727_v43 = vpop.eup %3726 }
 0x50d   : > { %v2475_v41 = vmul.f32 %v3727_v43, %v2403_v38 }
 0x50e   : > { %3389 = vmatmul.mubr.f32.gmra.mxu0 %v2471_v40 }
 0x50f   : > { %3391 = vmatprep.mubr.f32.mxu0 %v2473_v31 }
 0x512   : > { %3392 = vmatmul.mubr.f32.gmra.mxu0 %v2475_v41 }
 0x55a   : > { %v3428_v32 = vpop.f32.mrf.mxu1 }
 0x55c   : > { %v2694_v18 = vpop.f32.mrf.mxu1 }
 0x55e   : > { %v3431_v15 = vpop.f32.mrf.mxu1 }
 0x560   : > { %v2704_v27 = vpop.f32.mrf.mxu1 }
 0x562   : > { %v3434_v55 = vpop.f32.mrf.mxu1 }
 0x564   : > { %v2714_v16 = vpop.f32.mrf.mxu1 }
 0x566   : > { %v3437_v24 = vpop.f32.mrf.mxu1 }
 0x568   : > { %v2724_v30 = vpop.f32.mrf.mxu1 }
 0x5c6   : > { %v3384_v13 = vpop.f32.mrf.mxu0 }
 0x5c7   : > { %v2571_v8 = vadd.f32 %v3384_v13, %v3008_v42 }
 0x5c8   : > { %v2565_v29 = vpop.f32.mrf.mxu0 }
 0x5c9   : > { %v2734_v59 = vadd.f32 %v3428_v32, %v2571_v8  ;;  %v2566_v35 = vadd.f32 %v3008_v42, %v2565_v29 }
 0x5ca   : > { %v3387_v51 = vpop.f32.mrf.mxu0 }
 0x5cb   : > { %2742 = vst [vmem:[#allocation15 + $0x8] sm:$0xff] %v2734_v59  ;;  %v2733_v48 = vadd.f32 %v2694_v18, %v2566_v35  ;;  %v2581_v28 = vadd.f32 %v3387_v51, %v3008_v42 }
 0x5cc   : > { %v2575_v44 = vpop.f32.mrf.mxu0 }
 0x5cd   : > { %2741 = vst [vmem:[#allocation15] sm:$0xff] %v2733_v48  ;;  %v2736_v12 = vadd.f32 %v3431_v15, %v2581_v28  ;;  %v2576_v53 = vadd.f32 %v3008_v42, %v2575_v44 }
 0x5ce   : > { %v3390_v7 = vpop.f32.mrf.mxu0 }
 0x5cf   : > { %2744 = vst [vmem:[#allocation15 + $0x18] sm:$0xff] %v2736_v12  ;;  %v2735_v33 = vadd.f32 %v2704_v27, %v2576_v53  ;;  %v2591_v57 = vadd.f32 %v3390_v7, %v3008_v42 }
 0x5d0   : > { %v2585_v19 = vpop.f32.mrf.mxu0 }
 0x5d1   : > { %2743 = vst [vmem:[#allocation15 + $0x10] sm:$0xff] %v2735_v33  ;;  %v2738_v10 = vadd.f32 %v3434_v55, %v2591_v57  ;;  %v2586_v60 = vadd.f32 %v3008_v42, %v2585_v19 }
 0x5d2   : > { %v3393_v14 = vpop.f32.mrf.mxu0 }
 0x5d3   : > { %2746 = vst [vmem:[#allocation15 + $0x28] sm:$0xff] %v2738_v10  ;;  %v2737_v25 = vadd.f32 %v2714_v16, %v2586_v60  ;;  %v2601_v50 = vadd.f32 %v3393_v14, %v3008_v42 }
 0x5d4   : > { %v2595_v2 = vpop.f32.mrf.mxu0 }
 0x5d5   : > { %2745 = vst [vmem:[#allocation15 + $0x20] sm:$0xff] %v2737_v25  ;;  %v2740_v34 = vadd.f32 %v3437_v24, %v2601_v50  ;;  %v2596_v23 = vadd.f32 %v3008_v42, %v2595_v2 }
 0x5d7   : > { %2748 = vst [vmem:[#allocation15 + $0x38] sm:$0xff] %v2740_v34  ;;  %v2739_v4 = vadd.f32 %v2724_v30, %v2596_v23 }
 0x5d9   : > { %2747 = vst [vmem:[#allocation15 + $0x30] sm:$0xff] %v2739_v4 }
 0x5da PF: > { %p3531_p9 = scmp.eq.s32.totalorder %s4047_s13, 1  ;;  %s3975_s26 = smov [#allocation15]  }
 0x5db   : > { %s2755_s12 = sshll.u32 %s3975_s26, 4  ;;  %s2756_s12 = int_to_ptr.vmem [resolvable:$true] %s2755_s12 }
 0x5dc   : > { %s3888_s15 = scalar_lea.vmem %s2756_s12, 1024  ;;  %p3895_p11 = scmp.lt.s32.totalorder %s2756_s12, %s2756_s12 }
 0x5dd   : > { %p3889_p7 = scmp.ne.s32.totalorder %s2756_s12, %s3888_s15  ;;  %p3896_p12 = scmp.lt.s32.totalorder %s3888_s15, %s3888_s15 }
 0x5df   : > { %p3890_p10 = pnand %p3889_p7, %p3531_p9  ;;  %p3897_p0 = por %p3896_p12, %p3895_p11 }
 0x5e1   : > { %p3891_p2 = pneg %p3890_p10 }
 0x5e3   : > { %p3898_p3 = pnand %p3897_p0, %p3891_p2 }
 0x5e5   : > { %3901 = shalt.err (!%p3898_p3)
}
 0x5e6   : > { %s3976_s23 = smov 128   ;;  %s3977_s28 = smov 8  }
 0x5e7   : > { %3499 = dma.vmem_to_hbm [thread:$0]  (%p3531_p9), %s2756_s12, 1024, %s5474_s9, [#allocation7], %s3976_s23, %s3976_s23, %s3977_s28  }
 0x5e8   : > { %3945 = dma.done.wait (%p3531_p9), [#allocation7], 1024  }
 0x5e9   : > { %3947 = vsyncadd (%p3531_p9), [#allocation7], 4294966272 }
 0x5ea PF: > { %p20_p1 = scmp.ge.s32.totalorder %s4097_s29, 4   ;;  %s5700_s30 = smov %s3954_s10 }
 0x5eb   : > { %s5701_s10 = smov %s3958_s11  ;;  %s5702_s11 = smov %s4108_s19 }
 0x5ec   : > { %s5703_s12 = smov %s4097_s29  ;;  %22 = sbr.rel (!%p20_p1) target bundleno = 9 (0x9), region = 131 }
 0x5f1   :  { %2771 = vsyncpa [#allocation6], 1 }
 0x5f2   :  { %2773 = vsyncpa [#allocation6 + $0x1], 1 }
 0x5f3   :  { %2774 = vsyncpa [#allocation9], 1 }
 0x5f4   :  { %2775 = vsyncpa [#allocation12], 1 }
 0x5f5   :  { %2776 = vsyncpa [#allocation7], 1 }
 0x5f6   :  { %2778 = vsyncpa [#allocation7 + $0x1], 1 }

</bundles_post_ra>
